<compile_context>
chip_gen: v6e
topology: v6e:2x2x1
jax: 0.10.0
libtpu: 0.0.40
codegen_flags: <defaults>
</compile_context>

<pallas_src>
import jax
import jax.numpy as jnp
from jax.experimental import pallas as pl
from jax.experimental.pallas import tpu as pltpu

ATTN_EPS = 1e-4   # BiFPN fast-attention epsilon
BN_EPS = 1e-3     # BatchNorm eps (momentum irrelevant in inference)


def _ceil_to(x, m):
    return ((x + m - 1) // m) * m


# ----------------------------- Pallas kernels -----------------------------

def _conv1x1_cm_kernel(x_ref, w_ref, b_ref, o_ref):
    # x: (1, Cin, M)  w: (Cout, Cin) [BN folded]  b: (Cout, 1)  o: (1, Cout, M)
    o_ref[0] = (jnp.dot(w_ref[...], x_ref[0],
                        preferred_element_type=jnp.float32) + b_ref[...])


def _make_fused_sepconv_cm_kernel(n_inputs, width, m_len, s_len, has_extra):
    """Fused: fast-attention sum -> swish -> dw3x3 -> pw1x1(+BN) [-> extra 1x1].

    Channel-major: activations are (C, M), C on sublanes, flat M = H*W on
    lanes.  The 9 depthwise taps are lane rolls of a zero-padded (C, S)
    buffer; with S >= M + width + 1 the cyclic wrap lands in the zero pad,
    which *is* the SAME vertical zero padding.  Horizontal wrap of the flat
    layout is cancelled by iota left/right edge masks (computed in-kernel).
    """
    def kernel(wn_ref, *refs):
        i = 0
        x_refs = refs[i:i + n_inputs]; i += n_inputs
        wdw_ref = refs[i]; i += 1
        wpw_ref = refs[i]; bpw_ref = refs[i + 1]; i += 2
        if has_extra:
            wex_ref = refs[i]; bex_ref = refs[i + 1]; i += 2
        o_ref = refs[i]; i += 1
        oex_ref = refs[i] if has_extra else None
        pbuf_ref = refs[-1]

        # ---- fast-attention weighted sum (pre-normalized) + exact swish ----
        s = x_refs[0][0] * wn_ref[0]
        for j in range(1, n_inputs):
            s = s + x_refs[j][0] * wn_ref[j]
        s = s * pl.reciprocal(1.0 + jnp.exp(-s))        # swish, exact sigmoid

        # ---- depthwise 3x3 (SAME zero pad) via lane rolls ------------------
        pbuf_ref[...] = jnp.zeros_like(pbuf_ref)        # zero pad region
        pbuf_ref[:, 0:m_len] = s
        pb = pbuf_ref[...]                              # (C, S)

        lane = jax.lax.broadcasted_iota(jnp.int32, (1, s_len), 1)
        col = lane % width
        not_left = (col != 0).astype(jnp.float32)       # taps reading x-1
        not_right = (col != width - 1).astype(jnp.float32)  # taps reading x+1

        acc = jnp.zeros(pb.shape, jnp.float32)
        for k in range(9):
            dy, dx = k // 3, k % 3
            off = (dy - 1) * width + (dx - 1)           # flat tap offset
            t = pb if off == 0 else pltpu.roll(pb, (-off) % s_len, axis=1)
            if dx == 0:
                t = t * not_left
            elif dx == 2:
                t = t * not_right
            acc = acc + t * wdw_ref[k]                  # (C,S) * (C,1)
        acc = acc[:, 0:m_len]

        # ---- pointwise 1x1 + folded BN -> lane-dense (Cout, M) output ------
        out1 = (jnp.dot(wpw_ref[...], acc,
                        preferred_element_type=jnp.float32) + bpw_ref[...])
        o_ref[0] = out1
        if has_extra:   # fused follow-up 1x1 conv (+BN) on this block's output
            oex_ref[0] = (jnp.dot(wex_ref[...], out1,
                                  preferred_element_type=jnp.float32)
                          + bex_ref[...])
    return kernel


def _make_pool_conv_cm_kernel(wo, mo, so):
    """Fused MaxPool2dStaticSamePadding(3,2) + channel-up 1x1 conv (+BN).

    Works on the four 2x2 phase planes of the UNPADDED input, each (C, Mo)
    channel-major flat.  Window taps are lane rolls of a zero-padded (C, So)
    buffer; the bottom/right static-SAME zero padding falls out of the zero
    fill / the right-edge mask (pad value 0 participates in the max, matching
    torch F.pad + MaxPool2d).  Only the decimated output is computed, and the
    1x1 conv is applied before the (lane-dense) store.
    """
    def kernel(p00_ref, p01_ref, p10_ref, p11_ref, w_ref, b_ref, o_ref,
               buf_ref):
        lane = jax.lax.broadcasted_iota(jnp.int32, (1, so), 1)
        not_right = ((lane % wo) != wo - 1).astype(jnp.float32)
        s1 = (-1) % so
        sw = (-wo) % so
        sw1 = (-(wo + 1)) % so

        def padded(ref):
            buf_ref[...] = jnp.zeros_like(buf_ref)
            buf_ref[:, 0:mo] = ref[0]
            return buf_ref[...]

        p00 = padded(p00_ref)                          # taps (0,0)(0,2)(2,0)(2,2)
        m = p00
        m = jnp.maximum(m, pltpu.roll(p00, s1, axis=1) * not_right)
        m = jnp.maximum(m, pltpu.roll(p00, sw, axis=1))
        m = jnp.maximum(m, pltpu.roll(p00, sw1, axis=1) * not_right)

        p01 = padded(p01_ref)                          # taps (0,1)(2,1)
        m = jnp.maximum(m, p01)
        m = jnp.maximum(m, pltpu.roll(p01, sw, axis=1))

        p10 = padded(p10_ref)                          # taps (1,0)(1,2)
        m = jnp.maximum(m, p10)
        m = jnp.maximum(m, pltpu.roll(p10, s1, axis=1) * not_right)

        pooled = jnp.maximum(m[:, 0:mo], p11_ref[0])   # tap (1,1)

        o_ref[0] = (jnp.dot(w_ref[...], pooled,
                            preferred_element_type=jnp.float32) + b_ref[...])
    return kernel


# ------------------------------- wrappers ---------------------------------

def conv1x1_bn_cm(x, w_cm, b_cm):
    """1x1 conv + bias + BatchNorm (inference, folded), channel-major flat."""
    n, cin, m = x.shape
    cout = w_cm.shape[0]
    return pl.pallas_call(
        _conv1x1_cm_kernel,
        out_shape=jax.ShapeDtypeStruct((n, cout, m), jnp.float32),
        grid=(n,),
        in_specs=[pl.BlockSpec((1, cin, m), lambda b: (b, 0, 0)),
                  pl.BlockSpec((cout, cin), lambda b: (0, 0)),
                  pl.BlockSpec((cout, 1), lambda b: (0, 0))],
        out_specs=pl.BlockSpec((1, cout, m), lambda b: (b, 0, 0)),
        compiler_params=pltpu.CompilerParams(
            dimension_semantics=("parallel",)),
    )(x, w_cm, b_cm)


def fused_sepconv_cm(w_attn, inputs, p, height, width, extra=None):
    """swish(fast-attention sum) -> SeparableConvBlock (dw3x3 -> pw1x1 -> BN),
    optionally followed by a fused extra 1x1 conv head, one pallas_call,
    grid over batch ("parallel")."""
    n_in = len(inputs)
    n, c, m = inputs[0].shape
    assert m == height * width
    s_len = _ceil_to(m + width + 2, 128)
    cout = p["w"].shape[0]

    # fast-attention scalars: relu + 1/(sum+eps) normalization (tiny, XLA side)
    wr = jax.nn.relu(w_attn)
    wn = wr / (jnp.sum(wr) + ATTN_EPS)

    has_extra = extra is not None
    kernel = _make_fused_sepconv_cm_kernel(n_in, width, m, s_len, has_extra)

    smem_spec = pl.BlockSpec((n_in,), lambda b: (0,),
                             memory_space=pltpu.MemorySpace.SMEM)
    feat_spec = pl.BlockSpec((1, c, m), lambda b: (b, 0, 0))

    def const_spec(shape):
        nd = len(shape)
        return pl.BlockSpec(shape, lambda b, _nd=nd: (0,) * _nd)

    in_specs = [smem_spec] + [feat_spec] * n_in + [
        const_spec((9, c, 1)), const_spec((cout, c)), const_spec((cout, 1))]
    args = [wn] + list(inputs) + [p["wdw"], p["w"], p["b"]]
    out_shape = [jax.ShapeDtypeStruct((n, cout, m), jnp.float32)]
    out_specs = [pl.BlockSpec((1, cout, m), lambda b: (b, 0, 0))]
    if has_extra:
        w2, b2 = extra
        c2 = w2.shape[0]
        in_specs += [const_spec((c2, cout)), const_spec((c2, 1))]
        args += [w2, b2]
        out_shape.append(jax.ShapeDtypeStruct((n, c2, m), jnp.float32))
        out_specs.append(pl.BlockSpec((1, c2, m), lambda b: (b, 0, 0)))

    outs = pl.pallas_call(
        kernel,
        out_shape=tuple(out_shape),
        grid=(n,),
        in_specs=in_specs,
        out_specs=tuple(out_specs),
        scratch_shapes=[pltpu.VMEM((c, s_len), jnp.float32)],
        compiler_params=pltpu.CompilerParams(
            dimension_semantics=("parallel",)),
    )(*args)
    if has_extra:
        return outs[0], outs[1]
    return outs[0] if isinstance(outs, (tuple, list)) else outs


def maxpool3x3s2_conv1x1_cm(x, height, width, w_cm, b_cm):
    """MaxPool2dStaticSamePadding(3, 2) fused with the following 1x1 conv+BN."""
    n, c, m = x.shape
    assert m == height * width and height % 2 == 0 and width % 2 == 0
    ho, wo = height // 2, width // 2
    mo = ho * wo
    so = _ceil_to(mo + wo + 2, 128)
    cout = w_cm.shape[0]
    x4 = x.reshape(n, c, height, width)
    # 2x2 phase split of the UNPADDED input (XLA glue; no jnp.pad copies --
    # the bottom/right zero pad is recreated in-kernel).
    phases = [x4[:, :, r::2, s::2].reshape(n, c, mo)
              for r in (0, 1) for s in (0, 1)]
    ph_spec = pl.BlockSpec((1, c, mo), lambda b: (b, 0, 0))
    return pl.pallas_call(
        _make_pool_conv_cm_kernel(wo, mo, so),
        out_shape=jax.ShapeDtypeStruct((n, cout, mo), jnp.float32),
        grid=(n,),
        in_specs=[ph_spec] * 4 + [
            pl.BlockSpec((cout, c), lambda b: (0, 0)),
            pl.BlockSpec((cout, 1), lambda b: (0, 0))],
        out_specs=pl.BlockSpec((1, cout, mo), lambda b: (b, 0, 0)),
        scratch_shapes=[pltpu.VMEM((c, so), jnp.float32)],
        compiler_params=pltpu.CompilerParams(
            dimension_semantics=("parallel",)),
    )(*phases, w_cm, b_cm)


def upsample2x_cm(x, height, width):
    # nn.Upsample(scale_factor=2, mode='nearest'), channel-major flat layout.
    # TODO(synk): left as XLA data movement; fusing the nearest repeat into the
    # consuming sepconv kernel would require an in-kernel lane gather.
    n, c, m = x.shape
    x4 = x.reshape(n, c, height, width)
    x4 = jnp.repeat(jnp.repeat(x4, 2, axis=2), 2, axis=3)
    return x4.reshape(n, c, 4 * m)


# ---------------------------- parameter setup -----------------------------

def _conv1x1_params_cm(key, cin, cout):
    k1, k2, k3, k4 = jax.random.split(key, 4)
    w = 0.1 * jax.random.normal(k1, (cout, cin), jnp.float32)
    b = 0.1 * jax.random.normal(k2, (cout,), jnp.float32)
    gamma = 1.0 + 0.1 * jax.random.normal(k3, (cout,), jnp.float32)
    beta = 0.1 * jax.random.normal(k4, (cout,), jnp.float32)
    mean = jnp.zeros((cout,), jnp.float32)
    var = jnp.ones((cout,), jnp.float32)
    scale = gamma / jnp.sqrt(var + BN_EPS)
    shift = beta - mean * scale
    # fold bias + BN into the matmul:  scale*(W x + b) + shift
    return dict(w=w * scale[:, None], b=(b * scale + shift)[:, None])


def _sepconv_params_cm(key, c):
    k1, k2 = jax.random.split(key)
    wdw = 0.1 * jax.random.normal(k1, (9, c, 1), jnp.float32)  # depthwise, no bias
    pw = _conv1x1_params_cm(k2, c, c)                          # pointwise + BN
    return dict(wdw=wdw, w=pw["w"], b=pw["b"])


def init_bifpn3_params(key, conv_channels):
    C3, C4, C5 = conv_channels
    keys = jax.random.split(key, 13)
    p3_dc = _conv1x1_params_cm(keys[0], C3, C3)
    p4_dc = _conv1x1_params_cm(keys[1], C4, C4)
    p5_dc = _conv1x1_params_cm(keys[2], C5, C5)
    p4_dc2 = _conv1x1_params_cm(keys[3], C4, C4)
    p5_dc2 = _conv1x1_params_cm(keys[4], C5, C5)
    p41_dc = _conv1x1_params_cm(keys[5], C5, C4)
    p31_dc = _conv1x1_params_cm(keys[6], C4, C3)
    p42_uc = _conv1x1_params_cm(keys[7], C3, C4)
    p52_uc = _conv1x1_params_cm(keys[8], C4, C5)

    # compose p41_down_channel ∘ p5_down_channel (p5_in feeds only p41) - exact
    w41 = p41_dc["w"] @ p5_dc["w"]
    b41 = p41_dc["w"] @ p5_dc["b"] + p41_dc["b"]

    # merge the twin down-channel convs on the same input (single HBM pass)
    p4_merged = dict(w=jnp.concatenate([p4_dc["w"], p4_dc2["w"]], axis=0),
                     b=jnp.concatenate([p4_dc["b"], p4_dc2["b"]], axis=0))
    p5_merged = dict(w=jnp.concatenate([w41, p5_dc2["w"]], axis=0),
                     b=jnp.concatenate([b41, p5_dc2["b"]], axis=0))

    return dict(
        p3_dc=p3_dc, p4_merged=p4_merged, p5_merged=p5_merged,
        p31_dc=p31_dc, p42_uc=p42_uc, p52_uc=p52_uc,
        conv4_up=_sepconv_params_cm(keys[9], C4),
        conv3_up=_sepconv_params_cm(keys[10], C3),
        conv4_down=_sepconv_params_cm(keys[11], C4),
        conv5_down=_sepconv_params_cm(keys[12], C5),
        # fast-attention weights (torch init: ones)
        p4_w1=jnp.ones((2,), jnp.float32),
        p3_w1=jnp.ones((2,), jnp.float32),
        p4_w2=jnp.ones((3,), jnp.float32),
        p5_w2=jnp.ones((2,), jnp.float32),
    )


# ------------------------------ forward pass ------------------------------

def bifpn3_forward(params, p3, p4, p5):
    """BiFPN3._forward_fast_attention with first_time=True, attention=True.
    Inputs/outputs are NCHW (like PyTorch)."""
    N, C3, H3, W3 = p3.shape
    _, C4, H4, W4 = p4.shape
    _, C5, H5, W5 = p5.shape
    p3f = p3.reshape(N, C3, H3 * W3)
    p4f = p4.reshape(N, C4, H4 * W4)
    p5f = p5.reshape(N, C5, H5 * W5)

    # ---- down-channel (first_time), merged / composed 1x1 convs -----------
    p3_in = conv1x1_bn_cm(p3f, params["p3_dc"]["w"], params["p3_dc"]["b"])
    p4_both = conv1x1_bn_cm(p4f, params["p4_merged"]["w"],
                            params["p4_merged"]["b"])
    p4_in, p4_in2 = p4_both[:, :C4, :], p4_both[:, C4:, :]
    p5_both = conv1x1_bn_cm(p5f, params["p5_merged"]["w"],
                            params["p5_merged"]["b"])
    t5to4, p5_in2 = p5_both[:, :C4, :], p5_both[:, C4:, :]   # (p41∘p5_dc), p5_dc2

    # ---- P4 top-down (p31 down-channel fused as a second output head) -----
    t = upsample2x_cm(t5to4, H5, W5)                # 1x1 conv commuted w/ upsample
    p4_up, t4to3 = fused_sepconv_cm(
        params["p4_w1"], [p4_in, t], params["conv4_up"], H4, W4,
        extra=(params["p31_dc"]["w"], params["p31_dc"]["b"]))

    # ---- P3 output ---------------------------------------------------------
    t = upsample2x_cm(t4to3, H4, W4)
    p3_out = fused_sepconv_cm(params["p3_w1"], [p3_in, t],
                              params["conv3_up"], H3, W3)

    # ---- P4 bottom-up (maxpool + p42 up-channel fused into one kernel) ----
    t = maxpool3x3s2_conv1x1_cm(p3_out, H3, W3,
                                params["p42_uc"]["w"], params["p42_uc"]["b"])
    p4_out = fused_sepconv_cm(params["p4_w2"], [p4_in2, p4_up, t],
                              params["conv4_down"], H4, W4)

    # ---- P5 bottom-up ------------------------------------------------------
    t = maxpool3x3s2_conv1x1_cm(p4_out, H4, W4,
                                params["p52_uc"]["w"], params["p52_uc"]["b"])
    p5_out = fused_sepconv_cm(params["p5_w2"], [p5_in2, t],
                              params["conv5_down"], H5, W5)

    return (p3_out.reshape(N, C3, H3, W3),
            p4_out.reshape(N, C4, H4, W4),
            p5_out.reshape(N, C5, H5, W5))


# ---------------------------------- main -----------------------------------

if __name__ == "__main__":
    conv_channels = (8, 16, 32)        # (C3, C4, C5)
    N = 2
    key = jax.random.PRNGKey(0)
    kp3, kp4, kp5, kpar = jax.random.split(key, 4)

    # NCHW inputs (like PyTorch); spatial pyramid: p3 = 2x p4 = 4x p5
    p3 = jax.random.normal(kp3, (N, conv_channels[0], 32, 32), jnp.float32)
    p4 = jax.random.normal(kp4, (N, conv_channels[1], 16, 16), jnp.float32)
    p5 = jax.random.normal(kp5, (N, conv_channels[2], 8, 8), jnp.float32)

    params = init_bifpn3_params(kpar, conv_channels)

    fwd = jax.jit(bifpn3_forward)
    p3_out, p4_out, p5_out = fwd(params, p3, p4, p5)
    jax.block_until_ready((p3_out, p4_out, p5_out))

    assert p3_out.shape == (N, conv_channels[0], 32, 32)
    assert p4_out.shape == (N, conv_channels[1], 16, 16)
    assert p5_out.shape == (N, conv_channels[2], 8, 8)
    print("KERNEL_OK")
</pallas_src>

<mosaic_0001>
module attributes {stable_mosaic.version = 11 : i64} {
  func.func @_conv1x1_cm_kernel(%arg0: i32, %arg1: memref<1x32x64xf32, #tpu.memory_space<vmem>>, %arg2: memref<48x32xf32, #tpu.memory_space<vmem>>, %arg3: memref<48x1xf32, #tpu.memory_space<vmem>>, %arg4: memref<1x48x64xf32, #tpu.memory_space<vmem>>) attributes {dimension_semantics = [#tpu.dimension_semantics<parallel>], iteration_bounds = array<i64: 2>, scalar_prefetch = 0 : i64, scratch_operands = 0 : i64, tpu.core_type = #tpu.core_type<tc>, window_params = [{transform_indices = @transform_0, window_bounds = array<i64: 1, 32, 64>}, {pipeline_mode = #tpu.pipeline_mode<synchronous>, transform_indices = @transform_1, window_bounds = array<i64: 48, 32>}, {pipeline_mode = #tpu.pipeline_mode<synchronous>, transform_indices = @transform_2, window_bounds = array<i64: 48, 1>}, {transform_indices = @transform_3, window_bounds = array<i64: 1, 48, 64>}]} {
    %c0 = arith.constant 0 : index
    %c0_0 = arith.constant 0 : index
    %0 = vector.load %arg2[%c0, %c0_0] : memref<48x32xf32, #tpu.memory_space<vmem>>, vector<48x32xf32>
    %c0_1 = arith.constant 0 : index
    %c0_2 = arith.constant 0 : index
    %c0_3 = arith.constant 0 : index
    %1 = vector.load %arg1[%c0_1, %c0_2, %c0_3] : memref<1x32x64xf32, #tpu.memory_space<vmem>>, vector<1x32x64xf32>
    %2 = vector.shape_cast %1 : vector<1x32x64xf32> to vector<32x64xf32>
    %cst = arith.constant dense<0.000000e+00> : vector<48x64xf32>
    %3 = tpu.matmul %0, %2, %cst {dimension_numbers = #tpu.dot_dimension_numbers<[1], [0], [0], [1], [0, 0, 1, 1], [], []>} : vector<48x32xf32>, vector<32x64xf32>, vector<48x64xf32> -> vector<48x64xf32>
    %c0_4 = arith.constant 0 : index
    %c0_5 = arith.constant 0 : index
    %4 = vector.load %arg3[%c0_4, %c0_5] : memref<48x1xf32, #tpu.memory_space<vmem>>, vector<48x1xf32>
    %5 = vector.broadcast %4 : vector<48x1xf32> to vector<48x64xf32>
    %6 = arith.addf %3, %5 : vector<48x64xf32>
    %c0_6 = arith.constant 0 : index
    %c0_7 = arith.constant 0 : index
    %c0_8 = arith.constant 0 : index
    %7 = vector.load %arg4[%c0_6, %c0_7, %c0_8] : memref<1x48x64xf32, #tpu.memory_space<vmem>>, vector<1x48x64xf32>
    %8 = vector.shape_cast %7 : vector<1x48x64xf32> to vector<48x64xf32>
    %9 = vector.shape_cast %6 : vector<48x64xf32> to vector<1x48x64xf32>
    tpu.vector_store %arg4[%c0_6, %c0_7, %c0_8], %9 {strides = array<i32>} : memref<1x48x64xf32, #tpu.memory_space<vmem>>, vector<1x48x64xf32>,
    return
  }
  func.func @transform_0(%arg0: i32) -> (i32, i32, i32) {
    %c0_i32 = arith.constant 0 : i32
    %c0_i32_0 = arith.constant 0 : i32
    %c0_i32_1 = arith.constant 0 : i32
    return %arg0, %c0_i32, %c0_i32_0 : i32, i32, i32
  }
  func.func @transform_1(%arg0: i32) -> (i32, i32) {
    %c0_i32 = arith.constant 0 : i32
    %c0_i32_0 = arith.constant 0 : i32
    %c0_i32_1 = arith.constant 0 : i32
    return %c0_i32, %c0_i32_0 : i32, i32
  }
  func.func @transform_2(%arg0: i32) -> (i32, i32) {
    %c0_i32 = arith.constant 0 : i32
    %c0_i32_0 = arith.constant 0 : i32
    %c0_i32_1 = arith.constant 0 : i32
    return %c0_i32, %c0_i32_0 : i32, i32
  }
  func.func @transform_3(%arg0: i32) -> (i32, i32, i32) {
    %c0_i32 = arith.constant 0 : i32
    %c0_i32_0 = arith.constant 0 : i32
    %c0_i32_1 = arith.constant 0 : i32
    return %arg0, %c0_i32, %c0_i32_0 : i32, i32, i32
  }
}

module attributes {stable_mosaic.version = 11 : i64} {
  func.func @_conv1x1_cm_kernel(%arg0: i32, %arg1: memref<1x16x256xf32, #tpu.memory_space<vmem>>, %arg2: memref<32x16xf32, #tpu.memory_space<vmem>>, %arg3: memref<32x1xf32, #tpu.memory_space<vmem>>, %arg4: memref<1x32x256xf32, #tpu.memory_space<vmem>>) attributes {dimension_semantics = [#tpu.dimension_semantics<parallel>], iteration_bounds = array<i64: 2>, scalar_prefetch = 0 : i64, scratch_operands = 0 : i64, tpu.core_type = #tpu.core_type<tc>, window_params = [{transform_indices = @transform_0, window_bounds = array<i64: 1, 16, 256>}, {pipeline_mode = #tpu.pipeline_mode<synchronous>, transform_indices = @transform_1, window_bounds = array<i64: 32, 16>}, {pipeline_mode = #tpu.pipeline_mode<synchronous>, transform_indices = @transform_2, window_bounds = array<i64: 32, 1>}, {transform_indices = @transform_3, window_bounds = array<i64: 1, 32, 256>}]} {
    %c0 = arith.constant 0 : index
    %c0_0 = arith.constant 0 : index
    %0 = vector.load %arg2[%c0, %c0_0] : memref<32x16xf32, #tpu.memory_space<vmem>>, vector<32x16xf32>
    %c0_1 = arith.constant 0 : index
    %c0_2 = arith.constant 0 : index
    %c0_3 = arith.constant 0 : index
    %1 = vector.load %arg1[%c0_1, %c0_2, %c0_3] : memref<1x16x256xf32, #tpu.memory_space<vmem>>, vector<1x16x256xf32>
    %2 = vector.shape_cast %1 : vector<1x16x256xf32> to vector<16x256xf32>
    %cst = arith.constant dense<0.000000e+00> : vector<32x256xf32>
    %3 = tpu.matmul %0, %2, %cst {dimension_numbers = #tpu.dot_dimension_numbers<[1], [0], [0], [1], [0, 0, 1, 1], [], []>} : vector<32x16xf32>, vector<16x256xf32>, vector<32x256xf32> -> vector<32x256xf32>
    %c0_4 = arith.constant 0 : index
    %c0_5 = arith.constant 0 : index
    %4 = vector.load %arg3[%c0_4, %c0_5] : memref<32x1xf32, #tpu.memory_space<vmem>>, vector<32x1xf32>
    %5 = vector.broadcast %4 : vector<32x1xf32> to vector<32x256xf32>
    %6 = arith.addf %3, %5 : vector<32x256xf32>
    %c0_6 = arith.constant 0 : index
    %c0_7 = arith.constant 0 : index
    %c0_8 = arith.constant 0 : index
    %7 = vector.load %arg4[%c0_6, %c0_7, %c0_8] : memref<1x32x256xf32, #tpu.memory_space<vmem>>, vector<1x32x256xf32>
    %8 = vector.shape_cast %7 : vector<1x32x256xf32> to vector<32x256xf32>
    %9 = vector.shape_cast %6 : vector<32x256xf32> to vector<1x32x256xf32>
    tpu.vector_store %arg4[%c0_6, %c0_7, %c0_8], %9 {strides = array<i32>} : memref<1x32x256xf32, #tpu.memory_space<vmem>>, vector<1x32x256xf32>,
    return
  }
  func.func @transform_0(%arg0: i32) -> (i32, i32, i32) {
    %c0_i32 = arith.constant 0 : i32
    %c0_i32_0 = arith.constant 0 : i32
    %c0_i32_1 = arith.constant 0 : i32
    return %arg0, %c0_i32, %c0_i32_0 : i32, i32, i32
  }
  func.func @transform_1(%arg0: i32) -> (i32, i32) {
    %c0_i32 = arith.constant 0 : i32
    %c0_i32_0 = arith.constant 0 : i32
    %c0_i32_1 = arith.constant 0 : i32
    return %c0_i32, %c0_i32_0 : i32, i32
  }
  func.func @transform_2(%arg0: i32) -> (i32, i32) {
    %c0_i32 = arith.constant 0 : i32
    %c0_i32_0 = arith.constant 0 : i32
    %c0_i32_1 = arith.constant 0 : i32
    return %c0_i32, %c0_i32_0 : i32, i32
  }
  func.func @transform_3(%arg0: i32) -> (i32, i32, i32) {
    %c0_i32 = arith.constant 0 : i32
    %c0_i32_0 = arith.constant 0 : i32
    %c0_i32_1 = arith.constant 0 : i32
    return %arg0, %c0_i32, %c0_i32_0 : i32, i32, i32
  }
}

module attributes {stable_mosaic.version = 11 : i64} {
  func.func @kernel(%arg0: i32, %arg1: memref<2xf32, #tpu.memory_space<smem>>, %arg2: memref<1x16x256xf32, #tpu.memory_space<vmem>>, %arg3: memref<1x16x256xf32, #tpu.memory_space<vmem>>, %arg4: memref<9x16x1xf32, #tpu.memory_space<vmem>>, %arg5: memref<16x16xf32, #tpu.memory_space<vmem>>, %arg6: memref<16x1xf32, #tpu.memory_space<vmem>>, %arg7: memref<8x16xf32, #tpu.memory_space<vmem>>, %arg8: memref<8x1xf32, #tpu.memory_space<vmem>>, %arg9: memref<1x16x256xf32, #tpu.memory_space<vmem>>, %arg10: memref<1x8x256xf32, #tpu.memory_space<vmem>>, %arg11: memref<16x384xf32, #tpu.memory_space<vmem>>) attributes {dimension_semantics = [#tpu.dimension_semantics<parallel>], iteration_bounds = array<i64: 2>, scalar_prefetch = 0 : i64, scratch_operands = 1 : i64, tpu.core_type = #tpu.core_type<tc>, window_params = [{transform_indices = @transform_0, window_bounds = array<i64: 2>}, {transform_indices = @transform_1, window_bounds = array<i64: 1, 16, 256>}, {transform_indices = @transform_2, window_bounds = array<i64: 1, 16, 256>}, {pipeline_mode = #tpu.pipeline_mode<synchronous>, transform_indices = @transform_3, window_bounds = array<i64: 9, 16, 1>}, {pipeline_mode = #tpu.pipeline_mode<synchronous>, transform_indices = @transform_4, window_bounds = array<i64: 16, 16>}, {pipeline_mode = #tpu.pipeline_mode<synchronous>, transform_indices = @transform_5, window_bounds = array<i64: 16, 1>}, {pipeline_mode = #tpu.pipeline_mode<synchronous>, transform_indices = @transform_6, window_bounds = array<i64: 8, 16>}, {pipeline_mode = #tpu.pipeline_mode<synchronous>, transform_indices = @transform_7, window_bounds = array<i64: 8, 1>}, {transform_indices = @transform_8, window_bounds = array<i64: 1, 16, 256>}, {transform_indices = @transform_9, window_bounds = array<i64: 1, 8, 256>}]} {
    %c0 = arith.constant 0 : index
    %c0_0 = arith.constant 0 : index
    %c0_1 = arith.constant 0 : index
    %0 = vector.load %arg2[%c0, %c0_0, %c0_1] : memref<1x16x256xf32, #tpu.memory_space<vmem>>, vector<1x16x256xf32>
    %1 = vector.shape_cast %0 : vector<1x16x256xf32> to vector<16x256xf32>
    %c0_2 = arith.constant 0 : index
    %2 = memref.load %arg1[%c0_2] : memref<2xf32, #tpu.memory_space<smem>>
    %3 = vector.broadcast %2 : f32 to vector<16x256xf32>
    %4 = arith.mulf %1, %3 : vector<16x256xf32>
    %c0_3 = arith.constant 0 : index
    %c0_4 = arith.constant 0 : index
    %c0_5 = arith.constant 0 : index
    %5 = vector.load %arg3[%c0_3, %c0_4, %c0_5] : memref<1x16x256xf32, #tpu.memory_space<vmem>>, vector<1x16x256xf32>
    %6 = vector.shape_cast %5 : vector<1x16x256xf32> to vector<16x256xf32>
    %c1 = arith.constant 1 : index
    %7 = memref.load %arg1[%c1] : memref<2xf32, #tpu.memory_space<smem>>
    %8 = vector.broadcast %7 : f32 to vector<16x256xf32>
    %9 = arith.mulf %6, %8 : vector<16x256xf32>
    %10 = arith.addf %4, %9 : vector<16x256xf32>
    %cst = arith.constant 0.000000e+00 : f32
    %11 = vector.broadcast %cst : f32 to vector<16x256xf32>
    %12 = arith.subf %11, %10 : vector<16x256xf32>
    %13 = math.exp %12 : vector<16x256xf32>
    %cst_6 = arith.constant 1.000000e+00 : f32
    %14 = vector.broadcast %cst_6 : f32 to vector<16x256xf32>
    %15 = arith.addf %14, %13 : vector<16x256xf32>
    %16 = tpu.reciprocal %15 : vector<16x256xf32> -> vector<16x256xf32>
    %17 = arith.mulf %10, %16 : vector<16x256xf32>
    %cst_7 = arith.constant 0.000000e+00 : f32
    %18 = vector.broadcast %cst_7 : f32 to vector<16x384xf32>
    %c0_8 = arith.constant 0 : index
    %c0_9 = arith.constant 0 : index
    %19 = vector.load %arg11[%c0_8, %c0_9] : memref<16x384xf32, #tpu.memory_space<vmem>>, vector<16x384xf32>
    tpu.vector_store %arg11[%c0_8, %c0_9], %18 {strides = array<i32>} : memref<16x384xf32, #tpu.memory_space<vmem>>, vector<16x384xf32>,
    %c0_10 = arith.constant 0 : index
    %c0_11 = arith.constant 0 : index
    %20 = vector.load %arg11[%c0_10, %c0_11] : memref<16x384xf32, #tpu.memory_space<vmem>>, vector<16x256xf32>
    tpu.vector_store %arg11[%c0_10, %c0_11], %17 {strides = array<i32>} : memref<16x384xf32, #tpu.memory_space<vmem>>, vector<16x256xf32>,
    %c0_12 = arith.constant 0 : index
    %c0_13 = arith.constant 0 : index
    %21 = vector.load %arg11[%c0_12, %c0_13] : memref<16x384xf32, #tpu.memory_space<vmem>>, vector<16x384xf32>
    %22 = tpu.iota {dimensions = array<i32: 1>} : vector<1x384xi32>
    %c16_i32 = arith.constant 16 : i32
    %c0_i32 = arith.constant 0 : i32
    %23 = arith.cmpi eq, %c16_i32, %c0_i32 : i32
    %c1_i32 = arith.constant 1 : i32
    %24 = arith.select %23, %c1_i32, %c16_i32 : i32
    %25 = vector.broadcast %24 : i32 to vector<1x384xi32>
    %26 = arith.remsi %22, %25 : vector<1x384xi32>
    %c0_i32_14 = arith.constant 0 : i32
    %27 = vector.broadcast %c0_i32_14 : i32 to vector<1x384xi32>
    %28 = arith.cmpi ne, %26, %27 : vector<1x384xi32>
    %c0_i32_15 = arith.constant 0 : i32
    %29 = vector.broadcast %c0_i32_15 : i32 to vector<1x384xi32>
    %30 = arith.cmpi slt, %26, %29 : vector<1x384xi32>
    %c0_i32_16 = arith.constant 0 : i32
    %31 = arith.cmpi slt, %24, %c0_i32_16 : i32
    %32 = vector.broadcast %31 : i1 to vector<1x384xi1>
    %33 = vector.broadcast %32 : vector<1x384xi1> to vector<1x384xi1>
    %34 = arith.xori %30, %33 : vector<1x384xi1>
    %35 = arith.andi %34, %28 : vector<1x384xi1>
    %36 = vector.broadcast %24 : i32 to vector<1x384xi32>
    %37 = arith.addi %26, %36 : vector<1x384xi32>
    %38 = arith.select %35, %37, %26 : vector<1x384xi1>, vector<1x384xi32>
    %c0_i32_17 = arith.constant 0 : i32
    %39 = vector.broadcast %c0_i32_17 : i32 to vector<1x384xi32>
    %40 = arith.cmpi ne, %38, %39 : vector<1x384xi32>
    %41 = arith.extui %40 : vector<1x384xi1> to vector<1x384xi32>
    %42 = arith.sitofp %41 : vector<1x384xi32> to vector<1x384xf32>
    %c15_i32 = arith.constant 15 : i32
    %43 = vector.broadcast %c15_i32 : i32 to vector<1x384xi32>
    %44 = arith.cmpi ne, %38, %43 : vector<1x384xi32>
    %45 = arith.extui %44 : vector<1x384xi1> to vector<1x384xi32>
    %46 = arith.sitofp %45 : vector<1x384xi32> to vector<1x384xf32>
    %cst_18 = arith.constant 0.000000e+00 : f32
    %47 = vector.broadcast %cst_18 : f32 to vector<16x384xf32>
    %c17_i32 = arith.constant 17 : i32
    %48 = tpu.dynamic_rotate %21 by %c17_i32 dim 1 : vector<16x384xf32>, i32 -> vector<16x384xf32>
    %49 = vector.broadcast %42 : vector<1x384xf32> to vector<16x384xf32>
    %50 = arith.mulf %48, %49 : vector<16x384xf32>
    %c0_19 = arith.constant 0 : index
    %c0_20 = arith.constant 0 : index
    %c0_21 = arith.constant 0 : index
    %51 = vector.load %arg4[%c0_19, %c0_20, %c0_21] : memref<9x16x1xf32, #tpu.memory_space<vmem>>, vector<1x16x1xf32>
    %52 = vector.shape_cast %51 : vector<1x16x1xf32> to vector<16x1xf32>
    %53 = vector.broadcast %52 : vector<16x1xf32> to vector<16x384xf32>
    %54 = arith.mulf %50, %53 : vector<16x384xf32>
    %55 = arith.addf %47, %54 : vector<16x384xf32>
    %c16_i32_22 = arith.constant 16 : i32
    %56 = tpu.dynamic_rotate %21 by %c16_i32_22 dim 1 : vector<16x384xf32>, i32 -> vector<16x384xf32>
    %c1_23 = arith.constant 1 : index
    %c0_24 = arith.constant 0 : index
    %c0_25 = arith.constant 0 : index
    %57 = vector.load %arg4[%c1_23, %c0_24, %c0_25] : memref<9x16x1xf32, #tpu.memory_space<vmem>>, vector<1x16x1xf32>
    %58 = vector.shape_cast %57 : vector<1x16x1xf32> to vector<16x1xf32>
    %59 = vector.broadcast %58 : vector<16x1xf32> to vector<16x384xf32>
    %60 = arith.mulf %56, %59 : vector<16x384xf32>
    %61 = arith.addf %55, %60 : vector<16x384xf32>
    %c15_i32_26 = arith.constant 15 : i32
    %62 = tpu.dynamic_rotate %21 by %c15_i32_26 dim 1 : vector<16x384xf32>, i32 -> vector<16x384xf32>
    %63 = vector.broadcast %46 : vector<1x384xf32> to vector<16x384xf32>
    %64 = arith.mulf %62, %63 : vector<16x384xf32>
    %c2 = arith.constant 2 : index
    %c0_27 = arith.constant 0 : index
    %c0_28 = arith.constant 0 : index
    %65 = vector.load %arg4[%c2, %c0_27, %c0_28] : memref<9x16x1xf32, #tpu.memory_space<vmem>>, vector<1x16x1xf32>
    %66 = vector.shape_cast %65 : vector<1x16x1xf32> to vector<16x1xf32>
    %67 = vector.broadcast %66 : vector<16x1xf32> to vector<16x384xf32>
    %68 = arith.mulf %64, %67 : vector<16x384xf32>
    %69 = arith.addf %61, %68 : vector<16x384xf32>
    %c1_i32_29 = arith.constant 1 : i32
    %70 = tpu.dynamic_rotate %21 by %c1_i32_29 dim 1 : vector<16x384xf32>, i32 -> vector<16x384xf32>
    %71 = vector.broadcast %42 : vector<1x384xf32> to vector<16x384xf32>
    %72 = arith.mulf %70, %71 : vector<16x384xf32>
    %c3 = arith.constant 3 : index
    %c0_30 = arith.constant 0 : index
    %c0_31 = arith.constant 0 : index
    %73 = vector.load %arg4[%c3, %c0_30, %c0_31] : memref<9x16x1xf32, #tpu.memory_space<vmem>>, vector<1x16x1xf32>
    %74 = vector.shape_cast %73 : vector<1x16x1xf32> to vector<16x1xf32>
    %75 = vector.broadcast %74 : vector<16x1xf32> to vector<16x384xf32>
    %76 = arith.mulf %72, %75 : vector<16x384xf32>
    %77 = arith.addf %69, %76 : vector<16x384xf32>
    %c4 = arith.constant 4 : index
    %c0_32 = arith.constant 0 : index
    %c0_33 = arith.constant 0 : index
    %78 = vector.load %arg4[%c4, %c0_32, %c0_33] : memref<9x16x1xf32, #tpu.memory_space<vmem>>, vector<1x16x1xf32>
    %79 = vector.shape_cast %78 : vector<1x16x1xf32> to vector<16x1xf32>
    %80 = vector.broadcast %79 : vector<16x1xf32> to vector<16x384xf32>
    %81 = arith.mulf %21, %80 : vector<16x384xf32>
    %82 = arith.addf %77, %81 : vector<16x384xf32>
    %c383_i32 = arith.constant 383 : i32
    %83 = tpu.dynamic_rotate %21 by %c383_i32 dim 1 : vector<16x384xf32>, i32 -> vector<16x384xf32>
    %84 = vector.broadcast %46 : vector<1x384xf32> to vector<16x384xf32>
    %85 = arith.mulf %83, %84 : vector<16x384xf32>
    %c5 = arith.constant 5 : index
    %c0_34 = arith.constant 0 : index
    %c0_35 = arith.constant 0 : index
    %86 = vector.load %arg4[%c5, %c0_34, %c0_35] : memref<9x16x1xf32, #tpu.memory_space<vmem>>, vector<1x16x1xf32>
    %87 = vector.shape_cast %86 : vector<1x16x1xf32> to vector<16x1xf32>
    %88 = vector.broadcast %87 : vector<16x1xf32> to vector<16x384xf32>
    %89 = arith.mulf %85, %88 : vector<16x384xf32>
    %90 = arith.addf %82, %89 : vector<16x384xf32>
    %c369_i32 = arith.constant 369 : i32
    %91 = tpu.dynamic_rotate %21 by %c369_i32 dim 1 : vector<16x384xf32>, i32 -> vector<16x384xf32>
    %92 = vector.broadcast %42 : vector<1x384xf32> to vector<16x384xf32>
    %93 = arith.mulf %91, %92 : vector<16x384xf32>
    %c6 = arith.constant 6 : index
    %c0_36 = arith.constant 0 : index
    %c0_37 = arith.constant 0 : index
    %94 = vector.load %arg4[%c6, %c0_36, %c0_37] : memref<9x16x1xf32, #tpu.memory_space<vmem>>, vector<1x16x1xf32>
    %95 = vector.shape_cast %94 : vector<1x16x1xf32> to vector<16x1xf32>
    %96 = vector.broadcast %95 : vector<16x1xf32> to vector<16x384xf32>
    %97 = arith.mulf %93, %96 : vector<16x384xf32>
    %98 = arith.addf %90, %97 : vector<16x384xf32>
    %c368_i32 = arith.constant 368 : i32
    %99 = tpu.dynamic_rotate %21 by %c368_i32 dim 1 : vector<16x384xf32>, i32 -> vector<16x384xf32>
    %c7 = arith.constant 7 : index
    %c0_38 = arith.constant 0 : index
    %c0_39 = arith.constant 0 : index
    %100 = vector.load %arg4[%c7, %c0_38, %c0_39] : memref<9x16x1xf32, #tpu.memory_space<vmem>>, vector<1x16x1xf32>
    %101 = vector.shape_cast %100 : vector<1x16x1xf32> to vector<16x1xf32>
    %102 = vector.broadcast %101 : vector<16x1xf32> to vector<16x384xf32>
    %103 = arith.mulf %99, %102 : vector<16x384xf32>
    %104 = arith.addf %98, %103 : vector<16x384xf32>
    %c367_i32 = arith.constant 367 : i32
    %105 = tpu.dynamic_rotate %21 by %c367_i32 dim 1 : vector<16x384xf32>, i32 -> vector<16x384xf32>
    %106 = vector.broadcast %46 : vector<1x384xf32> to vector<16x384xf32>
    %107 = arith.mulf %105, %106 : vector<16x384xf32>
    %c8 = arith.constant 8 : index
    %c0_40 = arith.constant 0 : index
    %c0_41 = arith.constant 0 : index
    %108 = vector.load %arg4[%c8, %c0_40, %c0_41] : memref<9x16x1xf32, #tpu.memory_space<vmem>>, vector<1x16x1xf32>
    %109 = vector.shape_cast %108 : vector<1x16x1xf32> to vector<16x1xf32>
    %110 = vector.broadcast %109 : vector<16x1xf32> to vector<16x384xf32>
    %111 = arith.mulf %107, %110 : vector<16x384xf32>
    %112 = arith.addf %104, %111 : vector<16x384xf32>
    %113 = vector.extract_strided_slice %112 {offsets = [0, 0], sizes = [16, 256], strides = [1, 1]} : vector<16x384xf32> to vector<16x256xf32>
    %c0_42 = arith.constant 0 : index
    %c0_43 = arith.constant 0 : index
    %114 = vector.load %arg5[%c0_42, %c0_43] : memref<16x16xf32, #tpu.memory_space<vmem>>, vector<16x16xf32>
    %cst_44 = arith.constant dense<0.000000e+00> : vector<16x256xf32>
    %115 = tpu.matmul %114, %113, %cst_44 {dimension_numbers = #tpu.dot_dimension_numbers<[1], [0], [0], [1], [0, 0, 1, 1], [], []>} : vector<16x16xf32>, vector<16x256xf32>, vector<16x256xf32> -> vector<16x256xf32>
    %c0_45 = arith.constant 0 : index
    %c0_46 = arith.constant 0 : index
    %116 = vector.load %arg6[%c0_45, %c0_46] : memref<16x1xf32, #tpu.memory_space<vmem>>, vector<16x1xf32>
    %117 = vector.broadcast %116 : vector<16x1xf32> to vector<16x256xf32>
    %118 = arith.addf %115, %117 : vector<16x256xf32>
    %c0_47 = arith.constant 0 : index
    %c0_48 = arith.constant 0 : index
    %c0_49 = arith.constant 0 : index
    %119 = vector.load %arg9[%c0_47, %c0_48, %c0_49] : memref<1x16x256xf32, #tpu.memory_space<vmem>>, vector<1x16x256xf32>
    %120 = vector.shape_cast %119 : vector<1x16x256xf32> to vector<16x256xf32>
    %121 = vector.shape_cast %118 : vector<16x256xf32> to vector<1x16x256xf32>
    tpu.vector_store %arg9[%c0_47, %c0_48, %c0_49], %121 {strides = array<i32>} : memref<1x16x256xf32, #tpu.memory_space<vmem>>, vector<1x16x256xf32>,
    %c0_50 = arith.constant 0 : index
    %c0_51 = arith.constant 0 : index
    %122 = vector.load %arg7[%c0_50, %c0_51] : memref<8x16xf32, #tpu.memory_space<vmem>>, vector<8x16xf32>
    %cst_52 = arith.constant dense<0.000000e+00> : vector<8x256xf32>
    %123 = tpu.matmul %122, %118, %cst_52 {dimension_numbers = #tpu.dot_dimension_numbers<[1], [0], [0], [1], [0, 0, 1, 1], [], []>} : vector<8x16xf32>, vector<16x256xf32>, vector<8x256xf32> -> vector<8x256xf32>
    %c0_53 = arith.constant 0 : index
    %c0_54 = arith.constant 0 : index
    %124 = vector.load %arg8[%c0_53, %c0_54] : memref<8x1xf32, #tpu.memory_space<vmem>>, vector<8x1xf32>
    %125 = vector.broadcast %124 : vector<8x1xf32> to vector<8x256xf32>
    %126 = arith.addf %123, %125 : vector<8x256xf32>
    %c0_55 = arith.constant 0 : index
    %c0_56 = arith.constant 0 : index
    %c0_57 = arith.constant 0 : index
    %127 = vector.load %arg10[%c0_55, %c0_56, %c0_57] : memref<1x8x256xf32, #tpu.memory_space<vmem>>, vector<1x8x256xf32>
    %128 = vector.shape_cast %127 : vector<1x8x256xf32> to vector<8x256xf32>
    %129 = vector.shape_cast %126 : vector<8x256xf32> to vector<1x8x256xf32>
    tpu.vector_store %arg10[%c0_55, %c0_56, %c0_57], %129 {strides = array<i32>} : memref<1x8x256xf32, #tpu.memory_space<vmem>>, vector<1x8x256xf32>,
    return
  }
  func.func @transform_0(%arg0: i32) -> i32 {
    %c0_i32 = arith.constant 0 : i32
    %c0_i32_0 = arith.constant 0 : i32
    return %c0_i32 : i32
  }
  func.func @transform_1(%arg0: i32) -> (i32, i32, i32) {
    %c0_i32 = arith.constant 0 : i32
    %c0_i32_0 = arith.constant 0 : i32
    %c0_i32_1 = arith.constant 0 : i32
    return %arg0, %c0_i32, %c0_i32_0 : i32, i32, i32
  }
  func.func @transform_2(%arg0: i32) -> (i32, i32, i32) {
    %c0_i32 = arith.constant 0 : i32
    %c0_i32_0 = arith.constant 0 : i32
    %c0_i32_1 = arith.constant 0 : i32
    return %arg0, %c0_i32, %c0_i32_0 : i32, i32, i32
  }
  func.func @transform_3(%arg0: i32) -> (i32, i32, i32) {
    %c0_i32 = arith.constant 0 : i32
    %c0_i32_0 = arith.constant 0 : i32
    %c0_i32_1 = arith.constant 0 : i32
    %c0_i32_2 = arith.constant 0 : i32
    return %c0_i32, %c0_i32_0, %c0_i32_1 : i32, i32, i32
  }
  func.func @transform_4(%arg0: i32) -> (i32, i32) {
    %c0_i32 = arith.constant 0 : i32
    %c0_i32_0 = arith.constant 0 : i32
    %c0_i32_1 = arith.constant 0 : i32
    return %c0_i32, %c0_i32_0 : i32, i32
  }
  func.func @transform_5(%arg0: i32) -> (i32, i32) {
    %c0_i32 = arith.constant 0 : i32
    %c0_i32_0 = arith.constant 0 : i32
    %c0_i32_1 = arith.constant 0 : i32
    return %c0_i32, %c0_i32_0 : i32, i32
  }
  func.func @transform_6(%arg0: i32) -> (i32, i32) {
    %c0_i32 = arith.constant 0 : i32
    %c0_i32_0 = arith.constant 0 : i32
    %c0_i32_1 = arith.constant 0 : i32
    return %c0_i32, %c0_i32_0 : i32, i32
  }
  func.func @transform_7(%arg0: i32) -> (i32, i32) {
    %c0_i32 = arith.constant 0 : i32
    %c0_i32_0 = arith.constant 0 : i32
    %c0_i32_1 = arith.constant 0 : i32
    return %c0_i32, %c0_i32_0 : i32, i32
  }
  func.func @transform_8(%arg0: i32) -> (i32, i32, i32) {
    %c0_i32 = arith.constant 0 : i32
    %c0_i32_0 = arith.constant 0 : i32
    %c0_i32_1 = arith.constant 0 : i32
    return %arg0, %c0_i32, %c0_i32_0 : i32, i32, i32
  }
  func.func @transform_9(%arg0: i32) -> (i32, i32, i32) {
    %c0_i32 = arith.constant 0 : i32
    %c0_i32_0 = arith.constant 0 : i32
    %c0_i32_1 = arith.constant 0 : i32
    return %arg0, %c0_i32, %c0_i32_0 : i32, i32, i32
  }
}

module attributes {stable_mosaic.version = 11 : i64} {
  func.func @_conv1x1_cm_kernel(%arg0: i32, %arg1: memref<1x8x1024xf32, #tpu.memory_space<vmem>>, %arg2: memref<8x8xf32, #tpu.memory_space<vmem>>, %arg3: memref<8x1xf32, #tpu.memory_space<vmem>>, %arg4: memref<1x8x1024xf32, #tpu.memory_space<vmem>>) attributes {dimension_semantics = [#tpu.dimension_semantics<parallel>], iteration_bounds = array<i64: 2>, scalar_prefetch = 0 : i64, scratch_operands = 0 : i64, tpu.core_type = #tpu.core_type<tc>, window_params = [{transform_indices = @transform_0, window_bounds = array<i64: 1, 8, 1024>}, {pipeline_mode = #tpu.pipeline_mode<synchronous>, transform_indices = @transform_1, window_bounds = array<i64: 8, 8>}, {pipeline_mode = #tpu.pipeline_mode<synchronous>, transform_indices = @transform_2, window_bounds = array<i64: 8, 1>}, {transform_indices = @transform_3, window_bounds = array<i64: 1, 8, 1024>}]} {
    %c0 = arith.constant 0 : index
    %c0_0 = arith.constant 0 : index
    %0 = vector.load %arg2[%c0, %c0_0] : memref<8x8xf32, #tpu.memory_space<vmem>>, vector<8x8xf32>
    %c0_1 = arith.constant 0 : index
    %c0_2 = arith.constant 0 : index
    %c0_3 = arith.constant 0 : index
    %1 = vector.load %arg1[%c0_1, %c0_2, %c0_3] : memref<1x8x1024xf32, #tpu.memory_space<vmem>>, vector<1x8x1024xf32>
    %2 = vector.shape_cast %1 : vector<1x8x1024xf32> to vector<8x1024xf32>
    %cst = arith.constant dense<0.000000e+00> : vector<8x1024xf32>
    %3 = tpu.matmul %0, %2, %cst {dimension_numbers = #tpu.dot_dimension_numbers<[1], [0], [0], [1], [0, 0, 1, 1], [], []>} : vector<8x8xf32>, vector<8x1024xf32>, vector<8x1024xf32> -> vector<8x1024xf32>
    %c0_4 = arith.constant 0 : index
    %c0_5 = arith.constant 0 : index
    %4 = vector.load %arg3[%c0_4, %c0_5] : memref<8x1xf32, #tpu.memory_space<vmem>>, vector<8x1xf32>
    %5 = vector.broadcast %4 : vector<8x1xf32> to vector<8x1024xf32>
    %6 = arith.addf %3, %5 : vector<8x1024xf32>
    %c0_6 = arith.constant 0 : index
    %c0_7 = arith.constant 0 : index
    %c0_8 = arith.constant 0 : index
    %7 = vector.load %arg4[%c0_6, %c0_7, %c0_8] : memref<1x8x1024xf32, #tpu.memory_space<vmem>>, vector<1x8x1024xf32>
    %8 = vector.shape_cast %7 : vector<1x8x1024xf32> to vector<8x1024xf32>
    %9 = vector.shape_cast %6 : vector<8x1024xf32> to vector<1x8x1024xf32>
    tpu.vector_store %arg4[%c0_6, %c0_7, %c0_8], %9 {strides = array<i32>} : memref<1x8x1024xf32, #tpu.memory_space<vmem>>, vector<1x8x1024xf32>,
    return
  }
  func.func @transform_0(%arg0: i32) -> (i32, i32, i32) {
    %c0_i32 = arith.constant 0 : i32
    %c0_i32_0 = arith.constant 0 : i32
    %c0_i32_1 = arith.constant 0 : i32
    return %arg0, %c0_i32, %c0_i32_0 : i32, i32, i32
  }
  func.func @transform_1(%arg0: i32) -> (i32, i32) {
    %c0_i32 = arith.constant 0 : i32
    %c0_i32_0 = arith.constant 0 : i32
    %c0_i32_1 = arith.constant 0 : i32
    return %c0_i32, %c0_i32_0 : i32, i32
  }
  func.func @transform_2(%arg0: i32) -> (i32, i32) {
    %c0_i32 = arith.constant 0 : i32
    %c0_i32_0 = arith.constant 0 : i32
    %c0_i32_1 = arith.constant 0 : i32
    return %c0_i32, %c0_i32_0 : i32, i32
  }
  func.func @transform_3(%arg0: i32) -> (i32, i32, i32) {
    %c0_i32 = arith.constant 0 : i32
    %c0_i32_0 = arith.constant 0 : i32
    %c0_i32_1 = arith.constant 0 : i32
    return %arg0, %c0_i32, %c0_i32_0 : i32, i32, i32
  }
}

module attributes {stable_mosaic.version = 11 : i64} {
  func.func @kernel(%arg0: i32, %arg1: memref<2xf32, #tpu.memory_space<smem>>, %arg2: memref<1x8x1024xf32, #tpu.memory_space<vmem>>, %arg3: memref<1x8x1024xf32, #tpu.memory_space<vmem>>, %arg4: memref<9x8x1xf32, #tpu.memory_space<vmem>>, %arg5: memref<8x8xf32, #tpu.memory_space<vmem>>, %arg6: memref<8x1xf32, #tpu.memory_space<vmem>>, %arg7: memref<1x8x1024xf32, #tpu.memory_space<vmem>>, %arg8: memref<8x1152xf32, #tpu.memory_space<vmem>>) attributes {dimension_semantics = [#tpu.dimension_semantics<parallel>], iteration_bounds = array<i64: 2>, scalar_prefetch = 0 : i64, scratch_operands = 1 : i64, tpu.core_type = #tpu.core_type<tc>, window_params = [{transform_indices = @transform_0, window_bounds = array<i64: 2>}, {transform_indices = @transform_1, window_bounds = array<i64: 1, 8, 1024>}, {transform_indices = @transform_2, window_bounds = array<i64: 1, 8, 1024>}, {pipeline_mode = #tpu.pipeline_mode<synchronous>, transform_indices = @transform_3, window_bounds = array<i64: 9, 8, 1>}, {pipeline_mode = #tpu.pipeline_mode<synchronous>, transform_indices = @transform_4, window_bounds = array<i64: 8, 8>}, {pipeline_mode = #tpu.pipeline_mode<synchronous>, transform_indices = @transform_5, window_bounds = array<i64: 8, 1>}, {transform_indices = @transform_6, window_bounds = array<i64: 1, 8, 1024>}]} {
    %c0 = arith.constant 0 : index
    %c0_0 = arith.constant 0 : index
    %c0_1 = arith.constant 0 : index
    %0 = vector.load %arg2[%c0, %c0_0, %c0_1] : memref<1x8x1024xf32, #tpu.memory_space<vmem>>, vector<1x8x1024xf32>
    %1 = vector.shape_cast %0 : vector<1x8x1024xf32> to vector<8x1024xf32>
    %c0_2 = arith.constant 0 : index
    %2 = memref.load %arg1[%c0_2] : memref<2xf32, #tpu.memory_space<smem>>
    %3 = vector.broadcast %2 : f32 to vector<8x1024xf32>
    %4 = arith.mulf %1, %3 : vector<8x1024xf32>
    %c0_3 = arith.constant 0 : index
    %c0_4 = arith.constant 0 : index
    %c0_5 = arith.constant 0 : index
    %5 = vector.load %arg3[%c0_3, %c0_4, %c0_5] : memref<1x8x1024xf32, #tpu.memory_space<vmem>>, vector<1x8x1024xf32>
    %6 = vector.shape_cast %5 : vector<1x8x1024xf32> to vector<8x1024xf32>
    %c1 = arith.constant 1 : index
    %7 = memref.load %arg1[%c1] : memref<2xf32, #tpu.memory_space<smem>>
    %8 = vector.broadcast %7 : f32 to vector<8x1024xf32>
    %9 = arith.mulf %6, %8 : vector<8x1024xf32>
    %10 = arith.addf %4, %9 : vector<8x1024xf32>
    %cst = arith.constant 0.000000e+00 : f32
    %11 = vector.broadcast %cst : f32 to vector<8x1024xf32>
    %12 = arith.subf %11, %10 : vector<8x1024xf32>
    %13 = math.exp %12 : vector<8x1024xf32>
    %cst_6 = arith.constant 1.000000e+00 : f32
    %14 = vector.broadcast %cst_6 : f32 to vector<8x1024xf32>
    %15 = arith.addf %14, %13 : vector<8x1024xf32>
    %16 = tpu.reciprocal %15 : vector<8x1024xf32> -> vector<8x1024xf32>
    %17 = arith.mulf %10, %16 : vector<8x1024xf32>
    %cst_7 = arith.constant 0.000000e+00 : f32
    %18 = vector.broadcast %cst_7 : f32 to vector<8x1152xf32>
    %c0_8 = arith.constant 0 : index
    %c0_9 = arith.constant 0 : index
    %19 = vector.load %arg8[%c0_8, %c0_9] : memref<8x1152xf32, #tpu.memory_space<vmem>>, vector<8x1152xf32>
    tpu.vector_store %arg8[%c0_8, %c0_9], %18 {strides = array<i32>} : memref<8x1152xf32, #tpu.memory_space<vmem>>, vector<8x1152xf32>,
    %c0_10 = arith.constant 0 : index
    %c0_11 = arith.constant 0 : index
    %20 = vector.load %arg8[%c0_10, %c0_11] : memref<8x1152xf32, #tpu.memory_space<vmem>>, vector<8x1024xf32>
    tpu.vector_store %arg8[%c0_10, %c0_11], %17 {strides = array<i32>} : memref<8x1152xf32, #tpu.memory_space<vmem>>, vector<8x1024xf32>,
    %c0_12 = arith.constant 0 : index
    %c0_13 = arith.constant 0 : index
    %21 = vector.load %arg8[%c0_12, %c0_13] : memref<8x1152xf32, #tpu.memory_space<vmem>>, vector<8x1152xf32>
    %22 = tpu.iota {dimensions = array<i32: 1>} : vector<1x1152xi32>
    %c32_i32 = arith.constant 32 : i32
    %c0_i32 = arith.constant 0 : i32
    %23 = arith.cmpi eq, %c32_i32, %c0_i32 : i32
    %c1_i32 = arith.constant 1 : i32
    %24 = arith.select %23, %c1_i32, %c32_i32 : i32
    %25 = vector.broadcast %24 : i32 to vector<1x1152xi32>
    %26 = arith.remsi %22, %25 : vector<1x1152xi32>
    %c0_i32_14 = arith.constant 0 : i32
    %27 = vector.broadcast %c0_i32_14 : i32 to vector<1x1152xi32>
    %28 = arith.cmpi ne, %26, %27 : vector<1x1152xi32>
    %c0_i32_15 = arith.constant 0 : i32
    %29 = vector.broadcast %c0_i32_15 : i32 to vector<1x1152xi32>
    %30 = arith.cmpi slt, %26, %29 : vector<1x1152xi32>
    %c0_i32_16 = arith.constant 0 : i32
    %31 = arith.cmpi slt, %24, %c0_i32_16 : i32
    %32 = vector.broadcast %31 : i1 to vector<1x1152xi1>
    %33 = vector.broadcast %32 : vector<1x1152xi1> to vector<1x1152xi1>
    %34 = arith.xori %30, %33 : vector<1x1152xi1>
    %35 = arith.andi %34, %28 : vector<1x1152xi1>
    %36 = vector.broadcast %24 : i32 to vector<1x1152xi32>
    %37 = arith.addi %26, %36 : vector<1x1152xi32>
    %38 = arith.select %35, %37, %26 : vector<1x1152xi1>, vector<1x1152xi32>
    %c0_i32_17 = arith.constant 0 : i32
    %39 = vector.broadcast %c0_i32_17 : i32 to vector<1x1152xi32>
    %40 = arith.cmpi ne, %38, %39 : vector<1x1152xi32>
    %41 = arith.extui %40 : vector<1x1152xi1> to vector<1x1152xi32>
    %42 = arith.sitofp %41 : vector<1x1152xi32> to vector<1x1152xf32>
    %c31_i32 = arith.constant 31 : i32
    %43 = vector.broadcast %c31_i32 : i32 to vector<1x1152xi32>
    %44 = arith.cmpi ne, %38, %43 : vector<1x1152xi32>
    %45 = arith.extui %44 : vector<1x1152xi1> to vector<1x1152xi32>
    %46 = arith.sitofp %45 : vector<1x1152xi32> to vector<1x1152xf32>
    %cst_18 = arith.constant 0.000000e+00 : f32
    %47 = vector.broadcast %cst_18 : f32 to vector<8x1152xf32>
    %c33_i32 = arith.constant 33 : i32
    %48 = tpu.dynamic_rotate %21 by %c33_i32 dim 1 : vector<8x1152xf32>, i32 -> vector<8x1152xf32>
    %49 = vector.broadcast %42 : vector<1x1152xf32> to vector<8x1152xf32>
    %50 = arith.mulf %48, %49 : vector<8x1152xf32>
    %c0_19 = arith.constant 0 : index
    %c0_20 = arith.constant 0 : index
    %c0_21 = arith.constant 0 : index
    %51 = vector.load %arg4[%c0_19, %c0_20, %c0_21] : memref<9x8x1xf32, #tpu.memory_space<vmem>>, vector<1x8x1xf32>
    %52 = vector.shape_cast %51 : vector<1x8x1xf32> to vector<8x1xf32>
    %53 = vector.broadcast %52 : vector<8x1xf32> to vector<8x1152xf32>
    %54 = arith.mulf %50, %53 : vector<8x1152xf32>
    %55 = arith.addf %47, %54 : vector<8x1152xf32>
    %c32_i32_22 = arith.constant 32 : i32
    %56 = tpu.dynamic_rotate %21 by %c32_i32_22 dim 1 : vector<8x1152xf32>, i32 -> vector<8x1152xf32>
    %c1_23 = arith.constant 1 : index
    %c0_24 = arith.constant 0 : index
    %c0_25 = arith.constant 0 : index
    %57 = vector.load %arg4[%c1_23, %c0_24, %c0_25] : memref<9x8x1xf32, #tpu.memory_space<vmem>>, vector<1x8x1xf32>
    %58 = vector.shape_cast %57 : vector<1x8x1xf32> to vector<8x1xf32>
    %59 = vector.broadcast %58 : vector<8x1xf32> to vector<8x1152xf32>
    %60 = arith.mulf %56, %59 : vector<8x1152xf32>
    %61 = arith.addf %55, %60 : vector<8x1152xf32>
    %c31_i32_26 = arith.constant 31 : i32
    %62 = tpu.dynamic_rotate %21 by %c31_i32_26 dim 1 : vector<8x1152xf32>, i32 -> vector<8x1152xf32>
    %63 = vector.broadcast %46 : vector<1x1152xf32> to vector<8x1152xf32>
    %64 = arith.mulf %62, %63 : vector<8x1152xf32>
    %c2 = arith.constant 2 : index
    %c0_27 = arith.constant 0 : index
    %c0_28 = arith.constant 0 : index
    %65 = vector.load %arg4[%c2, %c0_27, %c0_28] : memref<9x8x1xf32, #tpu.memory_space<vmem>>, vector<1x8x1xf32>
    %66 = vector.shape_cast %65 : vector<1x8x1xf32> to vector<8x1xf32>
    %67 = vector.broadcast %66 : vector<8x1xf32> to vector<8x1152xf32>
    %68 = arith.mulf %64, %67 : vector<8x1152xf32>
    %69 = arith.addf %61, %68 : vector<8x1152xf32>
    %c1_i32_29 = arith.constant 1 : i32
    %70 = tpu.dynamic_rotate %21 by %c1_i32_29 dim 1 : vector<8x1152xf32>, i32 -> vector<8x1152xf32>
    %71 = vector.broadcast %42 : vector<1x1152xf32> to vector<8x1152xf32>
    %72 = arith.mulf %70, %71 : vector<8x1152xf32>
    %c3 = arith.constant 3 : index
    %c0_30 = arith.constant 0 : index
    %c0_31 = arith.constant 0 : index
    %73 = vector.load %arg4[%c3, %c0_30, %c0_31] : memref<9x8x1xf32, #tpu.memory_space<vmem>>, vector<1x8x1xf32>
    %74 = vector.shape_cast %73 : vector<1x8x1xf32> to vector<8x1xf32>
    %75 = vector.broadcast %74 : vector<8x1xf32> to vector<8x1152xf32>
    %76 = arith.mulf %72, %75 : vector<8x1152xf32>
    %77 = arith.addf %69, %76 : vector<8x1152xf32>
    %c4 = arith.constant 4 : index
    %c0_32 = arith.constant 0 : index
    %c0_33 = arith.constant 0 : index
    %78 = vector.load %arg4[%c4, %c0_32, %c0_33] : memref<9x8x1xf32, #tpu.memory_space<vmem>>, vector<1x8x1xf32>
    %79 = vector.shape_cast %78 : vector<1x8x1xf32> to vector<8x1xf32>
    %80 = vector.broadcast %79 : vector<8x1xf32> to vector<8x1152xf32>
    %81 = arith.mulf %21, %80 : vector<8x1152xf32>
    %82 = arith.addf %77, %81 : vector<8x1152xf32>
    %c1151_i32 = arith.constant 1151 : i32
    %83 = tpu.dynamic_rotate %21 by %c1151_i32 dim 1 : vector<8x1152xf32>, i32 -> vector<8x1152xf32>
    %84 = vector.broadcast %46 : vector<1x1152xf32> to vector<8x1152xf32>
    %85 = arith.mulf %83, %84 : vector<8x1152xf32>
    %c5 = arith.constant 5 : index
    %c0_34 = arith.constant 0 : index
    %c0_35 = arith.constant 0 : index
    %86 = vector.load %arg4[%c5, %c0_34, %c0_35] : memref<9x8x1xf32, #tpu.memory_space<vmem>>, vector<1x8x1xf32>
    %87 = vector.shape_cast %86 : vector<1x8x1xf32> to vector<8x1xf32>
    %88 = vector.broadcast %87 : vector<8x1xf32> to vector<8x1152xf32>
    %89 = arith.mulf %85, %88 : vector<8x1152xf32>
    %90 = arith.addf %82, %89 : vector<8x1152xf32>
    %c1121_i32 = arith.constant 1121 : i32
    %91 = tpu.dynamic_rotate %21 by %c1121_i32 dim 1 : vector<8x1152xf32>, i32 -> vector<8x1152xf32>
    %92 = vector.broadcast %42 : vector<1x1152xf32> to vector<8x1152xf32>
    %93 = arith.mulf %91, %92 : vector<8x1152xf32>
    %c6 = arith.constant 6 : index
    %c0_36 = arith.constant 0 : index
    %c0_37 = arith.constant 0 : index
    %94 = vector.load %arg4[%c6, %c0_36, %c0_37] : memref<9x8x1xf32, #tpu.memory_space<vmem>>, vector<1x8x1xf32>
    %95 = vector.shape_cast %94 : vector<1x8x1xf32> to vector<8x1xf32>
    %96 = vector.broadcast %95 : vector<8x1xf32> to vector<8x1152xf32>
    %97 = arith.mulf %93, %96 : vector<8x1152xf32>
    %98 = arith.addf %90, %97 : vector<8x1152xf32>
    %c1120_i32 = arith.constant 1120 : i32
    %99 = tpu.dynamic_rotate %21 by %c1120_i32 dim 1 : vector<8x1152xf32>, i32 -> vector<8x1152xf32>
    %c7 = arith.constant 7 : index
    %c0_38 = arith.constant 0 : index
    %c0_39 = arith.constant 0 : index
    %100 = vector.load %arg4[%c7, %c0_38, %c0_39] : memref<9x8x1xf32, #tpu.memory_space<vmem>>, vector<1x8x1xf32>
    %101 = vector.shape_cast %100 : vector<1x8x1xf32> to vector<8x1xf32>
    %102 = vector.broadcast %101 : vector<8x1xf32> to vector<8x1152xf32>
    %103 = arith.mulf %99, %102 : vector<8x1152xf32>
    %104 = arith.addf %98, %103 : vector<8x1152xf32>
    %c1119_i32 = arith.constant 1119 : i32
    %105 = tpu.dynamic_rotate %21 by %c1119_i32 dim 1 : vector<8x1152xf32>, i32 -> vector<8x1152xf32>
    %106 = vector.broadcast %46 : vector<1x1152xf32> to vector<8x1152xf32>
    %107 = arith.mulf %105, %106 : vector<8x1152xf32>
    %c8 = arith.constant 8 : index
    %c0_40 = arith.constant 0 : index
    %c0_41 = arith.constant 0 : index
    %108 = vector.load %arg4[%c8, %c0_40, %c0_41] : memref<9x8x1xf32, #tpu.memory_space<vmem>>, vector<1x8x1xf32>
    %109 = vector.shape_cast %108 : vector<1x8x1xf32> to vector<8x1xf32>
    %110 = vector.broadcast %109 : vector<8x1xf32> to vector<8x1152xf32>
    %111 = arith.mulf %107, %110 : vector<8x1152xf32>
    %112 = arith.addf %104, %111 : vector<8x1152xf32>
    %113 = vector.extract_strided_slice %112 {offsets = [0, 0], sizes = [8, 1024], strides = [1, 1]} : vector<8x1152xf32> to vector<8x1024xf32>
    %c0_42 = arith.constant 0 : index
    %c0_43 = arith.constant 0 : index
    %114 = vector.load %arg5[%c0_42, %c0_43] : memref<8x8xf32, #tpu.memory_space<vmem>>, vector<8x8xf32>
    %cst_44 = arith.constant dense<0.000000e+00> : vector<8x1024xf32>
    %115 = tpu.matmul %114, %113, %cst_44 {dimension_numbers = #tpu.dot_dimension_numbers<[1], [0], [0], [1], [0, 0, 1, 1], [], []>} : vector<8x8xf32>, vector<8x1024xf32>, vector<8x1024xf32> -> vector<8x1024xf32>
    %c0_45 = arith.constant 0 : index
    %c0_46 = arith.constant 0 : index
    %116 = vector.load %arg6[%c0_45, %c0_46] : memref<8x1xf32, #tpu.memory_space<vmem>>, vector<8x1xf32>
    %117 = vector.broadcast %116 : vector<8x1xf32> to vector<8x1024xf32>
    %118 = arith.addf %115, %117 : vector<8x1024xf32>
    %c0_47 = arith.constant 0 : index
    %c0_48 = arith.constant 0 : index
    %c0_49 = arith.constant 0 : index
    %119 = vector.load %arg7[%c0_47, %c0_48, %c0_49] : memref<1x8x1024xf32, #tpu.memory_space<vmem>>, vector<1x8x1024xf32>
    %120 = vector.shape_cast %119 : vector<1x8x1024xf32> to vector<8x1024xf32>
    %121 = vector.shape_cast %118 : vector<8x1024xf32> to vector<1x8x1024xf32>
    tpu.vector_store %arg7[%c0_47, %c0_48, %c0_49], %121 {strides = array<i32>} : memref<1x8x1024xf32, #tpu.memory_space<vmem>>, vector<1x8x1024xf32>,
    return
  }
  func.func @transform_0(%arg0: i32) -> i32 {
    %c0_i32 = arith.constant 0 : i32
    %c0_i32_0 = arith.constant 0 : i32
    return %c0_i32 : i32
  }
  func.func @transform_1(%arg0: i32) -> (i32, i32, i32) {
    %c0_i32 = arith.constant 0 : i32
    %c0_i32_0 = arith.constant 0 : i32
    %c0_i32_1 = arith.constant 0 : i32
    return %arg0, %c0_i32, %c0_i32_0 : i32, i32, i32
  }
  func.func @transform_2(%arg0: i32) -> (i32, i32, i32) {
    %c0_i32 = arith.constant 0 : i32
    %c0_i32_0 = arith.constant 0 : i32
    %c0_i32_1 = arith.constant 0 : i32
    return %arg0, %c0_i32, %c0_i32_0 : i32, i32, i32
  }
  func.func @transform_3(%arg0: i32) -> (i32, i32, i32) {
    %c0_i32 = arith.constant 0 : i32
    %c0_i32_0 = arith.constant 0 : i32
    %c0_i32_1 = arith.constant 0 : i32
    %c0_i32_2 = arith.constant 0 : i32
    return %c0_i32, %c0_i32_0, %c0_i32_1 : i32, i32, i32
  }
  func.func @transform_4(%arg0: i32) -> (i32, i32) {
    %c0_i32 = arith.constant 0 : i32
    %c0_i32_0 = arith.constant 0 : i32
    %c0_i32_1 = arith.constant 0 : i32
    return %c0_i32, %c0_i32_0 : i32, i32
  }
  func.func @transform_5(%arg0: i32) -> (i32, i32) {
    %c0_i32 = arith.constant 0 : i32
    %c0_i32_0 = arith.constant 0 : i32
    %c0_i32_1 = arith.constant 0 : i32
    return %c0_i32, %c0_i32_0 : i32, i32
  }
  func.func @transform_6(%arg0: i32) -> (i32, i32, i32) {
    %c0_i32 = arith.constant 0 : i32
    %c0_i32_0 = arith.constant 0 : i32
    %c0_i32_1 = arith.constant 0 : i32
    return %arg0, %c0_i32, %c0_i32_0 : i32, i32, i32
  }
}

module attributes {stable_mosaic.version = 11 : i64} {
  func.func @kernel(%arg0: i32, %arg1: memref<1x8x256xf32, #tpu.memory_space<vmem>>, %arg2: memref<1x8x256xf32, #tpu.memory_space<vmem>>, %arg3: memref<1x8x256xf32, #tpu.memory_space<vmem>>, %arg4: memref<1x8x256xf32, #tpu.memory_space<vmem>>, %arg5: memref<16x8xf32, #tpu.memory_space<vmem>>, %arg6: memref<16x1xf32, #tpu.memory_space<vmem>>, %arg7: memref<1x16x256xf32, #tpu.memory_space<vmem>>, %arg8: memref<8x384xf32, #tpu.memory_space<vmem>>) attributes {dimension_semantics = [#tpu.dimension_semantics<parallel>], iteration_bounds = array<i64: 2>, scalar_prefetch = 0 : i64, scratch_operands = 1 : i64, tpu.core_type = #tpu.core_type<tc>, window_params = [{transform_indices = @transform_0, window_bounds = array<i64: 1, 8, 256>}, {transform_indices = @transform_1, window_bounds = array<i64: 1, 8, 256>}, {transform_indices = @transform_2, window_bounds = array<i64: 1, 8, 256>}, {transform_indices = @transform_3, window_bounds = array<i64: 1, 8, 256>}, {pipeline_mode = #tpu.pipeline_mode<synchronous>, transform_indices = @transform_4, window_bounds = array<i64: 16, 8>}, {pipeline_mode = #tpu.pipeline_mode<synchronous>, transform_indices = @transform_5, window_bounds = array<i64: 16, 1>}, {transform_indices = @transform_6, window_bounds = array<i64: 1, 16, 256>}]} {
    %0 = tpu.iota {dimensions = array<i32: 1>} : vector<1x384xi32>
    %c16_i32 = arith.constant 16 : i32
    %c0_i32 = arith.constant 0 : i32
    %1 = arith.cmpi eq, %c16_i32, %c0_i32 : i32
    %c1_i32 = arith.constant 1 : i32
    %2 = arith.select %1, %c1_i32, %c16_i32 : i32
    %3 = vector.broadcast %2 : i32 to vector<1x384xi32>
    %4 = arith.remsi %0, %3 : vector<1x384xi32>
    %c0_i32_0 = arith.constant 0 : i32
    %5 = vector.broadcast %c0_i32_0 : i32 to vector<1x384xi32>
    %6 = arith.cmpi ne, %4, %5 : vector<1x384xi32>
    %c0_i32_1 = arith.constant 0 : i32
    %7 = vector.broadcast %c0_i32_1 : i32 to vector<1x384xi32>
    %8 = arith.cmpi slt, %4, %7 : vector<1x384xi32>
    %c0_i32_2 = arith.constant 0 : i32
    %9 = arith.cmpi slt, %2, %c0_i32_2 : i32
    %10 = vector.broadcast %9 : i1 to vector<1x384xi1>
    %11 = vector.broadcast %10 : vector<1x384xi1> to vector<1x384xi1>
    %12 = arith.xori %8, %11 : vector<1x384xi1>
    %13 = arith.andi %12, %6 : vector<1x384xi1>
    %14 = vector.broadcast %2 : i32 to vector<1x384xi32>
    %15 = arith.addi %4, %14 : vector<1x384xi32>
    %16 = arith.select %13, %15, %4 : vector<1x384xi1>, vector<1x384xi32>
    %c15_i32 = arith.constant 15 : i32
    %17 = vector.broadcast %c15_i32 : i32 to vector<1x384xi32>
    %18 = arith.cmpi ne, %16, %17 : vector<1x384xi32>
    %19 = arith.extui %18 : vector<1x384xi1> to vector<1x384xi32>
    %20 = arith.sitofp %19 : vector<1x384xi32> to vector<1x384xf32>
    %cst = arith.constant 0.000000e+00 : f32
    %21 = vector.broadcast %cst : f32 to vector<8x384xf32>
    %c0 = arith.constant 0 : index
    %c0_3 = arith.constant 0 : index
    %22 = vector.load %arg8[%c0, %c0_3] : memref<8x384xf32, #tpu.memory_space<vmem>>, vector<8x384xf32>
    tpu.vector_store %arg8[%c0, %c0_3], %21 {strides = array<i32>} : memref<8x384xf32, #tpu.memory_space<vmem>>, vector<8x384xf32>,
    %c0_4 = arith.constant 0 : index
    %c0_5 = arith.constant 0 : index
    %c0_6 = arith.constant 0 : index
    %23 = vector.load %arg1[%c0_4, %c0_5, %c0_6] : memref<1x8x256xf32, #tpu.memory_space<vmem>>, vector<1x8x256xf32>
    %24 = vector.shape_cast %23 : vector<1x8x256xf32> to vector<8x256xf32>
    %c0_7 = arith.constant 0 : index
    %c0_8 = arith.constant 0 : index
    %25 = vector.load %arg8[%c0_7, %c0_8] : memref<8x384xf32, #tpu.memory_space<vmem>>, vector<8x256xf32>
    tpu.vector_store %arg8[%c0_7, %c0_8], %24 {strides = array<i32>} : memref<8x384xf32, #tpu.memory_space<vmem>>, vector<8x256xf32>,
    %c0_9 = arith.constant 0 : index
    %c0_10 = arith.constant 0 : index
    %26 = vector.load %arg8[%c0_9, %c0_10] : memref<8x384xf32, #tpu.memory_space<vmem>>, vector<8x384xf32>
    %c383_i32 = arith.constant 383 : i32
    %27 = tpu.dynamic_rotate %26 by %c383_i32 dim 1 : vector<8x384xf32>, i32 -> vector<8x384xf32>
    %28 = vector.broadcast %20 : vector<1x384xf32> to vector<8x384xf32>
    %29 = arith.mulf %27, %28 : vector<8x384xf32>
    %30 = arith.maximumf %26, %29 : vector<8x384xf32>
    %c368_i32 = arith.constant 368 : i32
    %31 = tpu.dynamic_rotate %26 by %c368_i32 dim 1 : vector<8x384xf32>, i32 -> vector<8x384xf32>
    %32 = arith.maximumf %30, %31 : vector<8x384xf32>
    %c367_i32 = arith.constant 367 : i32
    %33 = tpu.dynamic_rotate %26 by %c367_i32 dim 1 : vector<8x384xf32>, i32 -> vector<8x384xf32>
    %34 = vector.broadcast %20 : vector<1x384xf32> to vector<8x384xf32>
    %35 = arith.mulf %33, %34 : vector<8x384xf32>
    %36 = arith.maximumf %32, %35 : vector<8x384xf32>
    %cst_11 = arith.constant 0.000000e+00 : f32
    %37 = vector.broadcast %cst_11 : f32 to vector<8x384xf32>
    %c0_12 = arith.constant 0 : index
    %c0_13 = arith.constant 0 : index
    %38 = vector.load %arg8[%c0_12, %c0_13] : memref<8x384xf32, #tpu.memory_space<vmem>>, vector<8x384xf32>
    tpu.vector_store %arg8[%c0_12, %c0_13], %37 {strides = array<i32>} : memref<8x384xf32, #tpu.memory_space<vmem>>, vector<8x384xf32>,
    %c0_14 = arith.constant 0 : index
    %c0_15 = arith.constant 0 : index
    %c0_16 = arith.constant 0 : index
    %39 = vector.load %arg2[%c0_14, %c0_15, %c0_16] : memref<1x8x256xf32, #tpu.memory_space<vmem>>, vector<1x8x256xf32>
    %40 = vector.shape_cast %39 : vector<1x8x256xf32> to vector<8x256xf32>
    %c0_17 = arith.constant 0 : index
    %c0_18 = arith.constant 0 : index
    %41 = vector.load %arg8[%c0_17, %c0_18] : memref<8x384xf32, #tpu.memory_space<vmem>>, vector<8x256xf32>
    tpu.vector_store %arg8[%c0_17, %c0_18], %40 {strides = array<i32>} : memref<8x384xf32, #tpu.memory_space<vmem>>, vector<8x256xf32>,
    %c0_19 = arith.constant 0 : index
    %c0_20 = arith.constant 0 : index
    %42 = vector.load %arg8[%c0_19, %c0_20] : memref<8x384xf32, #tpu.memory_space<vmem>>, vector<8x384xf32>
    %43 = arith.maximumf %36, %42 : vector<8x384xf32>
    %c368_i32_21 = arith.constant 368 : i32
    %44 = tpu.dynamic_rotate %42 by %c368_i32_21 dim 1 : vector<8x384xf32>, i32 -> vector<8x384xf32>
    %45 = arith.maximumf %43, %44 : vector<8x384xf32>
    %cst_22 = arith.constant 0.000000e+00 : f32
    %46 = vector.broadcast %cst_22 : f32 to vector<8x384xf32>
    %c0_23 = arith.constant 0 : index
    %c0_24 = arith.constant 0 : index
    %47 = vector.load %arg8[%c0_23, %c0_24] : memref<8x384xf32, #tpu.memory_space<vmem>>, vector<8x384xf32>
    tpu.vector_store %arg8[%c0_23, %c0_24], %46 {strides = array<i32>} : memref<8x384xf32, #tpu.memory_space<vmem>>, vector<8x384xf32>,
    %c0_25 = arith.constant 0 : index
    %c0_26 = arith.constant 0 : index
    %c0_27 = arith.constant 0 : index
    %48 = vector.load %arg3[%c0_25, %c0_26, %c0_27] : memref<1x8x256xf32, #tpu.memory_space<vmem>>, vector<1x8x256xf32>
    %49 = vector.shape_cast %48 : vector<1x8x256xf32> to vector<8x256xf32>
    %c0_28 = arith.constant 0 : index
    %c0_29 = arith.constant 0 : index
    %50 = vector.load %arg8[%c0_28, %c0_29] : memref<8x384xf32, #tpu.memory_space<vmem>>, vector<8x256xf32>
    tpu.vector_store %arg8[%c0_28, %c0_29], %49 {strides = array<i32>} : memref<8x384xf32, #tpu.memory_space<vmem>>, vector<8x256xf32>,
    %c0_30 = arith.constant 0 : index
    %c0_31 = arith.constant 0 : index
    %51 = vector.load %arg8[%c0_30, %c0_31] : memref<8x384xf32, #tpu.memory_space<vmem>>, vector<8x384xf32>
    %52 = arith.maximumf %45, %51 : vector<8x384xf32>
    %c383_i32_32 = arith.constant 383 : i32
    %53 = tpu.dynamic_rotate %51 by %c383_i32_32 dim 1 : vector<8x384xf32>, i32 -> vector<8x384xf32>
    %54 = vector.broadcast %20 : vector<1x384xf32> to vector<8x384xf32>
    %55 = arith.mulf %53, %54 : vector<8x384xf32>
    %56 = arith.maximumf %52, %55 : vector<8x384xf32>
    %57 = vector.extract_strided_slice %56 {offsets = [0, 0], sizes = [8, 256], strides = [1, 1]} : vector<8x384xf32> to vector<8x256xf32>
    %c0_33 = arith.constant 0 : index
    %c0_34 = arith.constant 0 : index
    %c0_35 = arith.constant 0 : index
    %58 = vector.load %arg4[%c0_33, %c0_34, %c0_35] : memref<1x8x256xf32, #tpu.memory_space<vmem>>, vector<1x8x256xf32>
    %59 = vector.shape_cast %58 : vector<1x8x256xf32> to vector<8x256xf32>
    %60 = arith.maximumf %57, %59 : vector<8x256xf32>
    %c0_36 = arith.constant 0 : index
    %c0_37 = arith.constant 0 : index
    %61 = vector.load %arg5[%c0_36, %c0_37] : memref<16x8xf32, #tpu.memory_space<vmem>>, vector<16x8xf32>
    %cst_38 = arith.constant dense<0.000000e+00> : vector<16x256xf32>
    %62 = tpu.matmul %61, %60, %cst_38 {dimension_numbers = #tpu.dot_dimension_numbers<[1], [0], [0], [1], [0, 0, 1, 1], [], []>} : vector<16x8xf32>, vector<8x256xf32>, vector<16x256xf32> -> vector<16x256xf32>
    %c0_39 = arith.constant 0 : index
    %c0_40 = arith.constant 0 : index
    %63 = vector.load %arg6[%c0_39, %c0_40] : memref<16x1xf32, #tpu.memory_space<vmem>>, vector<16x1xf32>
    %64 = vector.broadcast %63 : vector<16x1xf32> to vector<16x256xf32>
    %65 = arith.addf %62, %64 : vector<16x256xf32>
    %c0_41 = arith.constant 0 : index
    %c0_42 = arith.constant 0 : index
    %c0_43 = arith.constant 0 : index
    %66 = vector.load %arg7[%c0_41, %c0_42, %c0_43] : memref<1x16x256xf32, #tpu.memory_space<vmem>>, vector<1x16x256xf32>
    %67 = vector.shape_cast %66 : vector<1x16x256xf32> to vector<16x256xf32>
    %68 = vector.shape_cast %65 : vector<16x256xf32> to vector<1x16x256xf32>
    tpu.vector_store %arg7[%c0_41, %c0_42, %c0_43], %68 {strides = array<i32>} : memref<1x16x256xf32, #tpu.memory_space<vmem>>, vector<1x16x256xf32>,
    return
  }
  func.func @transform_0(%arg0: i32) -> (i32, i32, i32) {
    %c0_i32 = arith.constant 0 : i32
    %c0_i32_0 = arith.constant 0 : i32
    %c0_i32_1 = arith.constant 0 : i32
    return %arg0, %c0_i32, %c0_i32_0 : i32, i32, i32
  }
  func.func @transform_1(%arg0: i32) -> (i32, i32, i32) {
    %c0_i32 = arith.constant 0 : i32
    %c0_i32_0 = arith.constant 0 : i32
    %c0_i32_1 = arith.constant 0 : i32
    return %arg0, %c0_i32, %c0_i32_0 : i32, i32, i32
  }
  func.func @transform_2(%arg0: i32) -> (i32, i32, i32) {
    %c0_i32 = arith.constant 0 : i32
    %c0_i32_0 = arith.constant 0 : i32
    %c0_i32_1 = arith.constant 0 : i32
    return %arg0, %c0_i32, %c0_i32_0 : i32, i32, i32
  }
  func.func @transform_3(%arg0: i32) -> (i32, i32, i32) {
    %c0_i32 = arith.constant 0 : i32
    %c0_i32_0 = arith.constant 0 : i32
    %c0_i32_1 = arith.constant 0 : i32
    return %arg0, %c0_i32, %c0_i32_0 : i32, i32, i32
  }
  func.func @transform_4(%arg0: i32) -> (i32, i32) {
    %c0_i32 = arith.constant 0 : i32
    %c0_i32_0 = arith.constant 0 : i32
    %c0_i32_1 = arith.constant 0 : i32
    return %c0_i32, %c0_i32_0 : i32, i32
  }
  func.func @transform_5(%arg0: i32) -> (i32, i32) {
    %c0_i32 = arith.constant 0 : i32
    %c0_i32_0 = arith.constant 0 : i32
    %c0_i32_1 = arith.constant 0 : i32
    return %c0_i32, %c0_i32_0 : i32, i32
  }
  func.func @transform_6(%arg0: i32) -> (i32, i32, i32) {
    %c0_i32 = arith.constant 0 : i32
    %c0_i32_0 = arith.constant 0 : i32
    %c0_i32_1 = arith.constant 0 : i32
    return %arg0, %c0_i32, %c0_i32_0 : i32, i32, i32
  }
}

module attributes {stable_mosaic.version = 11 : i64} {
  func.func @kernel(%arg0: i32, %arg1: memref<3xf32, #tpu.memory_space<smem>>, %arg2: memref<1x16x256xf32, #tpu.memory_space<vmem>>, %arg3: memref<1x16x256xf32, #tpu.memory_space<vmem>>, %arg4: memref<1x16x256xf32, #tpu.memory_space<vmem>>, %arg5: memref<9x16x1xf32, #tpu.memory_space<vmem>>, %arg6: memref<16x16xf32, #tpu.memory_space<vmem>>, %arg7: memref<16x1xf32, #tpu.memory_space<vmem>>, %arg8: memref<1x16x256xf32, #tpu.memory_space<vmem>>, %arg9: memref<16x384xf32, #tpu.memory_space<vmem>>) attributes {dimension_semantics = [#tpu.dimension_semantics<parallel>], iteration_bounds = array<i64: 2>, scalar_prefetch = 0 : i64, scratch_operands = 1 : i64, tpu.core_type = #tpu.core_type<tc>, window_params = [{transform_indices = @transform_0, window_bounds = array<i64: 3>}, {transform_indices = @transform_1, window_bounds = array<i64: 1, 16, 256>}, {transform_indices = @transform_2, window_bounds = array<i64: 1, 16, 256>}, {transform_indices = @transform_3, window_bounds = array<i64: 1, 16, 256>}, {pipeline_mode = #tpu.pipeline_mode<synchronous>, transform_indices = @transform_4, window_bounds = array<i64: 9, 16, 1>}, {pipeline_mode = #tpu.pipeline_mode<synchronous>, transform_indices = @transform_5, window_bounds = array<i64: 16, 16>}, {pipeline_mode = #tpu.pipeline_mode<synchronous>, transform_indices = @transform_6, window_bounds = array<i64: 16, 1>}, {transform_indices = @transform_7, window_bounds = array<i64: 1, 16, 256>}]} {
    %c0 = arith.constant 0 : index
    %c0_0 = arith.constant 0 : index
    %c0_1 = arith.constant 0 : index
    %0 = vector.load %arg2[%c0, %c0_0, %c0_1] : memref<1x16x256xf32, #tpu.memory_space<vmem>>, vector<1x16x256xf32>
    %1 = vector.shape_cast %0 : vector<1x16x256xf32> to vector<16x256xf32>
    %c0_2 = arith.constant 0 : index
    %2 = memref.load %arg1[%c0_2] : memref<3xf32, #tpu.memory_space<smem>>
    %3 = vector.broadcast %2 : f32 to vector<16x256xf32>
    %4 = arith.mulf %1, %3 : vector<16x256xf32>
    %c0_3 = arith.constant 0 : index
    %c0_4 = arith.constant 0 : index
    %c0_5 = arith.constant 0 : index
    %5 = vector.load %arg3[%c0_3, %c0_4, %c0_5] : memref<1x16x256xf32, #tpu.memory_space<vmem>>, vector<1x16x256xf32>
    %6 = vector.shape_cast %5 : vector<1x16x256xf32> to vector<16x256xf32>
    %c1 = arith.constant 1 : index
    %7 = memref.load %arg1[%c1] : memref<3xf32, #tpu.memory_space<smem>>
    %8 = vector.broadcast %7 : f32 to vector<16x256xf32>
    %9 = arith.mulf %6, %8 : vector<16x256xf32>
    %10 = arith.addf %4, %9 : vector<16x256xf32>
    %c0_6 = arith.constant 0 : index
    %c0_7 = arith.constant 0 : index
    %c0_8 = arith.constant 0 : index
    %11 = vector.load %arg4[%c0_6, %c0_7, %c0_8] : memref<1x16x256xf32, #tpu.memory_space<vmem>>, vector<1x16x256xf32>
    %12 = vector.shape_cast %11 : vector<1x16x256xf32> to vector<16x256xf32>
    %c2 = arith.constant 2 : index
    %13 = memref.load %arg1[%c2] : memref<3xf32, #tpu.memory_space<smem>>
    %14 = vector.broadcast %13 : f32 to vector<16x256xf32>
    %15 = arith.mulf %12, %14 : vector<16x256xf32>
    %16 = arith.addf %10, %15 : vector<16x256xf32>
    %cst = arith.constant 0.000000e+00 : f32
    %17 = vector.broadcast %cst : f32 to vector<16x256xf32>
    %18 = arith.subf %17, %16 : vector<16x256xf32>
    %19 = math.exp %18 : vector<16x256xf32>
    %cst_9 = arith.constant 1.000000e+00 : f32
    %20 = vector.broadcast %cst_9 : f32 to vector<16x256xf32>
    %21 = arith.addf %20, %19 : vector<16x256xf32>
    %22 = tpu.reciprocal %21 : vector<16x256xf32> -> vector<16x256xf32>
    %23 = arith.mulf %16, %22 : vector<16x256xf32>
    %cst_10 = arith.constant 0.000000e+00 : f32
    %24 = vector.broadcast %cst_10 : f32 to vector<16x384xf32>
    %c0_11 = arith.constant 0 : index
    %c0_12 = arith.constant 0 : index
    %25 = vector.load %arg9[%c0_11, %c0_12] : memref<16x384xf32, #tpu.memory_space<vmem>>, vector<16x384xf32>
    tpu.vector_store %arg9[%c0_11, %c0_12], %24 {strides = array<i32>} : memref<16x384xf32, #tpu.memory_space<vmem>>, vector<16x384xf32>,
    %c0_13 = arith.constant 0 : index
    %c0_14 = arith.constant 0 : index
    %26 = vector.load %arg9[%c0_13, %c0_14] : memref<16x384xf32, #tpu.memory_space<vmem>>, vector<16x256xf32>
    tpu.vector_store %arg9[%c0_13, %c0_14], %23 {strides = array<i32>} : memref<16x384xf32, #tpu.memory_space<vmem>>, vector<16x256xf32>,
    %c0_15 = arith.constant 0 : index
    %c0_16 = arith.constant 0 : index
    %27 = vector.load %arg9[%c0_15, %c0_16] : memref<16x384xf32, #tpu.memory_space<vmem>>, vector<16x384xf32>
    %28 = tpu.iota {dimensions = array<i32: 1>} : vector<1x384xi32>
    %c16_i32 = arith.constant 16 : i32
    %c0_i32 = arith.constant 0 : i32
    %29 = arith.cmpi eq, %c16_i32, %c0_i32 : i32
    %c1_i32 = arith.constant 1 : i32
    %30 = arith.select %29, %c1_i32, %c16_i32 : i32
    %31 = vector.broadcast %30 : i32 to vector<1x384xi32>
    %32 = arith.remsi %28, %31 : vector<1x384xi32>
    %c0_i32_17 = arith.constant 0 : i32
    %33 = vector.broadcast %c0_i32_17 : i32 to vector<1x384xi32>
    %34 = arith.cmpi ne, %32, %33 : vector<1x384xi32>
    %c0_i32_18 = arith.constant 0 : i32
    %35 = vector.broadcast %c0_i32_18 : i32 to vector<1x384xi32>
    %36 = arith.cmpi slt, %32, %35 : vector<1x384xi32>
    %c0_i32_19 = arith.constant 0 : i32
    %37 = arith.cmpi slt, %30, %c0_i32_19 : i32
    %38 = vector.broadcast %37 : i1 to vector<1x384xi1>
    %39 = vector.broadcast %38 : vector<1x384xi1> to vector<1x384xi1>
    %40 = arith.xori %36, %39 : vector<1x384xi1>
    %41 = arith.andi %40, %34 : vector<1x384xi1>
    %42 = vector.broadcast %30 : i32 to vector<1x384xi32>
    %43 = arith.addi %32, %42 : vector<1x384xi32>
    %44 = arith.select %41, %43, %32 : vector<1x384xi1>, vector<1x384xi32>
    %c0_i32_20 = arith.constant 0 : i32
    %45 = vector.broadcast %c0_i32_20 : i32 to vector<1x384xi32>
    %46 = arith.cmpi ne, %44, %45 : vector<1x384xi32>
    %47 = arith.extui %46 : vector<1x384xi1> to vector<1x384xi32>
    %48 = arith.sitofp %47 : vector<1x384xi32> to vector<1x384xf32>
    %c15_i32 = arith.constant 15 : i32
    %49 = vector.broadcast %c15_i32 : i32 to vector<1x384xi32>
    %50 = arith.cmpi ne, %44, %49 : vector<1x384xi32>
    %51 = arith.extui %50 : vector<1x384xi1> to vector<1x384xi32>
    %52 = arith.sitofp %51 : vector<1x384xi32> to vector<1x384xf32>
    %cst_21 = arith.constant 0.000000e+00 : f32
    %53 = vector.broadcast %cst_21 : f32 to vector<16x384xf32>
    %c17_i32 = arith.constant 17 : i32
    %54 = tpu.dynamic_rotate %27 by %c17_i32 dim 1 : vector<16x384xf32>, i32 -> vector<16x384xf32>
    %55 = vector.broadcast %48 : vector<1x384xf32> to vector<16x384xf32>
    %56 = arith.mulf %54, %55 : vector<16x384xf32>
    %c0_22 = arith.constant 0 : index
    %c0_23 = arith.constant 0 : index
    %c0_24 = arith.constant 0 : index
    %57 = vector.load %arg5[%c0_22, %c0_23, %c0_24] : memref<9x16x1xf32, #tpu.memory_space<vmem>>, vector<1x16x1xf32>
    %58 = vector.shape_cast %57 : vector<1x16x1xf32> to vector<16x1xf32>
    %59 = vector.broadcast %58 : vector<16x1xf32> to vector<16x384xf32>
    %60 = arith.mulf %56, %59 : vector<16x384xf32>
    %61 = arith.addf %53, %60 : vector<16x384xf32>
    %c16_i32_25 = arith.constant 16 : i32
    %62 = tpu.dynamic_rotate %27 by %c16_i32_25 dim 1 : vector<16x384xf32>, i32 -> vector<16x384xf32>
    %c1_26 = arith.constant 1 : index
    %c0_27 = arith.constant 0 : index
    %c0_28 = arith.constant 0 : index
    %63 = vector.load %arg5[%c1_26, %c0_27, %c0_28] : memref<9x16x1xf32, #tpu.memory_space<vmem>>, vector<1x16x1xf32>
    %64 = vector.shape_cast %63 : vector<1x16x1xf32> to vector<16x1xf32>
    %65 = vector.broadcast %64 : vector<16x1xf32> to vector<16x384xf32>
    %66 = arith.mulf %62, %65 : vector<16x384xf32>
    %67 = arith.addf %61, %66 : vector<16x384xf32>
    %c15_i32_29 = arith.constant 15 : i32
    %68 = tpu.dynamic_rotate %27 by %c15_i32_29 dim 1 : vector<16x384xf32>, i32 -> vector<16x384xf32>
    %69 = vector.broadcast %52 : vector<1x384xf32> to vector<16x384xf32>
    %70 = arith.mulf %68, %69 : vector<16x384xf32>
    %c2_30 = arith.constant 2 : index
    %c0_31 = arith.constant 0 : index
    %c0_32 = arith.constant 0 : index
    %71 = vector.load %arg5[%c2_30, %c0_31, %c0_32] : memref<9x16x1xf32, #tpu.memory_space<vmem>>, vector<1x16x1xf32>
    %72 = vector.shape_cast %71 : vector<1x16x1xf32> to vector<16x1xf32>
    %73 = vector.broadcast %72 : vector<16x1xf32> to vector<16x384xf32>
    %74 = arith.mulf %70, %73 : vector<16x384xf32>
    %75 = arith.addf %67, %74 : vector<16x384xf32>
    %c1_i32_33 = arith.constant 1 : i32
    %76 = tpu.dynamic_rotate %27 by %c1_i32_33 dim 1 : vector<16x384xf32>, i32 -> vector<16x384xf32>
    %77 = vector.broadcast %48 : vector<1x384xf32> to vector<16x384xf32>
    %78 = arith.mulf %76, %77 : vector<16x384xf32>
    %c3 = arith.constant 3 : index
    %c0_34 = arith.constant 0 : index
    %c0_35 = arith.constant 0 : index
    %79 = vector.load %arg5[%c3, %c0_34, %c0_35] : memref<9x16x1xf32, #tpu.memory_space<vmem>>, vector<1x16x1xf32>
    %80 = vector.shape_cast %79 : vector<1x16x1xf32> to vector<16x1xf32>
    %81 = vector.broadcast %80 : vector<16x1xf32> to vector<16x384xf32>
    %82 = arith.mulf %78, %81 : vector<16x384xf32>
    %83 = arith.addf %75, %82 : vector<16x384xf32>
    %c4 = arith.constant 4 : index
    %c0_36 = arith.constant 0 : index
    %c0_37 = arith.constant 0 : index
    %84 = vector.load %arg5[%c4, %c0_36, %c0_37] : memref<9x16x1xf32, #tpu.memory_space<vmem>>, vector<1x16x1xf32>
    %85 = vector.shape_cast %84 : vector<1x16x1xf32> to vector<16x1xf32>
    %86 = vector.broadcast %85 : vector<16x1xf32> to vector<16x384xf32>
    %87 = arith.mulf %27, %86 : vector<16x384xf32>
    %88 = arith.addf %83, %87 : vector<16x384xf32>
    %c383_i32 = arith.constant 383 : i32
    %89 = tpu.dynamic_rotate %27 by %c383_i32 dim 1 : vector<16x384xf32>, i32 -> vector<16x384xf32>
    %90 = vector.broadcast %52 : vector<1x384xf32> to vector<16x384xf32>
    %91 = arith.mulf %89, %90 : vector<16x384xf32>
    %c5 = arith.constant 5 : index
    %c0_38 = arith.constant 0 : index
    %c0_39 = arith.constant 0 : index
    %92 = vector.load %arg5[%c5, %c0_38, %c0_39] : memref<9x16x1xf32, #tpu.memory_space<vmem>>, vector<1x16x1xf32>
    %93 = vector.shape_cast %92 : vector<1x16x1xf32> to vector<16x1xf32>
    %94 = vector.broadcast %93 : vector<16x1xf32> to vector<16x384xf32>
    %95 = arith.mulf %91, %94 : vector<16x384xf32>
    %96 = arith.addf %88, %95 : vector<16x384xf32>
    %c369_i32 = arith.constant 369 : i32
    %97 = tpu.dynamic_rotate %27 by %c369_i32 dim 1 : vector<16x384xf32>, i32 -> vector<16x384xf32>
    %98 = vector.broadcast %48 : vector<1x384xf32> to vector<16x384xf32>
    %99 = arith.mulf %97, %98 : vector<16x384xf32>
    %c6 = arith.constant 6 : index
    %c0_40 = arith.constant 0 : index
    %c0_41 = arith.constant 0 : index
    %100 = vector.load %arg5[%c6, %c0_40, %c0_41] : memref<9x16x1xf32, #tpu.memory_space<vmem>>, vector<1x16x1xf32>
    %101 = vector.shape_cast %100 : vector<1x16x1xf32> to vector<16x1xf32>
    %102 = vector.broadcast %101 : vector<16x1xf32> to vector<16x384xf32>
    %103 = arith.mulf %99, %102 : vector<16x384xf32>
    %104 = arith.addf %96, %103 : vector<16x384xf32>
    %c368_i32 = arith.constant 368 : i32
    %105 = tpu.dynamic_rotate %27 by %c368_i32 dim 1 : vector<16x384xf32>, i32 -> vector<16x384xf32>
    %c7 = arith.constant 7 : index
    %c0_42 = arith.constant 0 : index
    %c0_43 = arith.constant 0 : index
    %106 = vector.load %arg5[%c7, %c0_42, %c0_43] : memref<9x16x1xf32, #tpu.memory_space<vmem>>, vector<1x16x1xf32>
    %107 = vector.shape_cast %106 : vector<1x16x1xf32> to vector<16x1xf32>
    %108 = vector.broadcast %107 : vector<16x1xf32> to vector<16x384xf32>
    %109 = arith.mulf %105, %108 : vector<16x384xf32>
    %110 = arith.addf %104, %109 : vector<16x384xf32>
    %c367_i32 = arith.constant 367 : i32
    %111 = tpu.dynamic_rotate %27 by %c367_i32 dim 1 : vector<16x384xf32>, i32 -> vector<16x384xf32>
    %112 = vector.broadcast %52 : vector<1x384xf32> to vector<16x384xf32>
    %113 = arith.mulf %111, %112 : vector<16x384xf32>
    %c8 = arith.constant 8 : index
    %c0_44 = arith.constant 0 : index
    %c0_45 = arith.constant 0 : index
    %114 = vector.load %arg5[%c8, %c0_44, %c0_45] : memref<9x16x1xf32, #tpu.memory_space<vmem>>, vector<1x16x1xf32>
    %115 = vector.shape_cast %114 : vector<1x16x1xf32> to vector<16x1xf32>
    %116 = vector.broadcast %115 : vector<16x1xf32> to vector<16x384xf32>
    %117 = arith.mulf %113, %116 : vector<16x384xf32>
    %118 = arith.addf %110, %117 : vector<16x384xf32>
    %119 = vector.extract_strided_slice %118 {offsets = [0, 0], sizes = [16, 256], strides = [1, 1]} : vector<16x384xf32> to vector<16x256xf32>
    %c0_46 = arith.constant 0 : index
    %c0_47 = arith.constant 0 : index
    %120 = vector.load %arg6[%c0_46, %c0_47] : memref<16x16xf32, #tpu.memory_space<vmem>>, vector<16x16xf32>
    %cst_48 = arith.constant dense<0.000000e+00> : vector<16x256xf32>
    %121 = tpu.matmul %120, %119, %cst_48 {dimension_numbers = #tpu.dot_dimension_numbers<[1], [0], [0], [1], [0, 0, 1, 1], [], []>} : vector<16x16xf32>, vector<16x256xf32>, vector<16x256xf32> -> vector<16x256xf32>
    %c0_49 = arith.constant 0 : index
    %c0_50 = arith.constant 0 : index
    %122 = vector.load %arg7[%c0_49, %c0_50] : memref<16x1xf32, #tpu.memory_space<vmem>>, vector<16x1xf32>
    %123 = vector.broadcast %122 : vector<16x1xf32> to vector<16x256xf32>
    %124 = arith.addf %121, %123 : vector<16x256xf32>
    %c0_51 = arith.constant 0 : index
    %c0_52 = arith.constant 0 : index
    %c0_53 = arith.constant 0 : index
    %125 = vector.load %arg8[%c0_51, %c0_52, %c0_53] : memref<1x16x256xf32, #tpu.memory_space<vmem>>, vector<1x16x256xf32>
    %126 = vector.shape_cast %125 : vector<1x16x256xf32> to vector<16x256xf32>
    %127 = vector.shape_cast %124 : vector<16x256xf32> to vector<1x16x256xf32>
    tpu.vector_store %arg8[%c0_51, %c0_52, %c0_53], %127 {strides = array<i32>} : memref<1x16x256xf32, #tpu.memory_space<vmem>>, vector<1x16x256xf32>,
    return
  }
  func.func @transform_0(%arg0: i32) -> i32 {
    %c0_i32 = arith.constant 0 : i32
    %c0_i32_0 = arith.constant 0 : i32
    return %c0_i32 : i32
  }
  func.func @transform_1(%arg0: i32) -> (i32, i32, i32) {
    %c0_i32 = arith.constant 0 : i32
    %c0_i32_0 = arith.constant 0 : i32
    %c0_i32_1 = arith.constant 0 : i32
    return %arg0, %c0_i32, %c0_i32_0 : i32, i32, i32
  }
  func.func @transform_2(%arg0: i32) -> (i32, i32, i32) {
    %c0_i32 = arith.constant 0 : i32
    %c0_i32_0 = arith.constant 0 : i32
    %c0_i32_1 = arith.constant 0 : i32
    return %arg0, %c0_i32, %c0_i32_0 : i32, i32, i32
  }
  func.func @transform_3(%arg0: i32) -> (i32, i32, i32) {
    %c0_i32 = arith.constant 0 : i32
    %c0_i32_0 = arith.constant 0 : i32
    %c0_i32_1 = arith.constant 0 : i32
    return %arg0, %c0_i32, %c0_i32_0 : i32, i32, i32
  }
  func.func @transform_4(%arg0: i32) -> (i32, i32, i32) {
    %c0_i32 = arith.constant 0 : i32
    %c0_i32_0 = arith.constant 0 : i32
    %c0_i32_1 = arith.constant 0 : i32
    %c0_i32_2 = arith.constant 0 : i32
    return %c0_i32, %c0_i32_0, %c0_i32_1 : i32, i32, i32
  }
  func.func @transform_5(%arg0: i32) -> (i32, i32) {
    %c0_i32 = arith.constant 0 : i32
    %c0_i32_0 = arith.constant 0 : i32
    %c0_i32_1 = arith.constant 0 : i32
    return %c0_i32, %c0_i32_0 : i32, i32
  }
  func.func @transform_6(%arg0: i32) -> (i32, i32) {
    %c0_i32 = arith.constant 0 : i32
    %c0_i32_0 = arith.constant 0 : i32
    %c0_i32_1 = arith.constant 0 : i32
    return %c0_i32, %c0_i32_0 : i32, i32
  }
  func.func @transform_7(%arg0: i32) -> (i32, i32, i32) {
    %c0_i32 = arith.constant 0 : i32
    %c0_i32_0 = arith.constant 0 : i32
    %c0_i32_1 = arith.constant 0 : i32
    return %arg0, %c0_i32, %c0_i32_0 : i32, i32, i32
  }
}

module attributes {stable_mosaic.version = 11 : i64} {
  func.func @kernel(%arg0: i32, %arg1: memref<1x16x64xf32, #tpu.memory_space<vmem>>, %arg2: memref<1x16x64xf32, #tpu.memory_space<vmem>>, %arg3: memref<1x16x64xf32, #tpu.memory_space<vmem>>, %arg4: memref<1x16x64xf32, #tpu.memory_space<vmem>>, %arg5: memref<32x16xf32, #tpu.memory_space<vmem>>, %arg6: memref<32x1xf32, #tpu.memory_space<vmem>>, %arg7: memref<1x32x64xf32, #tpu.memory_space<vmem>>, %arg8: memref<16x128xf32, #tpu.memory_space<vmem>>) attributes {dimension_semantics = [#tpu.dimension_semantics<parallel>], iteration_bounds = array<i64: 2>, scalar_prefetch = 0 : i64, scratch_operands = 1 : i64, tpu.core_type = #tpu.core_type<tc>, window_params = [{transform_indices = @transform_0, window_bounds = array<i64: 1, 16, 64>}, {transform_indices = @transform_1, window_bounds = array<i64: 1, 16, 64>}, {transform_indices = @transform_2, window_bounds = array<i64: 1, 16, 64>}, {transform_indices = @transform_3, window_bounds = array<i64: 1, 16, 64>}, {pipeline_mode = #tpu.pipeline_mode<synchronous>, transform_indices = @transform_4, window_bounds = array<i64: 32, 16>}, {pipeline_mode = #tpu.pipeline_mode<synchronous>, transform_indices = @transform_5, window_bounds = array<i64: 32, 1>}, {transform_indices = @transform_6, window_bounds = array<i64: 1, 32, 64>}]} {
    %0 = tpu.iota {dimensions = array<i32: 1>} : vector<1x128xi32>
    %c8_i32 = arith.constant 8 : i32
    %c0_i32 = arith.constant 0 : i32
    %1 = arith.cmpi eq, %c8_i32, %c0_i32 : i32
    %c1_i32 = arith.constant 1 : i32
    %2 = arith.select %1, %c1_i32, %c8_i32 : i32
    %3 = vector.broadcast %2 : i32 to vector<1x128xi32>
    %4 = arith.remsi %0, %3 : vector<1x128xi32>
    %c0_i32_0 = arith.constant 0 : i32
    %5 = vector.broadcast %c0_i32_0 : i32 to vector<1x128xi32>
    %6 = arith.cmpi ne, %4, %5 : vector<1x128xi32>
    %c0_i32_1 = arith.constant 0 : i32
    %7 = vector.broadcast %c0_i32_1 : i32 to vector<1x128xi32>
    %8 = arith.cmpi slt, %4, %7 : vector<1x128xi32>
    %c0_i32_2 = arith.constant 0 : i32
    %9 = arith.cmpi slt, %2, %c0_i32_2 : i32
    %10 = vector.broadcast %9 : i1 to vector<1x128xi1>
    %11 = vector.broadcast %10 : vector<1x128xi1> to vector<1x128xi1>
    %12 = arith.xori %8, %11 : vector<1x128xi1>
    %13 = arith.andi %12, %6 : vector<1x128xi1>
    %14 = vector.broadcast %2 : i32 to vector<1x128xi32>
    %15 = arith.addi %4, %14 : vector<1x128xi32>
    %16 = arith.select %13, %15, %4 : vector<1x128xi1>, vector<1x128xi32>
    %c7_i32 = arith.constant 7 : i32
    %17 = vector.broadcast %c7_i32 : i32 to vector<1x128xi32>
    %18 = arith.cmpi ne, %16, %17 : vector<1x128xi32>
    %19 = arith.extui %18 : vector<1x128xi1> to vector<1x128xi32>
    %20 = arith.sitofp %19 : vector<1x128xi32> to vector<1x128xf32>
    %cst = arith.constant 0.000000e+00 : f32
    %21 = vector.broadcast %cst : f32 to vector<16x128xf32>
    %c0 = arith.constant 0 : index
    %c0_3 = arith.constant 0 : index
    %22 = vector.load %arg8[%c0, %c0_3] : memref<16x128xf32, #tpu.memory_space<vmem>>, vector<16x128xf32>
    tpu.vector_store %arg8[%c0, %c0_3], %21 {strides = array<i32>} : memref<16x128xf32, #tpu.memory_space<vmem>>, vector<16x128xf32>,
    %c0_4 = arith.constant 0 : index
    %c0_5 = arith.constant 0 : index
    %c0_6 = arith.constant 0 : index
    %23 = vector.load %arg1[%c0_4, %c0_5, %c0_6] : memref<1x16x64xf32, #tpu.memory_space<vmem>>, vector<1x16x64xf32>
    %24 = vector.shape_cast %23 : vector<1x16x64xf32> to vector<16x64xf32>
    %c0_7 = arith.constant 0 : index
    %c0_8 = arith.constant 0 : index
    %25 = vector.load %arg8[%c0_7, %c0_8] : memref<16x128xf32, #tpu.memory_space<vmem>>, vector<16x64xf32>
    tpu.vector_store %arg8[%c0_7, %c0_8], %24 {strides = array<i32>} : memref<16x128xf32, #tpu.memory_space<vmem>>, vector<16x64xf32>,
    %c0_9 = arith.constant 0 : index
    %c0_10 = arith.constant 0 : index
    %26 = vector.load %arg8[%c0_9, %c0_10] : memref<16x128xf32, #tpu.memory_space<vmem>>, vector<16x128xf32>
    %c127_i32 = arith.constant 127 : i32
    %27 = tpu.dynamic_rotate %26 by %c127_i32 dim 1 : vector<16x128xf32>, i32 -> vector<16x128xf32>
    %28 = vector.broadcast %20 : vector<1x128xf32> to vector<16x128xf32>
    %29 = arith.mulf %27, %28 : vector<16x128xf32>
    %30 = arith.maximumf %26, %29 : vector<16x128xf32>
    %c120_i32 = arith.constant 120 : i32
    %31 = tpu.dynamic_rotate %26 by %c120_i32 dim 1 : vector<16x128xf32>, i32 -> vector<16x128xf32>
    %32 = arith.maximumf %30, %31 : vector<16x128xf32>
    %c119_i32 = arith.constant 119 : i32
    %33 = tpu.dynamic_rotate %26 by %c119_i32 dim 1 : vector<16x128xf32>, i32 -> vector<16x128xf32>
    %34 = vector.broadcast %20 : vector<1x128xf32> to vector<16x128xf32>
    %35 = arith.mulf %33, %34 : vector<16x128xf32>
    %36 = arith.maximumf %32, %35 : vector<16x128xf32>
    %cst_11 = arith.constant 0.000000e+00 : f32
    %37 = vector.broadcast %cst_11 : f32 to vector<16x128xf32>
    %c0_12 = arith.constant 0 : index
    %c0_13 = arith.constant 0 : index
    %38 = vector.load %arg8[%c0_12, %c0_13] : memref<16x128xf32, #tpu.memory_space<vmem>>, vector<16x128xf32>
    tpu.vector_store %arg8[%c0_12, %c0_13], %37 {strides = array<i32>} : memref<16x128xf32, #tpu.memory_space<vmem>>, vector<16x128xf32>,
    %c0_14 = arith.constant 0 : index
    %c0_15 = arith.constant 0 : index
    %c0_16 = arith.constant 0 : index
    %39 = vector.load %arg2[%c0_14, %c0_15, %c0_16] : memref<1x16x64xf32, #tpu.memory_space<vmem>>, vector<1x16x64xf32>
    %40 = vector.shape_cast %39 : vector<1x16x64xf32> to vector<16x64xf32>
    %c0_17 = arith.constant 0 : index
    %c0_18 = arith.constant 0 : index
    %41 = vector.load %arg8[%c0_17, %c0_18] : memref<16x128xf32, #tpu.memory_space<vmem>>, vector<16x64xf32>
    tpu.vector_store %arg8[%c0_17, %c0_18], %40 {strides = array<i32>} : memref<16x128xf32, #tpu.memory_space<vmem>>, vector<16x64xf32>,
    %c0_19 = arith.constant 0 : index
    %c0_20 = arith.constant 0 : index
    %42 = vector.load %arg8[%c0_19, %c0_20] : memref<16x128xf32, #tpu.memory_space<vmem>>, vector<16x128xf32>
    %43 = arith.maximumf %36, %42 : vector<16x128xf32>
    %c120_i32_21 = arith.constant 120 : i32
    %44 = tpu.dynamic_rotate %42 by %c120_i32_21 dim 1 : vector<16x128xf32>, i32 -> vector<16x128xf32>
    %45 = arith.maximumf %43, %44 : vector<16x128xf32>
    %cst_22 = arith.constant 0.000000e+00 : f32
    %46 = vector.broadcast %cst_22 : f32 to vector<16x128xf32>
    %c0_23 = arith.constant 0 : index
    %c0_24 = arith.constant 0 : index
    %47 = vector.load %arg8[%c0_23, %c0_24] : memref<16x128xf32, #tpu.memory_space<vmem>>, vector<16x128xf32>
    tpu.vector_store %arg8[%c0_23, %c0_24], %46 {strides = array<i32>} : memref<16x128xf32, #tpu.memory_space<vmem>>, vector<16x128xf32>,
    %c0_25 = arith.constant 0 : index
    %c0_26 = arith.constant 0 : index
    %c0_27 = arith.constant 0 : index
    %48 = vector.load %arg3[%c0_25, %c0_26, %c0_27] : memref<1x16x64xf32, #tpu.memory_space<vmem>>, vector<1x16x64xf32>
    %49 = vector.shape_cast %48 : vector<1x16x64xf32> to vector<16x64xf32>
    %c0_28 = arith.constant 0 : index
    %c0_29 = arith.constant 0 : index
    %50 = vector.load %arg8[%c0_28, %c0_29] : memref<16x128xf32, #tpu.memory_space<vmem>>, vector<16x64xf32>
    tpu.vector_store %arg8[%c0_28, %c0_29], %49 {strides = array<i32>} : memref<16x128xf32, #tpu.memory_space<vmem>>, vector<16x64xf32>,
    %c0_30 = arith.constant 0 : index
    %c0_31 = arith.constant 0 : index
    %51 = vector.load %arg8[%c0_30, %c0_31] : memref<16x128xf32, #tpu.memory_space<vmem>>, vector<16x128xf32>
    %52 = arith.maximumf %45, %51 : vector<16x128xf32>
    %c127_i32_32 = arith.constant 127 : i32
    %53 = tpu.dynamic_rotate %51 by %c127_i32_32 dim 1 : vector<16x128xf32>, i32 -> vector<16x128xf32>
    %54 = vector.broadcast %20 : vector<1x128xf32> to vector<16x128xf32>
    %55 = arith.mulf %53, %54 : vector<16x128xf32>
    %56 = arith.maximumf %52, %55 : vector<16x128xf32>
    %57 = vector.extract_strided_slice %56 {offsets = [0, 0], sizes = [16, 64], strides = [1, 1]} : vector<16x128xf32> to vector<16x64xf32>
    %c0_33 = arith.constant 0 : index
    %c0_34 = arith.constant 0 : index
    %c0_35 = arith.constant 0 : index
    %58 = vector.load %arg4[%c0_33, %c0_34, %c0_35] : memref<1x16x64xf32, #tpu.memory_space<vmem>>, vector<1x16x64xf32>
    %59 = vector.shape_cast %58 : vector<1x16x64xf32> to vector<16x64xf32>
    %60 = arith.maximumf %57, %59 : vector<16x64xf32>
    %c0_36 = arith.constant 0 : index
    %c0_37 = arith.constant 0 : index
    %61 = vector.load %arg5[%c0_36, %c0_37] : memref<32x16xf32, #tpu.memory_space<vmem>>, vector<32x16xf32>
    %cst_38 = arith.constant dense<0.000000e+00> : vector<32x64xf32>
    %62 = tpu.matmul %61, %60, %cst_38 {dimension_numbers = #tpu.dot_dimension_numbers<[1], [0], [0], [1], [0, 0, 1, 1], [], []>} : vector<32x16xf32>, vector<16x64xf32>, vector<32x64xf32> -> vector<32x64xf32>
    %c0_39 = arith.constant 0 : index
    %c0_40 = arith.constant 0 : index
    %63 = vector.load %arg6[%c0_39, %c0_40] : memref<32x1xf32, #tpu.memory_space<vmem>>, vector<32x1xf32>
    %64 = vector.broadcast %63 : vector<32x1xf32> to vector<32x64xf32>
    %65 = arith.addf %62, %64 : vector<32x64xf32>
    %c0_41 = arith.constant 0 : index
    %c0_42 = arith.constant 0 : index
    %c0_43 = arith.constant 0 : index
    %66 = vector.load %arg7[%c0_41, %c0_42, %c0_43] : memref<1x32x64xf32, #tpu.memory_space<vmem>>, vector<1x32x64xf32>
    %67 = vector.shape_cast %66 : vector<1x32x64xf32> to vector<32x64xf32>
    %68 = vector.shape_cast %65 : vector<32x64xf32> to vector<1x32x64xf32>
    tpu.vector_store %arg7[%c0_41, %c0_42, %c0_43], %68 {strides = array<i32>} : memref<1x32x64xf32, #tpu.memory_space<vmem>>, vector<1x32x64xf32>,
    return
  }
  func.func @transform_0(%arg0: i32) -> (i32, i32, i32) {
    %c0_i32 = arith.constant 0 : i32
    %c0_i32_0 = arith.constant 0 : i32
    %c0_i32_1 = arith.constant 0 : i32
    return %arg0, %c0_i32, %c0_i32_0 : i32, i32, i32
  }
  func.func @transform_1(%arg0: i32) -> (i32, i32, i32) {
    %c0_i32 = arith.constant 0 : i32
    %c0_i32_0 = arith.constant 0 : i32
    %c0_i32_1 = arith.constant 0 : i32
    return %arg0, %c0_i32, %c0_i32_0 : i32, i32, i32
  }
  func.func @transform_2(%arg0: i32) -> (i32, i32, i32) {
    %c0_i32 = arith.constant 0 : i32
    %c0_i32_0 = arith.constant 0 : i32
    %c0_i32_1 = arith.constant 0 : i32
    return %arg0, %c0_i32, %c0_i32_0 : i32, i32, i32
  }
  func.func @transform_3(%arg0: i32) -> (i32, i32, i32) {
    %c0_i32 = arith.constant 0 : i32
    %c0_i32_0 = arith.constant 0 : i32
    %c0_i32_1 = arith.constant 0 : i32
    return %arg0, %c0_i32, %c0_i32_0 : i32, i32, i32
  }
  func.func @transform_4(%arg0: i32) -> (i32, i32) {
    %c0_i32 = arith.constant 0 : i32
    %c0_i32_0 = arith.constant 0 : i32
    %c0_i32_1 = arith.constant 0 : i32
    return %c0_i32, %c0_i32_0 : i32, i32
  }
  func.func @transform_5(%arg0: i32) -> (i32, i32) {
    %c0_i32 = arith.constant 0 : i32
    %c0_i32_0 = arith.constant 0 : i32
    %c0_i32_1 = arith.constant 0 : i32
    return %c0_i32, %c0_i32_0 : i32, i32
  }
  func.func @transform_6(%arg0: i32) -> (i32, i32, i32) {
    %c0_i32 = arith.constant 0 : i32
    %c0_i32_0 = arith.constant 0 : i32
    %c0_i32_1 = arith.constant 0 : i32
    return %arg0, %c0_i32, %c0_i32_0 : i32, i32, i32
  }
}

module attributes {stable_mosaic.version = 11 : i64} {
  func.func @kernel(%arg0: i32, %arg1: memref<2xf32, #tpu.memory_space<smem>>, %arg2: memref<1x32x64xf32, #tpu.memory_space<vmem>>, %arg3: memref<1x32x64xf32, #tpu.memory_space<vmem>>, %arg4: memref<9x32x1xf32, #tpu.memory_space<vmem>>, %arg5: memref<32x32xf32, #tpu.memory_space<vmem>>, %arg6: memref<32x1xf32, #tpu.memory_space<vmem>>, %arg7: memref<1x32x64xf32, #tpu.memory_space<vmem>>, %arg8: memref<32x128xf32, #tpu.memory_space<vmem>>) attributes {dimension_semantics = [#tpu.dimension_semantics<parallel>], iteration_bounds = array<i64: 2>, scalar_prefetch = 0 : i64, scratch_operands = 1 : i64, tpu.core_type = #tpu.core_type<tc>, window_params = [{transform_indices = @transform_0, window_bounds = array<i64: 2>}, {transform_indices = @transform_1, window_bounds = array<i64: 1, 32, 64>}, {transform_indices = @transform_2, window_bounds = array<i64: 1, 32, 64>}, {pipeline_mode = #tpu.pipeline_mode<synchronous>, transform_indices = @transform_3, window_bounds = array<i64: 9, 32, 1>}, {pipeline_mode = #tpu.pipeline_mode<synchronous>, transform_indices = @transform_4, window_bounds = array<i64: 32, 32>}, {pipeline_mode = #tpu.pipeline_mode<synchronous>, transform_indices = @transform_5, window_bounds = array<i64: 32, 1>}, {transform_indices = @transform_6, window_bounds = array<i64: 1, 32, 64>}]} {
    %c0 = arith.constant 0 : index
    %c0_0 = arith.constant 0 : index
    %c0_1 = arith.constant 0 : index
    %0 = vector.load %arg2[%c0, %c0_0, %c0_1] : memref<1x32x64xf32, #tpu.memory_space<vmem>>, vector<1x32x64xf32>
    %1 = vector.shape_cast %0 : vector<1x32x64xf32> to vector<32x64xf32>
    %c0_2 = arith.constant 0 : index
    %2 = memref.load %arg1[%c0_2] : memref<2xf32, #tpu.memory_space<smem>>
    %3 = vector.broadcast %2 : f32 to vector<32x64xf32>
    %4 = arith.mulf %1, %3 : vector<32x64xf32>
    %c0_3 = arith.constant 0 : index
    %c0_4 = arith.constant 0 : index
    %c0_5 = arith.constant 0 : index
    %5 = vector.load %arg3[%c0_3, %c0_4, %c0_5] : memref<1x32x64xf32, #tpu.memory_space<vmem>>, vector<1x32x64xf32>
    %6 = vector.shape_cast %5 : vector<1x32x64xf32> to vector<32x64xf32>
    %c1 = arith.constant 1 : index
    %7 = memref.load %arg1[%c1] : memref<2xf32, #tpu.memory_space<smem>>
    %8 = vector.broadcast %7 : f32 to vector<32x64xf32>
    %9 = arith.mulf %6, %8 : vector<32x64xf32>
    %10 = arith.addf %4, %9 : vector<32x64xf32>
    %cst = arith.constant 0.000000e+00 : f32
    %11 = vector.broadcast %cst : f32 to vector<32x64xf32>
    %12 = arith.subf %11, %10 : vector<32x64xf32>
    %13 = math.exp %12 : vector<32x64xf32>
    %cst_6 = arith.constant 1.000000e+00 : f32
    %14 = vector.broadcast %cst_6 : f32 to vector<32x64xf32>
    %15 = arith.addf %14, %13 : vector<32x64xf32>
    %16 = tpu.reciprocal %15 : vector<32x64xf32> -> vector<32x64xf32>
    %17 = arith.mulf %10, %16 : vector<32x64xf32>
    %cst_7 = arith.constant 0.000000e+00 : f32
    %18 = vector.broadcast %cst_7 : f32 to vector<32x128xf32>
    %c0_8 = arith.constant 0 : index
    %c0_9 = arith.constant 0 : index
    %19 = vector.load %arg8[%c0_8, %c0_9] : memref<32x128xf32, #tpu.memory_space<vmem>>, vector<32x128xf32>
    tpu.vector_store %arg8[%c0_8, %c0_9], %18 {strides = array<i32>} : memref<32x128xf32, #tpu.memory_space<vmem>>, vector<32x128xf32>,
    %c0_10 = arith.constant 0 : index
    %c0_11 = arith.constant 0 : index
    %20 = vector.load %arg8[%c0_10, %c0_11] : memref<32x128xf32, #tpu.memory_space<vmem>>, vector<32x64xf32>
    tpu.vector_store %arg8[%c0_10, %c0_11], %17 {strides = array<i32>} : memref<32x128xf32, #tpu.memory_space<vmem>>, vector<32x64xf32>,
    %c0_12 = arith.constant 0 : index
    %c0_13 = arith.constant 0 : index
    %21 = vector.load %arg8[%c0_12, %c0_13] : memref<32x128xf32, #tpu.memory_space<vmem>>, vector<32x128xf32>
    %22 = tpu.iota {dimensions = array<i32: 1>} : vector<1x128xi32>
    %c8_i32 = arith.constant 8 : i32
    %c0_i32 = arith.constant 0 : i32
    %23 = arith.cmpi eq, %c8_i32, %c0_i32 : i32
    %c1_i32 = arith.constant 1 : i32
    %24 = arith.select %23, %c1_i32, %c8_i32 : i32
    %25 = vector.broadcast %24 : i32 to vector<1x128xi32>
    %26 = arith.remsi %22, %25 : vector<1x128xi32>
    %c0_i32_14 = arith.constant 0 : i32
    %27 = vector.broadcast %c0_i32_14 : i32 to vector<1x128xi32>
    %28 = arith.cmpi ne, %26, %27 : vector<1x128xi32>
    %c0_i32_15 = arith.constant 0 : i32
    %29 = vector.broadcast %c0_i32_15 : i32 to vector<1x128xi32>
    %30 = arith.cmpi slt, %26, %29 : vector<1x128xi32>
    %c0_i32_16 = arith.constant 0 : i32
    %31 = arith.cmpi slt, %24, %c0_i32_16 : i32
    %32 = vector.broadcast %31 : i1 to vector<1x128xi1>
    %33 = vector.broadcast %32 : vector<1x128xi1> to vector<1x128xi1>
    %34 = arith.xori %30, %33 : vector<1x128xi1>
    %35 = arith.andi %34, %28 : vector<1x128xi1>
    %36 = vector.broadcast %24 : i32 to vector<1x128xi32>
    %37 = arith.addi %26, %36 : vector<1x128xi32>
    %38 = arith.select %35, %37, %26 : vector<1x128xi1>, vector<1x128xi32>
    %c0_i32_17 = arith.constant 0 : i32
    %39 = vector.broadcast %c0_i32_17 : i32 to vector<1x128xi32>
    %40 = arith.cmpi ne, %38, %39 : vector<1x128xi32>
    %41 = arith.extui %40 : vector<1x128xi1> to vector<1x128xi32>
    %42 = arith.sitofp %41 : vector<1x128xi32> to vector<1x128xf32>
    %c7_i32 = arith.constant 7 : i32
    %43 = vector.broadcast %c7_i32 : i32 to vector<1x128xi32>
    %44 = arith.cmpi ne, %38, %43 : vector<1x128xi32>
    %45 = arith.extui %44 : vector<1x128xi1> to vector<1x128xi32>
    %46 = arith.sitofp %45 : vector<1x128xi32> to vector<1x128xf32>
    %cst_18 = arith.constant 0.000000e+00 : f32
    %47 = vector.broadcast %cst_18 : f32 to vector<32x128xf32>
    %c9_i32 = arith.constant 9 : i32
    %48 = tpu.dynamic_rotate %21 by %c9_i32 dim 1 : vector<32x128xf32>, i32 -> vector<32x128xf32>
    %49 = vector.broadcast %42 : vector<1x128xf32> to vector<32x128xf32>
    %50 = arith.mulf %48, %49 : vector<32x128xf32>
    %c0_19 = arith.constant 0 : index
    %c0_20 = arith.constant 0 : index
    %c0_21 = arith.constant 0 : index
    %51 = vector.load %arg4[%c0_19, %c0_20, %c0_21] : memref<9x32x1xf32, #tpu.memory_space<vmem>>, vector<1x32x1xf32>
    %52 = vector.shape_cast %51 : vector<1x32x1xf32> to vector<32x1xf32>
    %53 = vector.broadcast %52 : vector<32x1xf32> to vector<32x128xf32>
    %54 = arith.mulf %50, %53 : vector<32x128xf32>
    %55 = arith.addf %47, %54 : vector<32x128xf32>
    %c8_i32_22 = arith.constant 8 : i32
    %56 = tpu.dynamic_rotate %21 by %c8_i32_22 dim 1 : vector<32x128xf32>, i32 -> vector<32x128xf32>
    %c1_23 = arith.constant 1 : index
    %c0_24 = arith.constant 0 : index
    %c0_25 = arith.constant 0 : index
    %57 = vector.load %arg4[%c1_23, %c0_24, %c0_25] : memref<9x32x1xf32, #tpu.memory_space<vmem>>, vector<1x32x1xf32>
    %58 = vector.shape_cast %57 : vector<1x32x1xf32> to vector<32x1xf32>
    %59 = vector.broadcast %58 : vector<32x1xf32> to vector<32x128xf32>
    %60 = arith.mulf %56, %59 : vector<32x128xf32>
    %61 = arith.addf %55, %60 : vector<32x128xf32>
    %c7_i32_26 = arith.constant 7 : i32
    %62 = tpu.dynamic_rotate %21 by %c7_i32_26 dim 1 : vector<32x128xf32>, i32 -> vector<32x128xf32>
    %63 = vector.broadcast %46 : vector<1x128xf32> to vector<32x128xf32>
    %64 = arith.mulf %62, %63 : vector<32x128xf32>
    %c2 = arith.constant 2 : index
    %c0_27 = arith.constant 0 : index
    %c0_28 = arith.constant 0 : index
    %65 = vector.load %arg4[%c2, %c0_27, %c0_28] : memref<9x32x1xf32, #tpu.memory_space<vmem>>, vector<1x32x1xf32>
    %66 = vector.shape_cast %65 : vector<1x32x1xf32> to vector<32x1xf32>
    %67 = vector.broadcast %66 : vector<32x1xf32> to vector<32x128xf32>
    %68 = arith.mulf %64, %67 : vector<32x128xf32>
    %69 = arith.addf %61, %68 : vector<32x128xf32>
    %c1_i32_29 = arith.constant 1 : i32
    %70 = tpu.dynamic_rotate %21 by %c1_i32_29 dim 1 : vector<32x128xf32>, i32 -> vector<32x128xf32>
    %71 = vector.broadcast %42 : vector<1x128xf32> to vector<32x128xf32>
    %72 = arith.mulf %70, %71 : vector<32x128xf32>
    %c3 = arith.constant 3 : index
    %c0_30 = arith.constant 0 : index
    %c0_31 = arith.constant 0 : index
    %73 = vector.load %arg4[%c3, %c0_30, %c0_31] : memref<9x32x1xf32, #tpu.memory_space<vmem>>, vector<1x32x1xf32>
    %74 = vector.shape_cast %73 : vector<1x32x1xf32> to vector<32x1xf32>
    %75 = vector.broadcast %74 : vector<32x1xf32> to vector<32x128xf32>
    %76 = arith.mulf %72, %75 : vector<32x128xf32>
    %77 = arith.addf %69, %76 : vector<32x128xf32>
    %c4 = arith.constant 4 : index
    %c0_32 = arith.constant 0 : index
    %c0_33 = arith.constant 0 : index
    %78 = vector.load %arg4[%c4, %c0_32, %c0_33] : memref<9x32x1xf32, #tpu.memory_space<vmem>>, vector<1x32x1xf32>
    %79 = vector.shape_cast %78 : vector<1x32x1xf32> to vector<32x1xf32>
    %80 = vector.broadcast %79 : vector<32x1xf32> to vector<32x128xf32>
    %81 = arith.mulf %21, %80 : vector<32x128xf32>
    %82 = arith.addf %77, %81 : vector<32x128xf32>
    %c127_i32 = arith.constant 127 : i32
    %83 = tpu.dynamic_rotate %21 by %c127_i32 dim 1 : vector<32x128xf32>, i32 -> vector<32x128xf32>
    %84 = vector.broadcast %46 : vector<1x128xf32> to vector<32x128xf32>
    %85 = arith.mulf %83, %84 : vector<32x128xf32>
    %c5 = arith.constant 5 : index
    %c0_34 = arith.constant 0 : index
    %c0_35 = arith.constant 0 : index
    %86 = vector.load %arg4[%c5, %c0_34, %c0_35] : memref<9x32x1xf32, #tpu.memory_space<vmem>>, vector<1x32x1xf32>
    %87 = vector.shape_cast %86 : vector<1x32x1xf32> to vector<32x1xf32>
    %88 = vector.broadcast %87 : vector<32x1xf32> to vector<32x128xf32>
    %89 = arith.mulf %85, %88 : vector<32x128xf32>
    %90 = arith.addf %82, %89 : vector<32x128xf32>
    %c121_i32 = arith.constant 121 : i32
    %91 = tpu.dynamic_rotate %21 by %c121_i32 dim 1 : vector<32x128xf32>, i32 -> vector<32x128xf32>
    %92 = vector.broadcast %42 : vector<1x128xf32> to vector<32x128xf32>
    %93 = arith.mulf %91, %92 : vector<32x128xf32>
    %c6 = arith.constant 6 : index
    %c0_36 = arith.constant 0 : index
    %c0_37 = arith.constant 0 : index
    %94 = vector.load %arg4[%c6, %c0_36, %c0_37] : memref<9x32x1xf32, #tpu.memory_space<vmem>>, vector<1x32x1xf32>
    %95 = vector.shape_cast %94 : vector<1x32x1xf32> to vector<32x1xf32>
    %96 = vector.broadcast %95 : vector<32x1xf32> to vector<32x128xf32>
    %97 = arith.mulf %93, %96 : vector<32x128xf32>
    %98 = arith.addf %90, %97 : vector<32x128xf32>
    %c120_i32 = arith.constant 120 : i32
    %99 = tpu.dynamic_rotate %21 by %c120_i32 dim 1 : vector<32x128xf32>, i32 -> vector<32x128xf32>
    %c7 = arith.constant 7 : index
    %c0_38 = arith.constant 0 : index
    %c0_39 = arith.constant 0 : index
    %100 = vector.load %arg4[%c7, %c0_38, %c0_39] : memref<9x32x1xf32, #tpu.memory_space<vmem>>, vector<1x32x1xf32>
    %101 = vector.shape_cast %100 : vector<1x32x1xf32> to vector<32x1xf32>
    %102 = vector.broadcast %101 : vector<32x1xf32> to vector<32x128xf32>
    %103 = arith.mulf %99, %102 : vector<32x128xf32>
    %104 = arith.addf %98, %103 : vector<32x128xf32>
    %c119_i32 = arith.constant 119 : i32
    %105 = tpu.dynamic_rotate %21 by %c119_i32 dim 1 : vector<32x128xf32>, i32 -> vector<32x128xf32>
    %106 = vector.broadcast %46 : vector<1x128xf32> to vector<32x128xf32>
    %107 = arith.mulf %105, %106 : vector<32x128xf32>
    %c8 = arith.constant 8 : index
    %c0_40 = arith.constant 0 : index
    %c0_41 = arith.constant 0 : index
    %108 = vector.load %arg4[%c8, %c0_40, %c0_41] : memref<9x32x1xf32, #tpu.memory_space<vmem>>, vector<1x32x1xf32>
    %109 = vector.shape_cast %108 : vector<1x32x1xf32> to vector<32x1xf32>
    %110 = vector.broadcast %109 : vector<32x1xf32> to vector<32x128xf32>
    %111 = arith.mulf %107, %110 : vector<32x128xf32>
    %112 = arith.addf %104, %111 : vector<32x128xf32>
    %113 = vector.extract_strided_slice %112 {offsets = [0, 0], sizes = [32, 64], strides = [1, 1]} : vector<32x128xf32> to vector<32x64xf32>
    %c0_42 = arith.constant 0 : index
    %c0_43 = arith.constant 0 : index
    %114 = vector.load %arg5[%c0_42, %c0_43] : memref<32x32xf32, #tpu.memory_space<vmem>>, vector<32x32xf32>
    %cst_44 = arith.constant dense<0.000000e+00> : vector<32x64xf32>
    %115 = tpu.matmul %114, %113, %cst_44 {dimension_numbers = #tpu.dot_dimension_numbers<[1], [0], [0], [1], [0, 0, 1, 1], [], []>} : vector<32x32xf32>, vector<32x64xf32>, vector<32x64xf32> -> vector<32x64xf32>
    %c0_45 = arith.constant 0 : index
    %c0_46 = arith.constant 0 : index
    %116 = vector.load %arg6[%c0_45, %c0_46] : memref<32x1xf32, #tpu.memory_space<vmem>>, vector<32x1xf32>
    %117 = vector.broadcast %116 : vector<32x1xf32> to vector<32x64xf32>
    %118 = arith.addf %115, %117 : vector<32x64xf32>
    %c0_47 = arith.constant 0 : index
    %c0_48 = arith.constant 0 : index
    %c0_49 = arith.constant 0 : index
    %119 = vector.load %arg7[%c0_47, %c0_48, %c0_49] : memref<1x32x64xf32, #tpu.memory_space<vmem>>, vector<1x32x64xf32>
    %120 = vector.shape_cast %119 : vector<1x32x64xf32> to vector<32x64xf32>
    %121 = vector.shape_cast %118 : vector<32x64xf32> to vector<1x32x64xf32>
    tpu.vector_store %arg7[%c0_47, %c0_48, %c0_49], %121 {strides = array<i32>} : memref<1x32x64xf32, #tpu.memory_space<vmem>>, vector<1x32x64xf32>,
    return
  }
  func.func @transform_0(%arg0: i32) -> i32 {
    %c0_i32 = arith.constant 0 : i32
    %c0_i32_0 = arith.constant 0 : i32
    return %c0_i32 : i32
  }
  func.func @transform_1(%arg0: i32) -> (i32, i32, i32) {
    %c0_i32 = arith.constant 0 : i32
    %c0_i32_0 = arith.constant 0 : i32
    %c0_i32_1 = arith.constant 0 : i32
    return %arg0, %c0_i32, %c0_i32_0 : i32, i32, i32
  }
  func.func @transform_2(%arg0: i32) -> (i32, i32, i32) {
    %c0_i32 = arith.constant 0 : i32
    %c0_i32_0 = arith.constant 0 : i32
    %c0_i32_1 = arith.constant 0 : i32
    return %arg0, %c0_i32, %c0_i32_0 : i32, i32, i32
  }
  func.func @transform_3(%arg0: i32) -> (i32, i32, i32) {
    %c0_i32 = arith.constant 0 : i32
    %c0_i32_0 = arith.constant 0 : i32
    %c0_i32_1 = arith.constant 0 : i32
    %c0_i32_2 = arith.constant 0 : i32
    return %c0_i32, %c0_i32_0, %c0_i32_1 : i32, i32, i32
  }
  func.func @transform_4(%arg0: i32) -> (i32, i32) {
    %c0_i32 = arith.constant 0 : i32
    %c0_i32_0 = arith.constant 0 : i32
    %c0_i32_1 = arith.constant 0 : i32
    return %c0_i32, %c0_i32_0 : i32, i32
  }
  func.func @transform_5(%arg0: i32) -> (i32, i32) {
    %c0_i32 = arith.constant 0 : i32
    %c0_i32_0 = arith.constant 0 : i32
    %c0_i32_1 = arith.constant 0 : i32
    return %c0_i32, %c0_i32_0 : i32, i32
  }
  func.func @transform_6(%arg0: i32) -> (i32, i32, i32) {
    %c0_i32 = arith.constant 0 : i32
    %c0_i32_0 = arith.constant 0 : i32
    %c0_i32_1 = arith.constant 0 : i32
    return %arg0, %c0_i32, %c0_i32_0 : i32, i32, i32
  }
}

</mosaic_0001>

<bundles_post_ra>
// kernel: bifpn3_forward.11
= control target key start
LH: loop header
LB: loop body
LE: loop exit
PB: predicated region body
PF: predicated region fallthrough
CT: control target
= control target key end

     0   :  { %s486_s12 = smov 0   ;;  %s555_s0 = inlined_call_operand.vmem [shape: f32[2,32,64], index: 0, kind: input, shape index: {}]   ;;  %s556_s1 = inlined_call_operand.vmem [shape: f32[48,32], index: 1, kind: input, shape index: {}]   ;;  %s557_s2 = inlined_call_operand.vmem [shape: f32[48,1], index: 2, kind: input, shape index: {}]   ;;  %s558_s3 = inlined_call_operand.vmem [shape: f32[2,48,64], index: 3, kind: output, shape index: {}]  }
   0x1 LB: > { %s393_s13 = sadd.s32 4294967295, %s463_s12   ;;  %p397_p0 = scmp.ge.s32.totalorder %s463_s12, 1  ;;  %s463_s12 = sphi %s486_s12, %s13_s12  }
   0x2   : > { %p137_p1 = scmp.lt.s32.totalorder %s463_s12, 3 }
   0x4   : > { %p138_p2 = pnand %p397_p0, %p137_p1 }
   0x5   : > { %p161_p3 = scmp.lt.s32.totalorder (!%p138_p2), %s393_s13, 1 }
   0x6   : > { %141 = sbr.rel (%p138_p2) target bundleno = 225 (0xe1), region = 32 }
   0xb   : > { %v171_v0 = vld [vmem:[%s556_s1] sm:$0xff]  ;;  %vm217_vm0 = vcmask 261120   ;;  %v173_v1 = vld [vmem:[%s556_s1 + $0x10] sm:$0xff]  ;;  %s560_s13 = smov (!%p161_p3, %s393_s13), 1  ;;  %v465_v2 = vmov 0   ;;  %v172_v9 = vld [vmem:[%s556_s1 + $0x8] sm:$0xff] }
   0xc   : > { %428 = vmatprep.mubr.msk.f32.mxu0 %vm217_vm0, %v171_v0  ;;  %431 = vmatprep.mubr.msk.f32.mxu1 %vm217_vm0, %v173_v1  ;;  %v183_v3 = vld [vmem:[%s557_s2 + $0x10] sm:$0xff]  ;;  %v181_v4 = vld [vmem:[%s557_s2] sm:$0xff]  ;;  %s409_s22 = sshll.u32 %s560_s13, 5  ;;  %v174_v10 = vld [vmem:[%s556_s1 + $0x18] sm:$0xff]  ;;  %s445_s17 = smul.u32 48, %s560_s13  ;;  %vm331_vm1 = vcmask 523264  }
   0xd   : > { %456 = vset.pattern.permute.xlu1 %v465_v2  ;;  %455 = vset.pattern.permute.xlu0 %v465_v2  ;;  %s165_s25 = scalar_lea.vmem %s555_s0, %s409_s22  ;;  %v175_v11 = vld [vmem:[%s556_s1 + $0x20] sm:$0xff]  ;;  %v184_v12 = vld [vmem:[%s557_s2 + $0x18] sm:$0xff]  ;;  %v182_v13 = vld [vmem:[%s557_s2 + $0x8] sm:$0xff] }
   0xe   : > { %199 = vperm.xlu1 %456, %v183_v3   ;;  %189 = vperm.xlu0 %455, %v181_v4   ;;  %v180_v5 = vld [vmem:[%s165_s25 + $0x18] sm:$0xff]  ;;  %v179_v6 = vld [vmem:[%s165_s25 + $0x10] sm:$0xff]  ;;  %v178_v7 = vld [vmem:[%s165_s25 + $0x8] sm:$0xff]  ;;  %s170_s20 = scalar_lea.vmem %s558_s3, %s445_s17 }
   0xf   : > { %420 = vmatprep.subr.mxu0 %v180_v5  ;;  %437 = vmatprep.subr.mxu1 %v180_v5  ;;  %v177_v8 = vld [vmem:[%s165_s25] sm:$0xff]  ;;  %v176_v14 = vld [vmem:[%s556_s1 + $0x28] sm:$0xff] }
  0x10   : > { %421 = vmatpush3.msra.mxu0 %v180_v5  ;;  %441 = vmatpush3.msra.mxu1 %v180_v5  ;;  %v186_v15 = vld [vmem:[%s557_s2 + $0x28] sm:$0xff]  ;;  %v185_v16 = vld [vmem:[%s557_s2 + $0x20] sm:$0xff] }
  0x11   : > { %422 = vmatprep.subr.mxu0 %v179_v6  ;;  %438 = vmatprep.subr.mxu1 %v179_v6 }
  0x12   : > { %423 = vmatpush3.msra.mxu0 %v179_v6  ;;  %442 = vmatpush3.msra.mxu1 %v179_v6 }
  0x13   : > { %424 = vmatprep.subr.mxu0 %v178_v7  ;;  %439 = vmatprep.subr.mxu1 %v178_v7 }
  0x14   : > { %425 = vmatpush3.msra.mxu0 %v178_v7  ;;  %443 = vmatpush3.msra.mxu1 %v178_v7 }
  0x15   : > { %426 = vmatprep.subr.mxu0 %v177_v8  ;;  %440 = vmatprep.subr.mxu1 %v177_v8 }
  0x16   : > { %427 = vmatpush3.msra.mxu0 %v177_v8  ;;  %444 = vmatpush3.msra.mxu1 %v177_v8 }
  0x17   : > { %429 = vmatmul.mubr.msk.f32.vlgmr.msra.gmra.mxu0 %vm217_vm0, %v172_v9  ;;  %432 = vmatmul.mubr.msk.f32.vlgmr.msra.gmra.mxu1 %vm217_vm0, %v174_v10 }
  0x18   : > { %434 = vmatprep.mubr.msk.f32.mxu1 %vm217_vm0, %v175_v11  ;;  %204 = vperm.xlu1 %456, %v184_v12  }
  0x19   : > { %194 = vperm.xlu0 %455, %v182_v13  }
  0x1b   : > { %435 = vmatmul.mubr.msk.f32.gmra.mxu1 %vm217_vm0, %v176_v14 }
  0x1c   : > { %214 = vperm.xlu1 %456, %v186_v15  }
  0x1d   : > { %209 = vperm.xlu0 %455, %v185_v16  }
  0x89   : > { %v200_v17 = vpop.permute.xlu1 %199  ;;  %v190_v18 = vpop.permute.xlu0 %189 }
  0x93   : > { %v205_v19 = vpop.permute.xlu1 %204 }
  0x94   : > { %v195_v20 = vpop.permute.xlu0 %194 }
  0x97   : > { %v215_v29 = vpop.permute.xlu1 %214 }
  0x98   : > { %v210_v32 = vpop.permute.xlu0 %209 }
  0xd7   : > { %v430_v21 = vpop.f32.mrf.mxu0  ;;  %v433_v22 = vpop.f32.mrf.mxu1 }
  0xd8   : > { %v308_v23 = vadd.f32 %v430_v21, %v195_v20  ;;  %v318_v24 = vadd.f32 %v433_v22, %v205_v19 }
  0xd9   : > { %v302_v25 = vpop.f32.mrf.mxu0  ;;  %v312_v26 = vpop.f32.mrf.mxu1 }
  0xda   : > { %333 = vst.msk [vmem:[%s170_s20 + $0x8] sm:$0xff] %vm331_vm1, %v308_v23  ;;  %335 = vst.msk [vmem:[%s170_s20 + $0x18] sm:$0xff] %vm331_vm1, %v318_v24  ;;  %v303_v27 = vadd.f32 %v302_v25, %v190_v18  ;;  %v313_v28 = vadd.f32 %v312_v26, %v200_v17 }
  0xdb   : > { %v436_v30 = vpop.f32.mrf.mxu1 }
  0xdc   : > { %332 = vst.msk [vmem:[%s170_s20] sm:$0xff] %vm331_vm1, %v303_v27  ;;  %334 = vst.msk [vmem:[%s170_s20 + $0x10] sm:$0xff] %vm331_vm1, %v313_v28  ;;  %v328_v31 = vadd.f32 %v436_v30, %v215_v29 }
  0xdd   : > { %v322_v33 = vpop.f32.mrf.mxu1 }
  0xde   : > { %337 = vst.msk [vmem:[%s170_s20 + $0x28] sm:$0xff] %vm331_vm1, %v328_v31  ;;  %v323_v34 = vadd.f32 %v322_v33, %v210_v32 }
  0xe0   : > { %336 = vst.msk [vmem:[%s170_s20 + $0x20] sm:$0xff] %vm331_vm1, %v323_v34 }
  0xe1 PF: > { %s13_s12 = sadd.s32 1, %s463_s12  }
  0xe2   : > { %p10_p4 = scmp.ge.s32.totalorder %s13_s12, 4  }
  0xe4   :  { %12 = sbr.rel (!%p10_p4) target bundleno = 1 (0x1), region = 62 }

// kernel: bifpn3_forward.10
= control target key start
LH: loop header
LB: loop body
LE: loop exit
PB: predicated region body
PF: predicated region fallthrough
CT: control target
= control target key end

     0   :  { %s431_s12 = smov 0   ;;  %s480_s0 = inlined_call_operand.vmem [shape: f32[2,16,256], index: 0, kind: input, shape index: {}]   ;;  %s481_s1 = inlined_call_operand.vmem [shape: f32[32,16], index: 1, kind: input, shape index: {}]   ;;  %s482_s2 = inlined_call_operand.vmem [shape: f32[32,1], index: 2, kind: input, shape index: {}]   ;;  %s483_s3 = inlined_call_operand.vmem [shape: f32[2,32,256], index: 3, kind: output, shape index: {}]  }
   0x1 LB: > { %s368_s13 = sadd.s32 4294967295, %s407_s12   ;;  %p372_p0 = scmp.ge.s32.totalorder %s407_s12, 1  ;;  %s407_s12 = sphi %s431_s12, %s13_s12  }
   0x2   : > { %p137_p1 = scmp.lt.s32.totalorder %s407_s12, 3 }
   0x4   : > { %p138_p2 = pnand %p372_p0, %p137_p1 }
   0x5   : > { %p161_p3 = scmp.lt.s32.totalorder (!%p138_p2), %s368_s13, 1 }
   0x6   : > { %141 = sbr.rel (%p138_p2) target bundleno = 221 (0xdd), region = 32 }
   0xb   : > { %v409_v0 = vmov 0.0   ;;  %v181_v1 = vld [vmem:[%s482_s2 + $0x10] sm:$0xff]  ;;  %v179_v2 = vld [vmem:[%s482_s2] sm:$0xff]  ;;  %s485_s13 = smov (!%p161_p3, %s368_s13), 1  ;;  %v410_v3 = vmov 0   ;;  %vm203_vm0 = vcmask 130048  }
   0xc   : > { %280 = vmatprep.mubr.f32.mxu0 %v409_v0  ;;  %292 = vmatprep.mubr.f32.mxu1 %v409_v0  ;;  %s383_s18 = sshll.u32 %s485_s13, 5  ;;  %v171_v8 = vld [vmem:[%s481_s1] sm:$0xff]  ;;  %v173_v9 = vld [vmem:[%s481_s1 + $0x10] sm:$0xff]  ;;  %v182_v10 = vld [vmem:[%s482_s2 + $0x18] sm:$0xff]  ;;  %s384_s7 = sshll.u32 %s485_s13, 6 }
   0xd   : > { %400 = vset.pattern.permute.xlu1 %v410_v3  ;;  %399 = vset.pattern.permute.xlu0 %v410_v3  ;;  %s165_s21 = scalar_lea.vmem %s480_s0, %s383_s18  ;;  %v180_v11 = vld [vmem:[%s482_s2 + $0x8] sm:$0xff]  ;;  %v174_v13 = vld [vmem:[%s481_s1 + $0x18] sm:$0xff]  ;;  %s170_s10 = scalar_lea.vmem %s483_s3, %s384_s7 }
   0xe   : > { %195 = vperm.xlu1 %400, %v181_v1   ;;  %185 = vperm.xlu0 %399, %v179_v2   ;;  %v178_v4 = vld [vmem:[%s165_s21 + $0x18] sm:$0xff]  ;;  %v177_v5 = vld [vmem:[%s165_s21 + $0x10] sm:$0xff]  ;;  %v176_v6 = vld [vmem:[%s165_s21 + $0x8] sm:$0xff] }
   0xf   : > { %244 = vmatprep.subr.mxu0 %v178_v4  ;;  %385 = vmatprep.subr.mxu1 %v178_v4  ;;  %v175_v7 = vld [vmem:[%s165_s21] sm:$0xff]  ;;  %v172_v12 = vld [vmem:[%s481_s1 + $0x8] sm:$0xff] }
  0x10   : > { %245 = vmatpush1.msra.mxu0 %v177_v5  ;;  %387 = vmatpush1.msra.mxu1 %v177_v5 }
  0x11   : > { %246 = vmatprep.subr.mxu0 %v176_v6  ;;  %386 = vmatprep.subr.mxu1 %v176_v6 }
  0x12   : > { %247 = vmatpush1.msra.mxu0 %v175_v7  ;;  %388 = vmatpush1.msra.mxu1 %v175_v7 }
  0x13   : > { %377 = vmatmul.mubr.msk.f32.vlgmr.msra.gmra.mxu0 %vm203_vm0, %v171_v8  ;;  %379 = vmatmul.mubr.msk.f32.vlgmr.msra.gmra.mxu1 %vm203_vm0, %v173_v9 }
  0x14   : > { %286 = vmatprep.mubr.f32.mxu0 %v409_v0  ;;  %298 = vmatprep.mubr.f32.mxu1 %v409_v0 }
  0x15   : > { %200 = vperm.xlu1 %400, %v182_v10   ;;  %190 = vperm.xlu0 %399, %v180_v11  }
  0x17   : > { %378 = vmatmul.mubr.msk.f32.gmra.mxu0 %vm203_vm0, %v172_v12  ;;  %380 = vmatmul.mubr.msk.f32.gmra.mxu1 %vm203_vm0, %v174_v13 }
  0x89   : > { %v196_v14 = vpop.permute.xlu1 %195  ;;  %v186_v15 = vpop.permute.xlu0 %185 }
  0x90   : > { %v201_v22 = vpop.permute.xlu1 %200  ;;  %v191_v23 = vpop.permute.xlu0 %190 }
  0xd3   : > { %v282_v16 = vpop.f32.mrf.mxu0  ;;  %v294_v17 = vpop.f32.mrf.mxu1 }
  0xd4   : > { %v283_v18 = vadd.f32 %v282_v16, %v186_v15  ;;  %v295_v19 = vadd.f32 %v294_v17, %v196_v14 }
  0xd5   : > { %v284_v20 = vpop.f32.mrf.mxu0  ;;  %v296_v21 = vpop.f32.mrf.mxu1 }
  0xd6   : > { %305 = vst [vmem:[%s170_s10] sm:$0xff] %v283_v18  ;;  %309 = vst [vmem:[%s170_s10 + $0x20] sm:$0xff] %v295_v19  ;;  %v285_v24 = vadd.f32 %v284_v20, %v186_v15  ;;  %v297_v25 = vadd.f32 %v296_v21, %v196_v14 }
  0xd7   : > { %v288_v26 = vpop.f32.mrf.mxu0  ;;  %v300_v27 = vpop.f32.mrf.mxu1 }
  0xd8   : > { %306 = vst [vmem:[%s170_s10 + $0x8] sm:$0xff] %v285_v24  ;;  %310 = vst [vmem:[%s170_s10 + $0x28] sm:$0xff] %v297_v25  ;;  %v289_v28 = vadd.f32 %v288_v26, %v191_v23  ;;  %v301_v29 = vadd.f32 %v300_v27, %v201_v22 }
  0xd9   : > { %v290_v30 = vpop.f32.mrf.mxu0  ;;  %v302_v31 = vpop.f32.mrf.mxu1 }
  0xda   : > { %307 = vst [vmem:[%s170_s10 + $0x10] sm:$0xff] %v289_v28  ;;  %311 = vst [vmem:[%s170_s10 + $0x30] sm:$0xff] %v301_v29  ;;  %v291_v32 = vadd.f32 %v290_v30, %v191_v23  ;;  %v303_v33 = vadd.f32 %v302_v31, %v201_v22 }
  0xdc   : > { %308 = vst [vmem:[%s170_s10 + $0x18] sm:$0xff] %v291_v32  ;;  %312 = vst [vmem:[%s170_s10 + $0x38] sm:$0xff] %v303_v33 }
  0xdd PF: > { %s13_s12 = sadd.s32 1, %s407_s12  }
  0xde   : > { %p10_p4 = scmp.ge.s32.totalorder %s13_s12, 4  }
  0xe0   :  { %12 = sbr.rel (!%p10_p4) target bundleno = 1 (0x1), region = 62 }

// kernel: bifpn3_forward.12
= control target key start
LH: loop header
LB: loop body
LE: loop exit
PB: predicated region body
PF: predicated region fallthrough
CT: control target
= control target key end

     0   :  { %15 = vsyncpa [#allocation4], 0  ;;  %s1348_s30 = smov 0   ;;  %s1751_s0 = inlined_call_operand.vmem [shape: f32[2], index: 0, kind: input, shape index: {}]   ;;  %s1752_s1 = inlined_call_operand.vmem [shape: f32[2,16,256], index: 1, kind: input, shape index: {}]   ;;  %s1753_s2 = inlined_call_operand.vmem [shape: f32[2,16,256], index: 2, kind: input, shape index: {}]   ;;  %s1754_s3 = inlined_call_operand.vmem [shape: f32[9,16,1], index: 3, kind: input, shape index: {}]   ;;  %s1755_s4 = inlined_call_operand.vmem [shape: f32[16,16], index: 4, kind: input, shape index: {}]   ;;  %s1756_s5 = inlined_call_operand.vmem [shape: f32[16,1], index: 5, kind: input, shape index: {}]   ;;  %s1757_s6 = inlined_call_operand.vmem [shape: f32[8,16], index: 6, kind: input, shape index: {}]   ;;  %s1758_s7 = inlined_call_operand.vmem [shape: f32[8,1], index: 7, kind: input, shape index: {}]   ;;  %s1759_s8 = inlined_call_operand.vmem [shape: f32[2,16,256], index: 8, kind: output, shape index: {0}]   ;;  %s1760_s9 = inlined_call_operand.vmem [shape: f32[2,8,256], index: 9, kind: output, shape index: {1}]  }
   0x1 LB: > { %s1354_s10 = sadd.s32 4294967295, %s1285_s30   ;;  %p1130_p0 = scmp.ge.s32.totalorder %s1285_s30, 1  ;;  %s1285_s30 = sphi %s1348_s30, %s21_s30  }
   0x2   : > { %p256_p1 = scmp.lt.s32.totalorder %s1285_s30, 3  ;;  %s269_s13 = sshll.u32 %s1751_s0, 4  ;;  %s270_s13 = int_to_ptr.vmem [resolvable:$true] %s269_s13 }
   0x3   : > { %p1181_p3 = scmp.eq.s32.totalorder %s1354_s10, 0  ;;  %s1260_s15 = scalar_lea.vmem %s270_s13, 16 }
   0x4   : > { %p1361_p2 = pnand %p1130_p0, %p256_p1  ;;  %p1261_p6 = scmp.ne.s32.totalorder %s270_s13, %s1260_s15 }
   0x5   : > { %p1268_p10 = scmp.lt.s32.totalorder %s270_s13, %s270_s13  ;;  %p1269_p11 = scmp.lt.s32.totalorder %s1260_s15, %s1260_s15 }
   0x6   : > { %p1177_p4 = pneg %p1361_p2 }
   0x7   : > { %p1270_p12 = por %p1269_p11, %p1268_p10 }
   0x8   : > { %p1178_p5 = pnand %p1181_p3, %p1177_p4 }
   0xa   : > { %p1262_p7 = pneg %p1178_p5 }
   0xc   : > { %p1263_p8 = pnand %p1262_p7, %p1261_p6 }
   0xe   : > { %p1264_p9 = pneg %p1263_p8 }
  0x10   : > { %p1271_p13 = pnand %p1270_p12, %p1264_p9 }
  0x12   : > { %1274 = shalt.err (!%p1271_p13)
}
  0x13   : > { %s1287_s16 = smov [#allocation3]   ;;  %313 = sbr.rel (%p1361_p2) target bundleno = 706 (0x2c2), region = 52 }
  0x14   : > { %1180 = dma.vmem_to_smem (!%p1178_p5), %s270_s13, 16, %s1287_s16, [#allocation4]  }
  0x18   : > { %1280 = dma.done.wait (%p1181_p3), [#allocation4], 16  }
  0x19   : > { %1282 = vsyncadd (%p1181_p3), [#allocation4], 4294967280 }
  0x1a   : > { %319 = sfence }
  0x1b   : > { %v505_v0 = vld [vmem:[%s1754_s3 + $0x8] sm:$0xff]  ;;  %v1148_v1 = vld [vmem:[%s1754_s3 + $0x10] sm:$0xff]  ;;  %v1288_v2 = vmov 0   ;;  %p360_p0 = scmp.lt.s32.totalorder %s1354_s10, 1  ;;  %s384_s21 = sld [smem:[#allocation3]]  ;;  %v1149_v3 = vld [vmem:[%s1754_s3 + $0x18] sm:$0xff] }
  0x1c   : > { %1202 = vset.pattern.permute.xlu0 %v1288_v2  ;;  %1203 = vset.pattern.permute.xlu1 %v1288_v2  ;;  %s1143_s24 = sld [smem:[#allocation3 + $0x1]]  ;;  %v1289_v4 = vmov 0.0   ;;  %s1290_s25 = smov 17   ;;  %v504_v5 = vld [vmem:[%s1754_s3] sm:$0xff]  ;;  %v1153_v6 = vld [vmem:[%s1754_s3 + $0x38] sm:$0xff]  ;;  %v1151_v22 = vld [vmem:[%s1754_s3 + $0x28] sm:$0xff] }
  0x1d   : > { %513 = vperm.xlu0 %1202, %v505_v0   ;;  %546 = vperm.xlu1 %1203, %v1148_v1   ;;  %s1763_s10 = smov (!%p360_p0, %s1354_s10), 1  ;;  %s1291_s20 = smov 15   ;;  %v1150_v32 = vld [vmem:[%s1754_s3 + $0x20] sm:$0xff]  ;;  %v1152_v55 = vld [vmem:[%s1754_s3 + $0x30] sm:$0xff]  ;;  %v1155_v56 = vld [vmem:[%s1754_s3 + $0x48] sm:$0xff]  ;;  %vm845_vm12 = vcmask 130048  }
  0x1e   : > { %916 = vmatprep.mubr.f32.mxu0 %v1289_v4  ;;  %1007 = vmatprep.mubr.f32.mxu1 %v1289_v4  ;;  %s1394_s26 = sshll.u32 %s1763_s10, 5  ;;  %s1292_s23 = smov 16   ;;  %v1157_v57 = vld [vmem:[%s1754_s3 + $0x58] sm:$0xff]  ;;  %v1154_v58 = vld [vmem:[%s1754_s3 + $0x40] sm:$0xff]  ;;  %v1159_v59 = vld [vmem:[%s1754_s3 + $0x68] sm:$0xff] }
  0x1f   : > { %s364_s14 = scalar_lea.vmem %s1752_s1, %s1394_s26  ;;  %s369_s17 = scalar_lea.vmem %s1753_s2, %s1394_s26  ;;  %v1156_v60 = vld [vmem:[%s1754_s3 + $0x50] sm:$0xff]  ;;  %v1161_v61 = vld [vmem:[%s1754_s3 + $0x78] sm:$0xff]  ;;  %v1158_v62 = vld [vmem:[%s1754_s3 + $0x60] sm:$0xff] }
  0x20   : > { %v382_v7 = vld [vmem:[%s364_s14 + $0x10] sm:$0xff]  ;;  %v380_v10 = vld [vmem:[%s364_s14] sm:$0xff]  ;;  %v383_v15 = vld [vmem:[%s364_s14 + $0x18] sm:$0xff]  ;;  %s1294_s15 = smov 127   ;;  %s1296_s11 = smov 112  }
  0x21   : > { %551 = vperm.xlu0 %1202, %v1149_v3   ;;  %1205 = vrot.lane.b32.xlu1 %v1289_v4, %s1290_s25  ;;  %v385_v8 = vstv %s384_s21  ;;  %v392_v9 = vld [vmem:[%s369_s17 + $0x10] sm:$0xff]  ;;  %v390_v14 = vld [vmem:[%s369_s17] sm:$0xff]  ;;  %s1297_s12 = smov 111   ;;  %s374_s28 = scalar_lea.vmem %s1759_s8, %s1394_s26 }
  0x22   : > { %v388_v11 = vmul.f32 %v385_v8, %v382_v7  ;;  %v395_v12 = vstv %s1143_s24  ;;  %v386_v13 = vmul.f32 %v385_v8, %v380_v10  ;;  %v393_v16 = vld [vmem:[%s369_s17 + $0x18] sm:$0xff]  ;;  %v389_v19 = vmul.f32 %v385_v8, %v383_v15  ;;  %v381_v20 = vld [vmem:[%s364_s14 + $0x8] sm:$0xff]  ;;  %s1293_s24 = smov 1   ;;  %v1160_v63 = vld [vmem:[%s1754_s3 + $0x70] sm:$0xff]  ;;  %s1172_s26 = sshll.u32 %s1763_s10, 4 }
  0x23   : > { %v398_v17 = vmul.f32 %v395_v12, %v392_v9  ;;  %v396_v18 = vmul.f32 %v395_v12, %v390_v14  ;;  %v391_v21 = vld [vmem:[%s369_s17 + $0x8] sm:$0xff]  ;;  %v399_v23 = vmul.f32 %v395_v12, %v393_v16  ;;  %v387_v24 = vmul.f32 %v385_v8, %v381_v20  ;;  %v1162_v2 = vld [vmem:[%s1754_s3 + $0x80] sm:$0xff]  ;;  %s379_s14 = scalar_lea.vmem %s1760_s9, %s1172_s26 }
  0x24   : > { %v397_v25 = vmul.f32 %v395_v12, %v391_v21  ;;  %v1163_v0 = vld [vmem:[%s1754_s3 + $0x88] sm:$0xff]  ;;  %v934_v8 = vld [vmem:[%s1758_s7] sm:$0xff]  ;;  %v444_v12 = vlaneseq }
  0x25   : > { %508 = vperm.xlu0 %1202, %v504_v5   ;;  %635 = vperm.xlu1 %1203, %v1153_v6   ;;  %v402_v26 = vadd.f32 %v398_v17, %v388_v11  ;;  %v400_v27 = vadd.f32 %v396_v18, %v386_v13  ;;  %v403_v28 = vadd.f32 %v399_v23, %v389_v19  ;;  %v834_v5 = vld [vmem:[%s1756_s5 + $0x8] sm:$0xff]  ;;  %v833_v10 = vld [vmem:[%s1756_s5] sm:$0xff] }
  0x26   : > { %v401_v29 = vadd.f32 %v397_v25, %v387_v24  ;;  %v1527_v14 = vand.u32 127, %v444_v12 }
  0x27   : > { %v406_v30 = vsub.f32 0.0, %v402_v26  ;;  %v404_v31 = vsub.f32 0.0, %v400_v27  ;;  %v407_v33 = vsub.f32 0.0, %v403_v28 }
  0x28   : > { %v405_v34 = vsub.f32 0.0, %v401_v29  ;;  %v451_v16 = vand.u32 15, %v1527_v14  ;;  %v446_v17 = vadd.s32 128, %v1527_v14  ;;  %vm495_vm1 = vcmp.lt.s32.totalorder %v1527_v14, 17 }
  0x29   : > { %593 = vperm.xlu0 %1202, %v1151_v22   ;;  %1215 = vrot.lane.b32.xlu1 %v1289_v4, %s1291_s20  ;;  %v412_v35 = vmul.f32 1.442695, %v406_v30  ;;  %v408_v36 = vmul.f32 1.442695, %v404_v31  ;;  %v414_v37 = vmul.f32 1.442695, %v407_v33 }
  0x2a   : > { %v410_v38 = vmul.f32 1.442695, %v405_v34  ;;  %vm471_vm0 = vcmp.ne.s32.totalorder %v451_v16, 0  ;;  %v458_v20 = vand.u32 15, %v446_v17  ;;  %vm536_vm3 = vcmp.lt.s32.totalorder %v1527_v14, 16 }
  0x2b   : > { %1244 = vpow2.f32 %v412_v35  ;;  %v1535_v22 = vsel %vm471_vm0, 1.0, %v1289_v4  ;;  %vm477_vm4 = vcmp.ne.s32.totalorder %v451_v16, 15  ;;  %vm574_vm5 = vcmp.lt.s32.totalorder %v1527_v14, 15 }
  0x2c   : > { %1246 = vpow2.f32 %v408_v36  ;;  %vm472_vm2 = vcmp.ne.s32.totalorder %v458_v20, 0  ;;  %vm478_vm6 = vcmp.ne.s32.totalorder %v458_v20, 15  ;;  %vm616_vm7 = vcmp.lt.s32.totalorder %v1527_v14, 1 }
  0x2d   : > { %588 = vperm.xlu0 %1202, %v1150_v32   ;;  %1248 = vpow2.f32 %v414_v37  ;;  %v1544_v31 = vsel %vm472_vm2, 1.0, %v1289_v4  ;;  %vm679_vm8 = vcmp.lt.s32.totalorder %v1527_v14, 127  ;;  %vm721_vm9 = vcmp.lt.s32.totalorder %v1527_v14, 113 }
  0x2e   : > { %1250 = vpow2.f32 %v410_v38  ;;  %vm763_vm10 = vcmp.lt.s32.totalorder %v1527_v14, 112  ;;  %vm801_vm11 = vcmp.lt.s32.totalorder %v1527_v14, 111  ;;  %v832_v14 = vld [vmem:[%s1755_s4 + $0x8] sm:$0xff] }
  0x31   : > { %1210 = vrot.lane.b32.xlu0 %v1289_v4, %s1292_s23 }
  0x38   : > { %v1245_v39 = vpop.eup %1244 }
  0x39   : > { %v1247_v40 = vpop.eup %1246  ;;  %v418_v41 = vadd.f32 1.0, %v1245_v39 }
  0x3a   : > { %v1249_v42 = vpop.eup %1248  ;;  %v416_v43 = vadd.f32 1.0, %v1247_v40 }
  0x3b   : > { %v1251_v44 = vpop.eup %1250  ;;  %1252 = vrcp.f32 %v418_v41  ;;  %v419_v45 = vadd.f32 1.0, %v1249_v42 }
  0x3c   : > { %1254 = vrcp.f32 %v416_v43  ;;  %v417_v46 = vadd.f32 1.0, %v1251_v44  ;;  %v1555_v43 = vsel %vm477_vm4, 1.0, %v1289_v4 }
  0x3d   : > { %1256 = vrcp.f32 %v419_v45 }
  0x3e   : > { %1258 = vrcp.f32 %v417_v46 }
  0x48   : > { %v1253_v47 = vpop.eup %1252 }
  0x49   : > { %v1255_v48 = vpop.eup %1254  ;;  %v1420_v49 = vmul.f32 %v1253_v47, %v402_v26 }
  0x4a   : > { %v1257_v50 = vpop.eup %1256  ;;  %v1422_v51 = vmul.f32 %v1255_v48, %v400_v27 }
  0x4b   : > { %485 = vrot.lane.b32.xlu1 %v1420_v49, %s1290_s25  ;;  %v1426_v52 = vmul.f32 %v1257_v50, %v403_v28  ;;  %v1259_v53 = vpop.eup %1258 }
  0x4c   : > { %483 = vrot.lane.b32.xlu0 %v1422_v51, %s1290_s25  ;;  %v1432_v54 = vmul.f32 %v1259_v53, %v401_v29 }
  0x4f   : > { %489 = vrot.lane.b32.xlu1 %v1426_v52, %s1290_s25 }
  0x50   : > { %526 = vrot.lane.b32.xlu0 %v1420_v49, %s1292_s23 }
  0x53   : > { %487 = vrot.lane.b32.xlu1 %v1432_v54, %s1290_s25 }
  0x54   : > { %564 = vrot.lane.b32.xlu0 %v1420_v49, %s1291_s20 }
  0x57   : > { %530 = vrot.lane.b32.xlu1 %v1426_v52, %s1292_s23 }
  0x58   : > { %524 = vrot.lane.b32.xlu0 %v1422_v51, %s1292_s23 }
  0x5b   : > { %568 = vrot.lane.b32.xlu1 %v1426_v52, %s1291_s20 }
  0x5c   : > { %562 = vrot.lane.b32.xlu0 %v1422_v51, %s1291_s20 }
  0x5f   : > { %528 = vrot.lane.b32.xlu1 %v1432_v54, %s1292_s23 }
  0x60   : > { %606 = vrot.lane.b32.xlu0 %v1420_v49, %s1293_s24 }
  0x63   : > { %566 = vrot.lane.b32.xlu1 %v1432_v54, %s1291_s20  ;;  %s1295_s20 = smov 113  }
  0x64   : > { %630 = vperm.xlu0 %1202, %v1152_v55  }
  0x67   : > { %610 = vrot.lane.b32.xlu1 %v1426_v52, %s1293_s24 }
  0x68   : > { %1220 = vrot.lane.b32.xlu0 %v1289_v4, %s1293_s24 }
  0x6b   : > { %656 = vperm.xlu1 %1203, %v1155_v56  }
  0x6c   : > { %608 = vrot.lane.b32.xlu0 %v1432_v54, %s1293_s24 }
  0x6f   : > { %604 = vrot.lane.b32.xlu1 %v1422_v51, %s1293_s24 }
  0x70   : > { %698 = vperm.xlu0 %1202, %v1157_v57  }
  0x73   : > { %651 = vperm.xlu1 %1203, %v1154_v58  }
  0x74   : > { %1225 = vrot.lane.b32.xlu0 %v1289_v4, %s1294_s15 }
  0x77   : > { %673 = vrot.lane.b32.xlu1 %v1426_v52, %s1294_s15 }
  0x78   : > { %740 = vperm.xlu0 %1202, %v1159_v59  }
  0x7b   : > { %693 = vperm.xlu1 %1203, %v1156_v60  }
  0x7c   : > { %671 = vrot.lane.b32.xlu0 %v1432_v54, %s1294_s15 }
  0x7f   : > { %669 = vrot.lane.b32.xlu1 %v1420_v49, %s1294_s15 }
  0x80   : > { %1230 = vrot.lane.b32.xlu0 %v1289_v4, %s1295_s20 }
  0x83   : > { %715 = vrot.lane.b32.xlu1 %v1426_v52, %s1295_s20 }
  0x84   : > { %778 = vperm.xlu0 %1202, %v1161_v61  }
  0x87   : > { %735 = vperm.xlu1 %1203, %v1158_v62  }
  0x88   : > { %711 = vrot.lane.b32.xlu0 %v1420_v49, %s1295_s20 }
  0x8b   : > { %667 = vrot.lane.b32.xlu1 %v1422_v51, %s1294_s15 }
  0x8c   : > { %773 = vperm.xlu0 %1202, %v1160_v63  }
  0x8f   : > { %713 = vrot.lane.b32.xlu1 %v1432_v54, %s1295_s20 }
  0x90   : > { %709 = vrot.lane.b32.xlu0 %v1422_v51, %s1295_s20 }
  0x93   : > { %820 = vperm.xlu1 %1203, %v1163_v0   ;;  %v1573_v0 = vsel %vm478_vm6, 1.0, %v1289_v4 }
  0x94   : > { %1235 = vrot.lane.b32.xlu0 %v1289_v4, %s1296_s11 }
  0x97   : > { %757 = vrot.lane.b32.xlu1 %v1426_v52, %s1296_s11 }
  0x98   : > { %1240 = vrot.lane.b32.xlu0 %v1289_v4, %s1297_s12  ;;  %v514_v1 = vpop.permute.xlu0 %513  ;;  %v1513_v6 = vpop.permute.xlu1 %546 }
  0x9b   : > { %795 = vrot.lane.b32.xlu1 %v1426_v52, %s1297_s12 }
  0x9c   : > { %753 = vrot.lane.b32.xlu0 %v1420_v49, %s1296_s11  ;;  %v1506_v3 = vpop.permute.xlu0 %551  ;;  %v1206_v9 = vpop.permute.xlu1 %1205 }
  0x9d   : > { %v1207_v21 = vunpack.i.l.bf16 %v1206_v9  ;;  %v1208_v23 = vunpack.i.h.bf16 %v1206_v9 }
  0x9f   : > { %815 = vperm.xlu1 %1203, %v1162_v2  }
  0xa0   : > { %755 = vrot.lane.b32.xlu0 %v1432_v54, %s1296_s11  ;;  %v509_v7 = vpop.permute.xlu0 %508  ;;  %v1525_v13 = vpop.permute.xlu1 %635 }
  0xa3   : > { %791 = vrot.lane.b32.xlu1 %v1420_v49, %s1297_s12 }
  0xa4   : > { %751 = vrot.lane.b32.xlu0 %v1422_v51, %s1296_s11  ;;  %v1523_v11 = vpop.permute.xlu0 %593  ;;  %v1216_v18 = vpop.permute.xlu1 %1215 }
  0xa5   : > { %v1217_v40 = vunpack.i.l.bf16 %v1216_v18 }
  0xa7   : > { %793 = vrot.lane.b32.xlu1 %v1432_v54, %s1297_s12 }
  0xa8   : > { %842 = vperm.xlu0 %1202, %v834_v5   ;;  %v1529_v15 = vpop.permute.xlu0 %588 }
  0xab   : > { %789 = vrot.lane.b32.xlu1 %v1422_v51, %s1297_s12 }
  0xac   : > { %937 = vperm.xlu0 %1202, %v934_v8   ;;  %v1211_v19 = vpop.permute.xlu0 %1210 }
  0xad   : > { %v1212_v27 = vunpack.i.l.bf16 %v1211_v19  ;;  %v1213_v53 = vunpack.i.h.bf16 %v1211_v19 }
  0xaf   : > { %837 = vperm.xlu1 %1203, %v833_v10  }
  0xbd   : > { %v486_v24 = vpop.permute.xlu1 %485 }
  0xbe   : > { %v499_v25 = vsel %vm495_vm1, %v1207_v21, %v486_v24  ;;  %v484_v26 = vpop.permute.xlu0 %483 }
  0xbf   : > { %v502_v28 = vmul.f32 %v1535_v22, %v499_v25  ;;  %v498_v29 = vsel %vm495_vm1, %v1208_v23, %v484_v26 }
  0xc0   : > { %v500_v30 = vmul.f32 %v1535_v22, %v498_v29 }
  0xc1   : > { %v518_v32 = vmul.f32 %v514_v1, %v502_v28  ;;  %v490_v33 = vpop.permute.xlu1 %489 }
  0xc2   : > { %v516_v34 = vmul.f32 %v509_v7, %v500_v30  ;;  %v497_v35 = vsel %vm495_vm1, %v486_v24, %v490_v33  ;;  %v527_v36 = vpop.permute.xlu0 %526 }
  0xc3   : > { %v503_v37 = vmul.f32 %v1544_v31, %v497_v35  ;;  %v540_v38 = vsel %vm536_vm3, %v1212_v27, %v527_v36 }
  0xc4   : > { %v556_v39 = vmul.f32 %v1506_v3, %v540_v38 }
  0xc5   : > { %v519_v41 = vmul.f32 %v514_v1, %v503_v37  ;;  %v488_v42 = vpop.permute.xlu1 %487  ;;  %v1218_v1 = vunpack.i.h.bf16 %v1216_v18 }
  0xc6   : > { %v560_v44 = vadd.f32 %v556_v39, %v518_v32  ;;  %v496_v45 = vsel %vm495_vm1, %v484_v26, %v488_v42  ;;  %v565_v46 = vpop.permute.xlu0 %564 }
  0xc7   : > { %v501_v47 = vmul.f32 %v1544_v31, %v496_v45  ;;  %v578_v48 = vsel %vm574_vm5, %v1217_v40, %v565_v46 }
  0xc8   : > { %v581_v50 = vmul.f32 %v1555_v43, %v578_v48 }
  0xc9   : > { %v517_v55 = vmul.f32 %v509_v7, %v501_v47  ;;  %v531_v56 = vpop.permute.xlu1 %530 }
  0xca   : > { %v598_v57 = vmul.f32 %v1523_v11, %v581_v50  ;;  %v538_v58 = vsel %vm536_vm3, %v527_v36, %v531_v56  ;;  %v525_v59 = vpop.permute.xlu0 %524 }
  0xcb   : > { %v557_v60 = vmul.f32 %v1506_v3, %v538_v58  ;;  %v539_v61 = vsel %vm536_vm3, %v1213_v53, %v525_v59 }
  0xcc   : > { %v1569_v62 = vadd.f32 %v598_v57, %v560_v44  ;;  %v554_v63 = vmul.f32 %v1513_v6, %v539_v61 }
  0xcd   : > { %v561_v2 = vadd.f32 %v557_v60, %v519_v41  ;;  %v569_v5 = vpop.permute.xlu1 %568 }
  0xce   : > { %v558_v7 = vadd.f32 %v554_v63, %v516_v34  ;;  %v576_v8 = vsel %vm574_vm5, %v565_v46, %v569_v5  ;;  %v563_v9 = vpop.permute.xlu0 %562 }
  0xcf   : > { %v582_v3 = vmul.f32 %v1573_v0, %v576_v8  ;;  %v577_v10 = vsel %vm574_vm5, %v1218_v1, %v563_v9 }
  0xd0   : > { %v579_v12 = vmul.f32 %v1555_v43, %v577_v10 }
  0xd1   : > { %v599_v16 = vmul.f32 %v1523_v11, %v582_v3  ;;  %v529_v17 = vpop.permute.xlu1 %528 }
  0xd2   : > { %v596_v19 = vmul.f32 %v1529_v15, %v579_v12  ;;  %v537_v18 = vsel %vm536_vm3, %v525_v59, %v529_v17  ;;  %v607_v28 = vpop.permute.xlu0 %606 }
  0xd3   : > { %v603_v20 = vadd.f32 %v599_v16, %v561_v2  ;;  %v555_v21 = vmul.f32 %v1513_v6, %v537_v18 }
  0xd4   : > { %v1586_v23 = vadd.f32 %v596_v19, %v558_v7 }
  0xd5   : > { %v559_v24 = vadd.f32 %v555_v21, %v517_v55  ;;  %v567_v25 = vpop.permute.xlu1 %566 }
  0xd6   : > { %v575_v26 = vsel %vm574_vm5, %v563_v9, %v567_v25 }
  0xd7   : > { %v580_v27 = vmul.f32 %v1573_v0, %v575_v26 }
  0xd9   : > { %v597_v11 = vmul.f32 %v1529_v15, %v580_v27  ;;  %v611_v32 = vpop.permute.xlu1 %610 }
  0xda   : > { %v618_v53 = vsel %vm616_vm7, %v607_v28, %v611_v32 }
  0xdb   : > { %v1592_v29 = vadd.f32 %v597_v11, %v559_v24  ;;  %v624_v58 = vmul.f32 %v1544_v31, %v618_v53 }
  0xdd   : > { %v641_v5 = vmul.f32 %v1525_v13, %v624_v58 }
  0xdf   : > { %v1594_v30 = vpop.permute.xlu0 %630  ;;  %v645_v18 = vadd.f32 %v641_v5, %v603_v20 }
  0xe3   : > { %v1221_v33 = vpop.permute.xlu0 %1220 }
  0xe4   : > { %v1222_v56 = vunpack.i.l.bf16 %v1221_v33  ;;  %v1223_v9 = vunpack.i.h.bf16 %v1221_v33 }
  0xe6   : > { %v1596_v34 = vpop.permute.xlu1 %656  ;;  %v620_v1 = vsel %vm616_vm7, %v1222_v56, %v607_v28 }
  0xe7   : > { %v609_v6 = vpop.permute.xlu0 %608  ;;  %v623_v3 = vmul.f32 %v1535_v22, %v620_v1  ;;  %v662_v12 = vmul.f32 %v1596_v34, %v1426_v52  ;;  %v661_v5 = vmul.f32 %v1596_v34, %v1420_v49 }
  0xe9   : > { %v640_v26 = vmul.f32 %v1525_v13, %v623_v3  ;;  %v666_v20 = vadd.f32 %v662_v12, %v645_v18 }
  0xea   : > { %v605_v35 = vpop.permute.xlu1 %604 }
  0xeb   : > { %v1598_v36 = vpop.permute.xlu0 %698  ;;  %v617_v16 = vsel %vm616_vm7, %v605_v35, %v609_v6  ;;  %v619_v21 = vsel %vm616_vm7, %v1223_v9, %v605_v35 }
  0xec   : > { %v622_v52 = vmul.f32 %v1544_v31, %v617_v16  ;;  %v621_v35 = vmul.f32 %v1535_v22, %v619_v21 }
  0xee   : > { %v1600_v37 = vpop.permute.xlu1 %651  ;;  %v638_v9 = vmul.f32 %v1594_v30, %v621_v35 }
  0xef   : > { %v1226_v38 = vpop.permute.xlu0 %1225 }
  0xf0   : > { %v1227_v57 = vunpack.i.l.bf16 %v1226_v38  ;;  %v1228_v32 = vunpack.i.h.bf16 %v1226_v38  ;;  %v639_v38 = vmul.f32 %v1594_v30, %v622_v52 }
  0xf2   : > { %v674_v39 = vpop.permute.xlu1 %673 }
  0xf3   : > { %v1602_v40 = vpop.permute.xlu0 %740  ;;  %v681_v60 = vsel %vm679_vm8, %v674_v39, %v1227_v57 }
  0xf4   : > { %v687_v7 = vmul.f32 %v1573_v0, %v681_v60 }
  0xf6   : > { %v1604_v15 = vpop.permute.xlu1 %693  ;;  %v704_v24 = vmul.f32 %v1598_v36, %v687_v7 }
  0xf7   : > { %v1606_v41 = vpop.permute.xlu0 %671 }
  0xf8   : > { %v708_v57 = vadd.f32 %v704_v24, %v666_v20 }
  0xfa   : > { %v670_v42 = vpop.permute.xlu1 %669 }
  0xfb   : > { %v1608_v44 = vpop.permute.xlu0 %1230  ;;  %v683_v27 = vsel %vm679_vm8, %v670_v42, %v674_v39  ;;  %v680_v39 = vsel %vm679_vm8, %v1606_v41, %v1228_v32 }
  0xfc   : > { %v1232_v61 = vunpack.i.l.bf16 %v1608_v44  ;;  %v686_v42 = vmul.f32 %v1555_v43, %v683_v27  ;;  %v1233_v58 = vunpack.i.h.bf16 %v1608_v44  ;;  %v685_v7 = vmul.f32 %v1573_v0, %v680_v39 }
  0xfe   : > { %v716_v45 = vpop.permute.xlu1 %715  ;;  %v703_v3 = vmul.f32 %v1598_v36, %v686_v42 }
  0xff   : > { %v1610_v46 = vpop.permute.xlu0 %778  ;;  %v723_v2 = vsel %vm721_vm9, %v716_v45, %v1232_v61 }
 0x100   : > { %v729_v17 = vmul.f32 %v1544_v31, %v723_v2 }
 0x102   : > { %v1612_v47 = vpop.permute.xlu1 %735  ;;  %v746_v33 = vmul.f32 %v1602_v40, %v729_v17  ;;  %v643_v17 = vadd.f32 %v639_v38, %v1592_v29  ;;  %v702_v29 = vmul.f32 %v1604_v15, %v685_v7 }
 0x103   : > { %v712_v48 = vpop.permute.xlu0 %711 }
 0x104   : > { %v725_v13 = vsel %vm721_vm9, %v712_v48, %v716_v45  ;;  %v644_v45 = vadd.f32 %v640_v26, %v1569_v62  ;;  %v750_v2 = vadd.f32 %v746_v33, %v708_v57 }
 0x105   : > { %v728_v48 = vmul.f32 %v1535_v22, %v725_v13 }
 0x106   : > { %v1615_v50 = vpop.permute.xlu1 %667  ;;  %v665_v18 = vadd.f32 %v661_v5, %v644_v45  ;;  %v831_v5 = vld [vmem:[%s1755_s4] sm:$0xff] }
 0x107   : > { %v1619_v55 = vpop.permute.xlu0 %773  ;;  %v682_v49 = vsel %vm679_vm8, %v1615_v50, %v1606_v41  ;;  %v745_v36 = vmul.f32 %v1602_v40, %v728_v48  ;;  %v659_v41 = vmul.f32 %v1600_v37, %v1422_v51 }
 0x108   : > { %v707_v50 = vadd.f32 %v703_v3, %v665_v18 }
 0x10a   : > { %v1624_v59 = vpop.permute.xlu1 %713  ;;  %v749_v20 = vadd.f32 %v745_v36, %v707_v50 }
 0x10b   : > { %v710_v63 = vpop.permute.xlu0 %709  ;;  %v722_v44 = vsel %vm721_vm9, %v1624_v59, %v1233_v58 }
 0x10c   : > { %v727_v21 = vmul.f32 %v1544_v31, %v722_v44  ;;  %v642_v31 = vadd.f32 %v638_v9, %v1586_v23 }
 0x10e   : > { %v1635_v8 = vpop.permute.xlu1 %820  ;;  %v663_v39 = vadd.f32 %v659_v41, %v642_v31 }
 0x10f   : > { %v1638_v10 = vpop.permute.xlu0 %1235 }
 0x110   : > { %v1237_v19 = vunpack.i.l.bf16 %v1638_v10  ;;  %v1238_v26 = vunpack.i.h.bf16 %v1638_v10 }
 0x112   : > { %v758_v25 = vpop.permute.xlu1 %757 }
 0x113   : > { %v765_v11 = vsel %vm763_vm10, %v758_v25, %v1237_v19  ;;  %v1657_v28 = vpop.permute.xlu0 %1240  ;;  %v660_v19 = vmul.f32 %v1600_v37, %v1432_v54  ;;  %v724_v54 = vsel %vm721_vm9, %v710_v63, %v1624_v59  ;;  %v744_v63 = vmul.f32 %v1612_v47, %v727_v21 }
 0x114   : > { %v1242_v6 = vunpack.i.l.bf16 %v1657_v28  ;;  %v784_v53 = vmul.f32 %v1610_v46, %v765_v11  ;;  %v726_v51 = vmul.f32 %v1535_v22, %v724_v54  ;;  %v1243_v32 = vunpack.i.h.bf16 %v1657_v28 }
 0x115   : > { %v664_v27 = vadd.f32 %v660_v19, %v643_v17  ;;  %v933_v17 = vld [vmem:[%s1757_s6] sm:$0xff] }
 0x116   : > { %v796_v56 = vpop.permute.xlu1 %795  ;;  %v788_v62 = vadd.f32 %v784_v53, %v750_v2  ;;  %v743_v53 = vmul.f32 %v1612_v47, %v726_v51 }
 0x117   : > { %v803_v60 = vsel %vm801_vm11, %v796_v56, %v1242_v6  ;;  %v754_v61 = vpop.permute.xlu0 %753 }
 0x118   : > { %v809_v1 = vmul.f32 %v1573_v0, %v803_v60  ;;  %v767_v34 = vsel %vm763_vm10, %v754_v61, %v758_v25  ;;  %v684_v25 = vmul.f32 %v1555_v43, %v682_v49 }
 0x119   : > { %v783_v52 = vmul.f32 %v1610_v46, %v767_v34  ;;  %v706_v46 = vadd.f32 %v702_v29, %v664_v27 }
 0x11a   : > { %v816_v12 = vpop.permute.xlu1 %815  ;;  %v826_v16 = vmul.f32 %v1635_v8, %v809_v1  ;;  %v701_v23 = vmul.f32 %v1604_v15, %v684_v25 }
 0x11b   : > { %v756_v30 = vpop.permute.xlu0 %755  ;;  %v787_v35 = vadd.f32 %v783_v52, %v749_v20 }
 0x11c   : > { %v830_v24 = vadd.f32 %v826_v16, %v788_v62  ;;  %v764_v11 = vsel %vm763_vm10, %v756_v30, %v1238_v26  ;;  %v705_v15 = vadd.f32 %v701_v23, %v663_v39 }
 0x11d   : > { %v782_v33 = vmul.f32 %v1619_v55, %v764_v11 }
 0x11e   : > { %v792_v40 = vpop.permute.xlu1 %791  ;;  %880 = vmatprep.subr.mxu0 %v830_v24  ;;  %v747_v45 = vadd.f32 %v743_v53, %v705_v15 }
 0x11f   : > { %v805_v59 = vsel %vm801_vm11, %v792_v40, %v796_v56  ;;  %v752_v10 = vpop.permute.xlu0 %751  ;;  %v748_v56 = vadd.f32 %v744_v63, %v706_v46 }
 0x120   : > { %v808_v37 = vmul.f32 %v1555_v43, %v805_v59  ;;  %v766_v42 = vsel %vm763_vm10, %v752_v10, %v756_v30 }
 0x121   : > { %v786_v38 = vadd.f32 %v782_v33, %v748_v56  ;;  %v781_v58 = vmul.f32 %v1619_v55, %v766_v42 }
 0x122   : > { %v794_v6 = vpop.permute.xlu1 %793  ;;  %v825_v13 = vmul.f32 %v1635_v8, %v808_v37 }
 0x123   : > { %v802_v22 = vsel %vm801_vm11, %v794_v6, %v1243_v32  ;;  %v785_v47 = vadd.f32 %v781_v58, %v747_v45  ;;  %v843_v3 = vpop.permute.xlu0 %842 }
 0x124   : > { %v807_v28 = vmul.f32 %v1573_v0, %v802_v22  ;;  %v829_v57 = vadd.f32 %v825_v13, %v787_v35 }
 0x126   : > { %v824_v60 = vmul.f32 %v816_v12, %v807_v28  ;;  %v790_v61 = vpop.permute.xlu1 %789  ;;  %881 = vmatpush1.msra.mxu0 %v829_v57 }
 0x127   : > { %v804_v8 = vsel %vm801_vm11, %v790_v61, %v794_v6  ;;  %v938_v19 = vpop.permute.xlu0 %937 }
 0x128   : > { %v806_v48 = vmul.f32 %v1555_v43, %v804_v8  ;;  %v828_v1 = vadd.f32 %v824_v60, %v786_v38 }
 0x12a   : > { %v823_v2 = vmul.f32 %v816_v12, %v806_v48  ;;  %882 = vmatprep.subr.mxu0 %v828_v1  ;;  %v838_v43 = vpop.permute.xlu1 %837 }
 0x12c   : > { %v827_v0 = vadd.f32 %v823_v2, %v785_v47 }
 0x12e   : > { %883 = vmatpush1.msra.mxu0 %v827_v0 }
 0x12f   : > { %1164 = vmatmul.mubr.msk.f32.vlgmr.msra.gmra.mxu0 %vm845_vm12, %v831_v5 }
 0x130   : > { %922 = vmatprep.mubr.f32.mxu0 %v1289_v4 }
 0x133   : > { %1165 = vmatmul.mubr.msk.f32.gmra.mxu0 %vm845_vm12, %v832_v14 }
 0x1ef   : > { %v918_v55 = vpop.f32.mrf.mxu0 }
 0x1f0   : > { %v919_v7 = vadd.f32 %v918_v55, %v838_v43 }
 0x1f1   : > { %v920_v44 = vpop.f32.mrf.mxu0 }
 0x1f2   : > { %929 = vst [vmem:[%s374_s28] sm:$0xff] %v919_v7  ;;  %v921_v9 = vadd.f32 %v920_v44, %v838_v43 }
 0x1f3   : > { %v924_v12 = vpop.f32.mrf.mxu0 }
 0x1f4   : > { %930 = vst [vmem:[%s374_s28 + $0x8] sm:$0xff] %v921_v9  ;;  %v925_v4 = vadd.f32 %v924_v12, %v843_v3 }
 0x1f5   : > { %v926_v62 = vpop.f32.mrf.mxu0 }
 0x1f6   : > { %931 = vst [vmem:[%s374_s28 + $0x10] sm:$0xff] %v925_v4  ;;  %v927_v16 = vadd.f32 %v926_v62, %v843_v3 }
 0x1f8   : > { %932 = vst [vmem:[%s374_s28 + $0x18] sm:$0xff] %v927_v16  ;;  %971 = vmatprep.subr.mxu1 %v927_v16 }
 0x1f9   : > { %972 = vmatpush1.msra.mxu1 %v925_v4 }
 0x1fa   : > { %973 = vmatprep.subr.mxu1 %v921_v9 }
 0x1fb   : > { %974 = vmatpush1.msra.mxu1 %v919_v7 }
 0x1fc   : > { %1166 = vmatmul.mubr.msk.f32.vlgmr.msra.gmra.mxu1 %vm845_vm12, %v933_v17 }
 0x2bc   : > { %v1009_v49 = vpop.f32.mrf.mxu1 }
 0x2bd   : > { %v1010_v34 = vadd.f32 %v1009_v49, %v938_v19 }
 0x2be   : > { %v1011_v30 = vpop.f32.mrf.mxu1 }
 0x2bf   : > { %1014 = vst [vmem:[%s379_s14] sm:$0xff] %v1010_v34  ;;  %v1012_v18 = vadd.f32 %v1011_v30, %v938_v19 }
 0x2c1   : > { %1015 = vst [vmem:[%s379_s14 + $0x8] sm:$0xff] %v1012_v18 }
 0x2c2 PF: > { %s21_s30 = sadd.s32 1, %s1285_s30  }
 0x2c3   : > { %p18_p1 = scmp.ge.s32.totalorder %s21_s30, 4  }
 0x2c5   :  { %20 = sbr.rel (!%p18_p1) target bundleno = 1 (0x1), region = 110 }
 0x2ca   :  { %1053 = vsyncpa [#allocation4], 1 }
 0x2cb   :  { %1055 = vsyncpa [#allocation4 + $0x1], 1 }

// kernel: bifpn3_forward.9
= control target key start
LH: loop header
LB: loop body
LE: loop exit
PB: predicated region body
PF: predicated region fallthrough
CT: control target
= control target key end

     0   :  { %s595_s12 = smov 0   ;;  %s625_s0 = inlined_call_operand.vmem [shape: f32[2,8,1024], index: 0, kind: input, shape index: {}]   ;;  %s626_s1 = inlined_call_operand.vmem [shape: f32[8,8], index: 1, kind: input, shape index: {}]   ;;  %s627_s2 = inlined_call_operand.vmem [shape: f32[8,1], index: 2, kind: input, shape index: {}]   ;;  %s628_s3 = inlined_call_operand.vmem [shape: f32[2,8,1024], index: 3, kind: output, shape index: {}]  }
   0x1 LB: > { %s537_s13 = sadd.s32 4294967295, %s571_s12   ;;  %p541_p0 = scmp.ge.s32.totalorder %s571_s12, 1  ;;  %s571_s12 = sphi %s595_s12, %s13_s12  }
   0x2   : > { %p137_p1 = scmp.lt.s32.totalorder %s571_s12, 3 }
   0x4   : > { %p138_p2 = pnand %p541_p0, %p137_p1 }
   0x5   : > { %p161_p3 = scmp.lt.s32.totalorder (!%p138_p2), %s537_s13, 1 }
   0x6   : > { %141 = sbr.rel (%p138_p2) target bundleno = 219 (0xdb), region = 32 }
   0xb   : > { %v180_v0 = vld [vmem:[%s627_s2] sm:$0xff]  ;;  %v573_v1 = vmov 0.0   ;;  %s630_s13 = smov (!%p161_p3, %s537_s13), 1  ;;  %v574_v2 = vmov 0   ;;  %vm186_vm0 = vcmask 64512  }
   0xc   : > { %254 = vmatprep.mubr.f32.mxu0 %v573_v1  ;;  %325 = vmatprep.mubr.f32.mxu1 %v573_v1  ;;  %s552_s16 = sshll.u32 %s630_s13, 6  ;;  %v171_v3 = vld [vmem:[%s626_s1] sm:$0xff] }
   0xd   : > { %564 = vset.pattern.permute.xlu0 %v574_v2  ;;  %s165_s19 = scalar_lea.vmem %s625_s0, %s552_s16  ;;  %s170_s24 = scalar_lea.vmem %s628_s3, %s552_s16 }
   0xe   : > { %183 = vperm.xlu0 %564, %v180_v0   ;;  %v173_v4 = vld [vmem:[%s165_s19 + $0x8] sm:$0xff]  ;;  %v175_v5 = vld [vmem:[%s165_s19 + $0x18] sm:$0xff]  ;;  %v172_v6 = vld [vmem:[%s165_s19] sm:$0xff] }
   0xf   : > { %220 = vmatprep.subr.mxu0 %v173_v4  ;;  %291 = vmatprep.subr.mxu1 %v175_v5  ;;  %v174_v7 = vld [vmem:[%s165_s19 + $0x10] sm:$0xff]  ;;  %v177_v8 = vld [vmem:[%s165_s19 + $0x28] sm:$0xff]  ;;  %v179_v9 = vld [vmem:[%s165_s19 + $0x38] sm:$0xff] }
  0x10   : > { %221 = vmatpush1.msra.mxu0 %v172_v6  ;;  %292 = vmatpush1.msra.mxu1 %v174_v7  ;;  %v176_v10 = vld [vmem:[%s165_s19 + $0x20] sm:$0xff]  ;;  %v178_v11 = vld [vmem:[%s165_s19 + $0x30] sm:$0xff] }
  0x11   : > { %546 = vmatmul.mubr.msk.f32.vlgmr.msra.gmra.mxu0 %vm186_vm0, %v171_v3  ;;  %547 = vmatmul.mubr.msk.f32.vlgmr.msra.gmra.mxu1 %vm186_vm0, %v171_v3 }
  0x12   : > { %362 = vmatprep.subr.mxu0 %v177_v8  ;;  %433 = vmatprep.subr.mxu1 %v179_v9 }
  0x13   : > { %363 = vmatpush1.msra.mxu0 %v176_v10  ;;  %434 = vmatpush1.msra.mxu1 %v178_v11 }
  0x14   : > { %396 = vmatprep.mubr.f32.mxu0 %v573_v1  ;;  %467 = vmatprep.mubr.f32.mxu1 %v573_v1 }
  0x15   : > { %548 = vmatmul.mubr.msk.f32.vlgmr.msra.gmra.mxu0 %vm186_vm0, %v171_v3  ;;  %549 = vmatmul.mubr.msk.f32.vlgmr.msra.gmra.mxu1 %vm186_vm0, %v171_v3 }
  0x89   : > { %v184_v12 = vpop.permute.xlu0 %183 }
  0xd1   : > { %v256_v13 = vpop.f32.mrf.mxu0  ;;  %v327_v14 = vpop.f32.mrf.mxu1 }
  0xd2   : > { %v257_v15 = vadd.f32 %v256_v13, %v184_v12  ;;  %v328_v16 = vadd.f32 %v327_v14, %v184_v12 }
  0xd3   : > { %v258_v17 = vpop.f32.mrf.mxu0  ;;  %v329_v18 = vpop.f32.mrf.mxu1 }
  0xd4   : > { %474 = vst [vmem:[%s170_s24] sm:$0xff] %v257_v15  ;;  %476 = vst [vmem:[%s170_s24 + $0x10] sm:$0xff] %v328_v16  ;;  %v259_v19 = vadd.f32 %v258_v17, %v184_v12  ;;  %v330_v20 = vadd.f32 %v329_v18, %v184_v12 }
  0xd5   : > { %v398_v21 = vpop.f32.mrf.mxu0  ;;  %v469_v22 = vpop.f32.mrf.mxu1 }
  0xd6   : > { %475 = vst [vmem:[%s170_s24 + $0x8] sm:$0xff] %v259_v19  ;;  %477 = vst [vmem:[%s170_s24 + $0x18] sm:$0xff] %v330_v20  ;;  %v399_v23 = vadd.f32 %v398_v21, %v184_v12  ;;  %v470_v24 = vadd.f32 %v469_v22, %v184_v12 }
  0xd7   : > { %v400_v25 = vpop.f32.mrf.mxu0  ;;  %v471_v26 = vpop.f32.mrf.mxu1 }
  0xd8   : > { %478 = vst [vmem:[%s170_s24 + $0x20] sm:$0xff] %v399_v23  ;;  %480 = vst [vmem:[%s170_s24 + $0x30] sm:$0xff] %v470_v24  ;;  %v401_v27 = vadd.f32 %v400_v25, %v184_v12  ;;  %v472_v28 = vadd.f32 %v471_v26, %v184_v12 }
  0xda   : > { %479 = vst [vmem:[%s170_s24 + $0x28] sm:$0xff] %v401_v27  ;;  %481 = vst [vmem:[%s170_s24 + $0x38] sm:$0xff] %v472_v28 }
  0xdb PF: > { %s13_s12 = sadd.s32 1, %s571_s12  }
  0xdc   : > { %p10_p4 = scmp.ge.s32.totalorder %s13_s12, 4  }
  0xde   :  { %12 = sbr.rel (!%p10_p4) target bundleno = 1 (0x1), region = 62 }

// kernel: bifpn3_forward.13
= control target key start
LH: loop header
LB: loop body
LE: loop exit
PB: predicated region body
PF: predicated region fallthrough
CT: control target
= control target key end

     0   :  { %11 = vsyncpa [#allocation4], 0  ;;  %s1592_s21 = smov 0   ;;  %s2310_s0 = inlined_call_operand.vmem [shape: f32[2], index: 0, kind: input, shape index: {}]   ;;  %s2311_s1 = inlined_call_operand.vmem [shape: f32[2,8,1024], index: 1, kind: input, shape index: {}]   ;;  %s2312_s2 = inlined_call_operand.vmem [shape: f32[2,8,1024], index: 2, kind: input, shape index: {}]   ;;  %s2313_s3 = inlined_call_operand.vmem [shape: f32[9,8,1], index: 3, kind: input, shape index: {}]   ;;  %s2314_s4 = inlined_call_operand.vmem [shape: f32[8,8], index: 4, kind: input, shape index: {}]   ;;  %s2315_s5 = inlined_call_operand.vmem [shape: f32[8,1], index: 5, kind: input, shape index: {}]   ;;  %s2316_s6 = inlined_call_operand.vmem [shape: f32[2,8,1024], index: 6, kind: output, shape index: {}]  }
   0x1 LB: > { %s1598_s22 = sadd.s32 4294967295, %s1544_s21   ;;  %p1411_p0 = scmp.ge.s32.totalorder %s1544_s21, 1  ;;  %s1544_s21 = sphi %s1592_s21, %s17_s21  }
   0x2   : > { %p184_p1 = scmp.lt.s32.totalorder %s1544_s21, 3  ;;  %s197_s25 = sshll.u32 %s2310_s0, 4  ;;  %s198_s25 = int_to_ptr.vmem [resolvable:$true] %s197_s25 }
   0x3   : > { %p1464_p3 = scmp.eq.s32.totalorder %s1598_s22, 0  ;;  %s1519_s27 = scalar_lea.vmem %s198_s25, 16 }
   0x4   : > { %p1605_p2 = pnand %p1411_p0, %p184_p1  ;;  %p1520_p6 = scmp.ne.s32.totalorder %s198_s25, %s1519_s27 }
   0x5   : > { %p1527_p10 = scmp.lt.s32.totalorder %s198_s25, %s198_s25  ;;  %p1528_p11 = scmp.lt.s32.totalorder %s1519_s27, %s1519_s27 }
   0x6   : > { %p1460_p4 = pneg %p1605_p2 }
   0x7   : > { %p1529_p12 = por %p1528_p11, %p1527_p10 }
   0x8   : > { %p1461_p5 = pnand %p1464_p3, %p1460_p4 }
   0xa   : > { %p1521_p7 = pneg %p1461_p5 }
   0xc   : > { %p1522_p8 = pnand %p1521_p7, %p1520_p6 }
   0xe   : > { %p1523_p9 = pneg %p1522_p8 }
  0x10   : > { %p1530_p13 = pnand %p1529_p12, %p1523_p9 }
  0x12   : > { %1533 = shalt.err (!%p1530_p13)
}
  0x13   : > { %s1546_s28 = smov [#allocation3]   ;;  %235 = sbr.rel (%p1605_p2) target bundleno = 556 (0x22c), region = 44 }
  0x14   : > { %1463 = dma.vmem_to_smem (!%p1461_p5), %s198_s25, 16, %s1546_s28, [#allocation4]  }
  0x18   : > { %1539 = dma.done.wait (%p1464_p3), [#allocation4], 16  }
  0x19   : > { %1541 = vsyncadd (%p1464_p3), [#allocation4], 4294967280 }
  0x1a   : > { %241 = sfence }
  0x1b   : > { %v592_v0 = vld [vmem:[%s2313_s3] sm:$0xff]  ;;  %v1547_v1 = vmov 0   ;;  %v1548_v2 = vmov 0.0   ;;  %s1549_s7 = smov 33   ;;  %p271_p0 = scmp.lt.s32.totalorder %s1598_s22, 1  ;;  %v1439_v3 = vld [vmem:[%s2313_s3 + $0x8] sm:$0xff] }
  0x1c   : > { %1485 = vset.pattern.permute.xlu0 %v1547_v1  ;;  %573 = vrot.lane.b32.xlu1 %v1548_v2, %s1549_s7  ;;  %s294_s8 = sld [smem:[#allocation3]]  ;;  %s1550_s12 = smov 32   ;;  %v1440_v4 = vld [vmem:[%s2313_s3 + $0x10] sm:$0xff]  ;;  %v1441_v22 = vld [vmem:[%s2313_s3 + $0x18] sm:$0xff] }
  0x1d   : > { %595 = vperm.xlu0 %1485, %v592_v0   ;;  %1486 = vset.pattern.permute.xlu1 %v1547_v1  ;;  %s1422_s11 = sld [smem:[#allocation3 + $0x1]]  ;;  %s2319_s22 = smov (!%p271_p0, %s1598_s22), 1 }
  0x1e   : > { %1173 = vmatprep.mubr.f32.mxu1 %v1548_v2  ;;  %1102 = vmatprep.mubr.f32.mxu0 %v1548_v2  ;;  %s1634_s13 = sshll.u32 %s2319_s22, 6  ;;  %s1551_s25 = smov 31  }
  0x1f   : > { %s1643_s18 = scalar_lea.vmem %s2311_s1, %s1634_s13  ;;  %s1649_s23 = scalar_lea.vmem %s2312_s2, %s1634_s13 }
  0x20   : > { %630 = vrot.lane.b32.xlu1 %v1548_v2, %s1550_s12  ;;  %v288_v5 = vld [vmem:[%s1643_s18 + $0x10] sm:$0xff]  ;;  %v286_v8 = vld [vmem:[%s1643_s18] sm:$0xff]  ;;  %v287_v13 = vld [vmem:[%s1643_s18 + $0x8] sm:$0xff]  ;;  %s1552_s26 = smov 1   ;;  %s1554_s10 = smov 97  }
  0x21   : > { %645 = vperm.xlu0 %1485, %v1439_v3   ;;  %v306_v7 = vld [vmem:[%s1649_s23 + $0x10] sm:$0xff]  ;;  %v304_v12 = vld [vmem:[%s1649_s23] sm:$0xff]  ;;  %v305_v14 = vld [vmem:[%s1649_s23 + $0x8] sm:$0xff]  ;;  %s1555_s16 = smov 96   ;;  %s1556_s17 = smov 95  }
  0x22   : > { %v295_v6 = vstv %s294_s8  ;;  %v289_v19 = vld [vmem:[%s1643_s18 + $0x18] sm:$0xff]  ;;  %v291_v21 = vld [vmem:[%s1643_s18 + $0x28] sm:$0xff]  ;;  %v290_v45 = vld [vmem:[%s1643_s18 + $0x20] sm:$0xff] }
  0x23   : > { %v298_v9 = vmul.f32 %v295_v6, %v288_v5  ;;  %v313_v10 = vstv %s1422_s11  ;;  %v296_v11 = vmul.f32 %v295_v6, %v286_v8  ;;  %v297_v17 = vmul.f32 %v295_v6, %v287_v13  ;;  %v307_v20 = vld [vmem:[%s1649_s23 + $0x18] sm:$0xff]  ;;  %v309_v25 = vld [vmem:[%s1649_s23 + $0x28] sm:$0xff]  ;;  %v308_v46 = vld [vmem:[%s1649_s23 + $0x20] sm:$0xff] }
  0x24   : > { %v316_v15 = vmul.f32 %v313_v10, %v306_v7  ;;  %v314_v16 = vmul.f32 %v313_v10, %v304_v12  ;;  %v315_v18 = vmul.f32 %v313_v10, %v305_v14  ;;  %v299_v23 = vmul.f32 %v295_v6, %v289_v19  ;;  %v293_v35 = vld [vmem:[%s1643_s18 + $0x38] sm:$0xff]  ;;  %v292_v51 = vld [vmem:[%s1643_s18 + $0x30] sm:$0xff] }
  0x25   : > { %703 = vperm.xlu0 %1485, %v1440_v4   ;;  %v317_v24 = vmul.f32 %v313_v10, %v307_v20  ;;  %v301_v30 = vmul.f32 %v295_v6, %v291_v21  ;;  %v319_v34 = vmul.f32 %v313_v10, %v309_v25  ;;  %v311_v36 = vld [vmem:[%s1649_s23 + $0x38] sm:$0xff]  ;;  %v303_v42 = vmul.f32 %v295_v6, %v293_v35  ;;  %v310_v52 = vld [vmem:[%s1649_s23 + $0x30] sm:$0xff] }
  0x26   : > { %v1664_v26 = vadd.f32 %v316_v15, %v298_v9  ;;  %v1666_v27 = vadd.f32 %v314_v16, %v296_v11  ;;  %v1668_v28 = vadd.f32 %v315_v18, %v297_v17  ;;  %v321_v43 = vmul.f32 %v313_v10, %v311_v36  ;;  %v1444_v35 = vld [vmem:[%s2313_s3 + $0x30] sm:$0xff]  ;;  %v1445_v36 = vld [vmem:[%s2313_s3 + $0x38] sm:$0xff] }
  0x27   : > { %v1670_v29 = vadd.f32 %v317_v24, %v299_v23  ;;  %v1680_v44 = vadd.f32 %v319_v34, %v301_v30  ;;  %v300_v49 = vmul.f32 %v295_v6, %v290_v45  ;;  %v318_v50 = vmul.f32 %v313_v10, %v308_v46  ;;  %v1443_v34 = vld [vmem:[%s2313_s3 + $0x28] sm:$0xff] }
  0x28   : > { %v332_v31 = vsub.f32 0.0, %v1664_v26  ;;  %v330_v32 = vsub.f32 0.0, %v1666_v27  ;;  %v331_v33 = vsub.f32 0.0, %v1668_v28  ;;  %v1684_v47 = vadd.f32 %v321_v43, %v303_v42 }
  0x29   : > { %761 = vperm.xlu0 %1485, %v1441_v22   ;;  %v333_v37 = vsub.f32 0.0, %v1670_v29  ;;  %v335_v48 = vsub.f32 0.0, %v1680_v44  ;;  %v1690_v55 = vadd.f32 %v318_v50, %v300_v49  ;;  %v302_v56 = vmul.f32 %v295_v6, %v292_v51 }
  0x2a   : > { %v342_v38 = vmul.f32 1.442695, %v332_v31  ;;  %v338_v39 = vmul.f32 1.442695, %v330_v32  ;;  %v340_v40 = vmul.f32 1.442695, %v331_v33  ;;  %v320_v57 = vmul.f32 %v313_v10, %v310_v52 }
  0x2b   : > { %v344_v41 = vmul.f32 1.442695, %v333_v37  ;;  %v337_v53 = vsub.f32 0.0, %v1684_v47  ;;  %v348_v54 = vmul.f32 1.442695, %v335_v48  ;;  %v334_v59 = vsub.f32 0.0, %v1690_v55 }
  0x2c   : > { %1487 = vpow2.f32 %v342_v38  ;;  %v328_v61 = vadd.f32 %v320_v57, %v302_v56  ;;  %v1442_v33 = vld [vmem:[%s2313_s3 + $0x20] sm:$0xff] }
  0x2d   : > { %680 = vrot.lane.b32.xlu0 %v1548_v2, %s1551_s25  ;;  %1489 = vpow2.f32 %v338_v39  ;;  %v352_v58 = vmul.f32 1.442695, %v337_v53  ;;  %v346_v5 = vmul.f32 1.442695, %v334_v59  ;;  %v1446_v39 = vld [vmem:[%s2313_s3 + $0x40] sm:$0xff] }
  0x2e   : > { %1491 = vpow2.f32 %v340_v40  ;;  %v336_v8 = vsub.f32 0.0, %v328_v61 }
  0x2f   : > { %1493 = vpow2.f32 %v344_v41  ;;  %v404_v41 = vlaneseq }
  0x30   : > { %1495 = vpow2.f32 %v348_v54  ;;  %v350_v6 = vmul.f32 1.442695, %v336_v8 }
  0x31   : > { %1497 = vpow2.f32 %v352_v58 }
  0x39   : > { %v1488_v60 = vpop.eup %1487 }
  0x3a   : > { %v1490_v62 = vpop.eup %1489  ;;  %v356_v63 = vadd.f32 1.0, %v1488_v60 }
  0x3b   : > { %v1492_v0 = vpop.eup %1491  ;;  %v354_v1 = vadd.f32 1.0, %v1490_v62 }
  0x3c   : > { %v1494_v3 = vpop.eup %1493  ;;  %1499 = vrcp.f32 %v356_v63  ;;  %v355_v4 = vadd.f32 1.0, %v1492_v0 }
  0x3d   : > { %1501 = vrcp.f32 %v354_v1  ;;  %v357_v7 = vadd.f32 1.0, %v1494_v3  ;;  %v1496_v9 = vpop.eup %1495 }
  0x3e   : > { %1503 = vrcp.f32 %v355_v4  ;;  %v1498_v10 = vpop.eup %1497  ;;  %v359_v11 = vadd.f32 1.0, %v1496_v9 }
  0x3f   : > { %1505 = vpow2.f32 %v346_v5  ;;  %v361_v17 = vadd.f32 1.0, %v1498_v10 }
  0x40   : > { %1507 = vrcp.f32 %v357_v7 }
  0x41   : > { %1509 = vpow2.f32 %v350_v6 }
  0x42   : > { %1511 = vrcp.f32 %v359_v11 }
  0x43   : > { %1513 = vrcp.f32 %v361_v17 }
  0x49   : > { %v1500_v12 = vpop.eup %1499 }
  0x4a   : > { %v1502_v13 = vpop.eup %1501  ;;  %v1694_v14 = vmul.f32 %v1500_v12, %v1664_v26 }
  0x4b   : > { %v1504_v15 = vpop.eup %1503  ;;  %v1697_v16 = vmul.f32 %v1502_v13, %v1666_v27 }
  0x4c   : > { %561 = vrot.lane.b32.xlu0 %v1694_v14, %s1549_s7  ;;  %v1506_v18 = vpop.eup %1505  ;;  %v1704_v19 = vmul.f32 %v1504_v15, %v1668_v28 }
  0x4d   : > { %557 = vrot.lane.b32.xlu1 %v1697_v16, %s1549_s7  ;;  %v1508_v20 = vpop.eup %1507  ;;  %v358_v22 = vadd.f32 1.0, %v1506_v18 }
  0x4e   : > { %v1711_v21 = vmul.f32 %v1508_v20, %v1670_v29  ;;  %v1510_v23 = vpop.eup %1509 }
  0x4f   : > { %1515 = vrcp.f32 %v358_v22  ;;  %v360_v24 = vadd.f32 1.0, %v1510_v23  ;;  %v1512_v25 = vpop.eup %1511 }
  0x50   : > { %614 = vrot.lane.b32.xlu0 %v1697_v16, %s1550_s12  ;;  %v1724_v26 = vmul.f32 %v1512_v25, %v1680_v44  ;;  %v1514_v27 = vpop.eup %1513  ;;  %v1824_v44 = vand.u32 127, %v404_v41 }
  0x51   : > { %559 = vrot.lane.b32.xlu1 %v1704_v19, %s1549_s7  ;;  %1517 = vrcp.f32 %v360_v24  ;;  %v1731_v28 = vmul.f32 %v1514_v27, %v1684_v47 }
  0x52   : > { %v417_v45 = vand.u32 31, %v1824_v44  ;;  %v1836_v48 = vadd.s32 128, %v1824_v44  ;;  %v407_v49 = vadd.s32 256, %v1824_v44  ;;  %vm575_vm1 = vcmp.lt.s32.totalorder %v1824_v44, 33 }
  0x53   : > { %vm632_vm2 = vcmp.lt.s32.totalorder %v1824_v44, 32  ;;  %vm682_vm7 = vcmp.lt.s32.totalorder %v1824_v44, 31  ;;  %vm740_vm11 = vcmp.lt.s32.totalorder %v1824_v44, 1 }
  0x54   : > { %618 = vrot.lane.b32.xlu0 %v1694_v14, %s1550_s12  ;;  %vm509_vm0 = vcmp.ne.s32.totalorder %v417_v45, 0  ;;  %v424_v52 = vand.u32 31, %v1836_v48  ;;  %v431_v54 = vand.u32 31, %v407_v49  ;;  %vm533_vm5 = vcmp.ne.s32.totalorder %v417_v45, 31 }
  0x55   : > { %563 = vrot.lane.b32.xlu1 %v1711_v21, %s1549_s7  ;;  %v1845_v51 = vsel %vm509_vm0, 1.0, %v1548_v2  ;;  %v1891_v11 = vsel %vm533_vm5, 1.0, %v1548_v2  ;;  %vm879_vm5 = vcmp.lt.s32.totalorder %v1824_v44, 97 }
  0x56   : > { %vm510_vm3 = vcmp.ne.s32.totalorder %v424_v52, 0  ;;  %vm511_vm4 = vcmp.ne.s32.totalorder %v431_v54, 0  ;;  %vm534_vm8 = vcmp.ne.s32.totalorder %v424_v52, 31  ;;  %vm535_vm9 = vcmp.ne.s32.totalorder %v431_v54, 31 }
  0x57   : > { %v1871_v3 = vsel %vm510_vm3, 1.0, %v1548_v2  ;;  %v1876_v5 = vsel %vm511_vm4, 1.0, %v1548_v2  ;;  %v1928_v48 = vsel %vm535_vm9, 1.0, %v1548_v2  ;;  %vm821_vm4 = vcmp.lt.s32.totalorder %v1824_v44, 127 }
  0x58   : > { %664 = vrot.lane.b32.xlu0 %v1697_v16, %s1551_s25 }
  0x59   : > { %616 = vrot.lane.b32.xlu1 %v1704_v19, %s1550_s12 }
  0x5c   : > { %668 = vrot.lane.b32.xlu0 %v1694_v14, %s1551_s25  ;;  %v1516_v29 = vpop.eup %1515 }
  0x5d   : > { %620 = vrot.lane.b32.xlu1 %v1711_v21, %s1550_s12  ;;  %v1740_v30 = vmul.f32 %v1516_v29, %v1690_v55  ;;  %v1849_v55 = vadd.s32 384, %v1824_v44 }
  0x5e   : > { %v1518_v31 = vpop.eup %1517 }
  0x5f   : > { %v1745_v32 = vmul.f32 %v1518_v31, %v328_v61  ;;  %v438_v61 = vand.u32 31, %v1849_v55 }
  0x60   : > { %567 = vrot.lane.b32.xlu0 %v1724_v26, %s1549_s7 }
  0x61   : > { %666 = vrot.lane.b32.xlu1 %v1704_v19, %s1551_s25  ;;  %vm512_vm6 = vcmp.ne.s32.totalorder %v438_v61, 0  ;;  %vm536_vm10 = vcmp.ne.s32.totalorder %v438_v61, 31 }
  0x62   : > { %v1894_v12 = vsel %vm512_vm6, 1.0, %v1548_v2  ;;  %vm937_vm6 = vcmp.lt.s32.totalorder %v1824_v44, 96 }
  0x64   : > { %571 = vrot.lane.b32.xlu0 %v1731_v28, %s1549_s7 }
  0x65   : > { %670 = vrot.lane.b32.xlu1 %v1711_v21, %s1551_s25 }
  0x68   : > { %724 = vrot.lane.b32.xlu0 %v1704_v19, %s1552_s26 }
  0x69   : > { %565 = vrot.lane.b32.xlu1 %v1740_v30, %s1549_s7 }
  0x6c   : > { %728 = vrot.lane.b32.xlu0 %v1711_v21, %s1552_s26 }
  0x6d   : > { %569 = vrot.lane.b32.xlu1 %v1745_v32, %s1549_s7  ;;  %s1553_s7 = smov 127  }
  0x70   : > { %738 = vrot.lane.b32.xlu0 %v1548_v2, %s1552_s26 }
  0x71   : > { %722 = vrot.lane.b32.xlu1 %v1697_v16, %s1552_s26 }
  0x74   : > { %624 = vrot.lane.b32.xlu0 %v1724_v26, %s1550_s12 }
  0x75   : > { %726 = vrot.lane.b32.xlu1 %v1694_v14, %s1552_s26 }
  0x78   : > { %628 = vrot.lane.b32.xlu0 %v1731_v28, %s1550_s12 }
  0x79   : > { %784 = vperm.xlu1 %1486, %v1442_v33  }
  0x7c   : > { %674 = vrot.lane.b32.xlu0 %v1724_v26, %s1551_s25 }
  0x7d   : > { %622 = vrot.lane.b32.xlu1 %v1740_v30, %s1550_s12 }
  0x80   : > { %678 = vrot.lane.b32.xlu0 %v1731_v28, %s1551_s25 }
  0x81   : > { %626 = vrot.lane.b32.xlu1 %v1745_v32, %s1550_s12 }
  0x84   : > { %730 = vrot.lane.b32.xlu0 %v1740_v30, %s1552_s26 }
  0x85   : > { %672 = vrot.lane.b32.xlu1 %v1740_v30, %s1551_s25 }
  0x88   : > { %734 = vrot.lane.b32.xlu0 %v1745_v32, %s1552_s26 }
  0x89   : > { %676 = vrot.lane.b32.xlu1 %v1745_v32, %s1551_s25  ;;  %s285_s25 = scalar_lea.vmem %s2316_s6, %s1634_s13 }
  0x8c   : > { %805 = vrot.lane.b32.xlu0 %v1704_v19, %s1553_s7 }
  0x8d   : > { %842 = vperm.xlu1 %1486, %v1443_v34  }
  0x8e   : > { %v574_v43 = vpop.permute.xlu1 %573 }
  0x90   : > { %809 = vrot.lane.b32.xlu0 %v1711_v21, %s1553_s7 }
  0x91   : > { %732 = vrot.lane.b32.xlu1 %v1724_v26, %s1552_s26 }
  0x92   : > { %v631_v47 = vpop.permute.xlu1 %630 }
  0x94   : > { %900 = vperm.xlu0 %1485, %v1444_v35  }
  0x95   : > { %736 = vrot.lane.b32.xlu1 %v1731_v28, %s1552_s26 }
  0x98   : > { %863 = vrot.lane.b32.xlu0 %v1704_v19, %s1554_s10  ;;  %v1797_v37 = vpop.permute.xlu0 %595 }
  0x99   : > { %807 = vrot.lane.b32.xlu1 %v1694_v14, %s1553_s7 }
  0x9c   : > { %867 = vrot.lane.b32.xlu0 %v1711_v21, %s1554_s10  ;;  %v1805_v38 = vpop.permute.xlu0 %645 }
  0x9d   : > { %811 = vrot.lane.b32.xlu1 %v1740_v30, %s1553_s7 }
  0xa0   : > { %950 = vperm.xlu0 %1485, %v1445_v36   ;;  %v1814_v40 = vpop.permute.xlu0 %703 }
  0xa1   : > { %803 = vrot.lane.b32.xlu1 %v1697_v16, %s1553_s7 }
  0xa4   : > { %813 = vrot.lane.b32.xlu0 %v1724_v26, %s1553_s7  ;;  %v1822_v42 = vpop.permute.xlu0 %761 }
  0xa5   : > { %865 = vrot.lane.b32.xlu1 %v1694_v14, %s1554_s10 }
  0xa8   : > { %817 = vrot.lane.b32.xlu0 %v1731_v28, %s1553_s7  ;;  %v681_v46 = vpop.permute.xlu0 %680 }
  0xa9   : > { %869 = vrot.lane.b32.xlu1 %v1740_v30, %s1554_s10 }
  0xac   : > { %1008 = vperm.xlu0 %1485, %v1446_v39  }
  0xad   : > { %861 = vrot.lane.b32.xlu1 %v1697_v16, %s1554_s10 }
  0xb0   : > { %873 = vrot.lane.b32.xlu0 %v1745_v32, %s1554_s10 }
  0xb1   : > { %815 = vrot.lane.b32.xlu1 %v1745_v32, %s1553_s7 }
  0xb4   : > { %877 = vrot.lane.b32.xlu0 %v1548_v2, %s1554_s10 }
  0xb5   : > { %819 = vrot.lane.b32.xlu1 %v1548_v2, %s1553_s7 }
  0xb8   : > { %923 = vrot.lane.b32.xlu0 %v1694_v14, %s1555_s16 }
  0xb9   : > { %871 = vrot.lane.b32.xlu1 %v1724_v26, %s1554_s10 }
  0xbc   : > { %927 = vrot.lane.b32.xlu0 %v1740_v30, %s1555_s16 }
  0xbd   : > { %875 = vrot.lane.b32.xlu1 %v1731_v28, %s1554_s10 }
  0xbe   : > { %v562_v50 = vpop.permute.xlu0 %561 }
  0xbf   : > { %v558_v53 = vpop.permute.xlu1 %557 }
  0xc0   : > { %v583_v56 = vsel %vm575_vm1, %v574_v43, %v558_v53  ;;  %973 = vrot.lane.b32.xlu0 %v1694_v14, %s1556_s17 }
  0xc1   : > { %v584_v57 = vmul.f32 %v1845_v51, %v583_v56  ;;  %921 = vrot.lane.b32.xlu1 %v1704_v19, %s1555_s16 }
  0xc2   : > { %v615_v58 = vpop.permute.xlu0 %614 }
  0xc3   : > { %v640_v59 = vsel %vm632_vm2, %v631_v47, %v615_v58  ;;  %v560_v60 = vpop.permute.xlu1 %559  ;;  %v598_v62 = vmul.f32 %v1797_v37, %v584_v57  ;;  %v1925_v47 = vsel %vm534_vm8, 1.0, %v1548_v2  ;;  %v1941_v57 = vsel %vm536_vm10, 1.0, %v1548_v2 }
  0xc4   : > { %v648_v63 = vmul.f32 %v1805_v38, %v640_v59  ;;  %v581_v0 = vsel %vm575_vm1, %v560_v60, %v562_v50  ;;  %v582_v1 = vsel %vm575_vm1, %v558_v53, %v560_v60  ;;  %977 = vrot.lane.b32.xlu0 %v1740_v30, %s1556_s17  ;;  %vm1034_vm8 = vcmask 64512  }
  0xc5   : > { %925 = vrot.lane.b32.xlu1 %v1711_v21, %s1555_s16  ;;  %v585_v6 = vmul.f32 %v1871_v3, %v582_v1  ;;  %v586_v10 = vmul.f32 %v1876_v5, %v581_v0 }
  0xc6   : > { %v656_v4 = vadd.f32 %v648_v63, %v598_v62  ;;  %v619_v7 = vpop.permute.xlu0 %618 }
  0xc7   : > { %v1878_v8 = vpop.permute.xlu1 %563  ;;  %v599_v18 = vmul.f32 %v1797_v37, %v585_v6  ;;  %v600_v24 = vmul.f32 %v1797_v37, %v586_v10 }
  0xc8   : > { %v580_v9 = vsel %vm575_vm1, %v562_v50, %v1878_v8  ;;  %969 = vrot.lane.b32.xlu0 %v1697_v16, %s1556_s17 }
  0xc9   : > { %971 = vrot.lane.b32.xlu1 %v1704_v19, %s1556_s17  ;;  %v587_v25 = vmul.f32 %v1894_v12, %v580_v9 }
  0xca   : > { %v665_v13 = vpop.permute.xlu0 %664 }
  0xcb   : > { %v690_v15 = vsel %vm682_vm7, %v681_v46, %v665_v13  ;;  %v617_v17 = vpop.permute.xlu1 %616  ;;  %v601_v43 = vmul.f32 %v1797_v37, %v587_v25 }
  0xcc   : > { %v691_v20 = vmul.f32 %v1891_v11, %v690_v15  ;;  %v638_v22 = vsel %vm632_vm2, %v617_v17, %v619_v7  ;;  %v639_v23 = vsel %vm632_vm2, %v615_v58, %v617_v17  ;;  %931 = vrot.lane.b32.xlu0 %v1745_v32, %s1555_s16 }
  0xcd   : > { %v649_v27 = vmul.f32 %v1805_v38, %v639_v23  ;;  %v650_v29 = vmul.f32 %v1805_v38, %v638_v22  ;;  %975 = vrot.lane.b32.xlu1 %v1711_v21, %s1556_s17 }
  0xce   : > { %v706_v31 = vmul.f32 %v1814_v40, %v691_v20  ;;  %v669_v33 = vpop.permute.xlu0 %668  ;;  %v1028_v20 = vld [vmem:[%s2315_s5] sm:$0xff] }
  0xcf   : > { %v657_v34 = vadd.f32 %v649_v27, %v599_v18  ;;  %v658_v35 = vadd.f32 %v650_v29, %v600_v24  ;;  %v1913_v36 = vpop.permute.xlu1 %620  ;;  %v409_v29 = vadd.s32 512, %v1824_v44 }
  0xd0   : > { %v714_v39 = vadd.f32 %v706_v31, %v656_v4  ;;  %v637_v41 = vsel %vm632_vm2, %v619_v7, %v1913_v36  ;;  %935 = vrot.lane.b32.xlu0 %v1548_v2, %s1555_s16 }
  0xd1   : > { %v651_v45 = vmul.f32 %v1805_v38, %v637_v41  ;;  %919 = vrot.lane.b32.xlu1 %v1697_v16, %s1555_s16 }
  0xd2   : > { %v568_v46 = vpop.permute.xlu0 %567 }
  0xd3   : > { %v659_v49 = vadd.f32 %v651_v45, %v601_v43  ;;  %v667_v50 = vpop.permute.xlu1 %666 }
  0xd4   : > { %v688_v52 = vsel %vm682_vm7, %v667_v50, %v669_v33  ;;  %v689_v53 = vsel %vm682_vm7, %v665_v13, %v667_v50  ;;  %981 = vrot.lane.b32.xlu0 %v1745_v32, %s1556_s17 }
  0xd5   : > { %v692_v54 = vmul.f32 %v1925_v47, %v689_v53  ;;  %v693_v55 = vmul.f32 %v1928_v48, %v688_v52  ;;  %929 = vrot.lane.b32.xlu1 %v1724_v26, %s1555_s16  ;;  %v445_v53 = vand.u32 31, %v409_v29 }
  0xd6   : > { %v572_v56 = vpop.permute.xlu0 %571 }
  0xd7   : > { %v707_v58 = vmul.f32 %v1814_v40, %v692_v54  ;;  %v708_v59 = vmul.f32 %v1814_v40, %v693_v55  ;;  %v1945_v60 = vpop.permute.xlu1 %670  ;;  %vm513_vm12 = vcmp.ne.s32.totalorder %v445_v53, 0  ;;  %vm537_vm0 = vcmp.ne.s32.totalorder %v445_v53, 31 }
  0xd8   : > { %v687_v61 = vsel %vm682_vm7, %v669_v33, %v1945_v60  ;;  %985 = vrot.lane.b32.xlu0 %v1548_v2, %s1556_s17  ;;  %v410_v33 = vadd.s32 640, %v1824_v44 }
  0xd9   : > { %v715_v62 = vadd.f32 %v707_v58, %v657_v34  ;;  %v716_v63 = vadd.f32 %v708_v59, %v658_v35  ;;  %v694_v0 = vmul.f32 %v1941_v57, %v687_v61  ;;  %933 = vrot.lane.b32.xlu1 %v1731_v28, %s1555_s16  ;;  %v412_v61 = vadd.s32 896, %v1824_v44 }
  0xda   : > { %v725_v1 = vpop.permute.xlu0 %724  ;;  %v452_v55 = vand.u32 31, %v410_v33 }
  0xdb   : > { %v709_v4 = vmul.f32 %v1814_v40, %v694_v0  ;;  %v566_v7 = vpop.permute.xlu1 %565 }
  0xdc   : > { %v578_v6 = vsel %vm575_vm1, %v566_v7, %v568_v46  ;;  %v579_v9 = vsel %vm575_vm1, %v1878_v8, %v566_v7  ;;  %vm514_vm13 = vcmp.ne.s32.totalorder %v452_v55, 0  ;;  %v2000_v7 = vsel %vm513_vm12, 1.0, %v1548_v2 }
  0xdd   : > { %v717_v10 = vadd.f32 %v709_v4, %v659_v49  ;;  %979 = vrot.lane.b32.xlu1 %v1724_v26, %s1556_s17 }
  0xde   : > { %v729_v13 = vpop.permute.xlu0 %728 }
  0xdf   : > { %v570_v15 = vpop.permute.xlu1 %569 }
  0xe0   : > { %v1965_v17 = vsel %vm575_vm1, %v570_v15, %v572_v56  ;;  %v1969_v18 = vsel %vm575_vm1, %v568_v46, %v570_v15  ;;  %v411_v56 = vadd.s32 768, %v1824_v44  ;;  %v2003_v15 = vsel %vm514_vm13, 1.0, %v1548_v2 }
  0xe1   : > { %983 = vrot.lane.b32.xlu1 %v1731_v28, %s1556_s17  ;;  %vm538_vm1 = vcmp.ne.s32.totalorder %v452_v55, 31 }
  0xe2   : > { %v739_v8 = vpop.permute.xlu0 %738  ;;  %v2061_v53 = vsel %vm538_vm1, 1.0, %v1548_v2 }
  0xe3   : > { %v723_v22 = vpop.permute.xlu1 %722 }
  0xe4   : > { %v747_v23 = vsel %vm740_vm11, %v723_v22, %v725_v1  ;;  %v748_v24 = vsel %vm740_vm11, %v739_v8, %v723_v22 }
  0xe5   : > { %v749_v25 = vmul.f32 %v1845_v51, %v748_v24  ;;  %v750_v27 = vmul.f32 %v1871_v3, %v747_v23  ;;  %1031 = vperm.xlu1 %1486, %v1028_v20  }
  0xe6   : > { %v625_v31 = vpop.permute.xlu0 %624 }
  0xe7   : > { %v764_v34 = vmul.f32 %v1822_v42, %v749_v25  ;;  %v765_v35 = vmul.f32 %v1822_v42, %v750_v27  ;;  %v727_v41 = vpop.permute.xlu1 %726 }
  0xe8   : > { %v745_v43 = vsel %vm740_vm11, %v727_v41, %v729_v13  ;;  %v746_v45 = vsel %vm740_vm11, %v725_v1, %v727_v41 }
  0xe9   : > { %v772_v46 = vadd.f32 %v764_v34, %v714_v39  ;;  %v773_v49 = vadd.f32 %v765_v35, %v715_v62  ;;  %v751_v50 = vmul.f32 %v1876_v5, %v746_v45  ;;  %v752_v52 = vmul.f32 %v1894_v12, %v745_v43 }
  0xea   : > { %v629_v54 = vpop.permute.xlu0 %628  ;;  %v459_v39 = vand.u32 31, %v411_v56  ;;  %v466_v62 = vand.u32 31, %v412_v61 }
  0xeb   : > { %v766_v58 = vmul.f32 %v1822_v42, %v751_v50  ;;  %v767_v59 = vmul.f32 %v1822_v42, %v752_v52 }
  0xec   : > { %vm515_vm14 = vcmp.ne.s32.totalorder %v459_v39, 0  ;;  %vm516_vm15 = vcmp.ne.s32.totalorder %v466_v62, 0  ;;  %vm539_vm3 = vcmp.ne.s32.totalorder %v459_v39, 31 }
  0xed   : > { %v774_v0 = vadd.f32 %v766_v58, %v716_v63  ;;  %v775_v4 = vadd.f32 %v767_v59, %v717_v10  ;;  %v588_v63 = vmul.f32 %v2000_v7, %v579_v9  ;;  %v589_v10 = vmul.f32 %v2003_v15, %v578_v6 }
  0xee   : > { %v1997_v1 = vpop.permute.xlu0 %674  ;;  %v2014_v24 = vsel %vm515_vm14, 1.0, %v1548_v2  ;;  %v2023_v9 = vsel %vm516_vm15, 1.0, %v1548_v2 }
  0xef   : > { %v590_v43 = vmul.f32 %v2014_v24, %v1969_v18  ;;  %v591_v45 = vmul.f32 %v2023_v9, %v1965_v17 }
  0xf1   : > { %v604_v18 = vmul.f32 %v1797_v37, %v590_v43  ;;  %v605_v17 = vmul.f32 %v1797_v37, %v591_v45 }
  0xf2   : > { %v679_v8 = vpop.permute.xlu0 %678 }
  0xf4   : > { %v2005_v20 = vpop.permute.xlu1 %784 }
  0xf5   : > { %v789_v22 = vmul.f32 %v2005_v20, %v1694_v14  ;;  %v787_v23 = vmul.f32 %v2005_v20, %v1697_v16  ;;  %v788_v27 = vmul.f32 %v2005_v20, %v1704_v19  ;;  %v790_v29 = vmul.f32 %v2005_v20, %v1711_v21 }
  0xf6   : > { %v2016_v25 = vpop.permute.xlu0 %730  ;;  %v602_v19 = vmul.f32 %v1797_v37, %v588_v63  ;;  %v603_v21 = vmul.f32 %v1797_v37, %v589_v10 }
  0xf7   : > { %v744_v14 = vsel %vm740_vm11, %v729_v13, %v2016_v25  ;;  %v2028_v6 = vadd.f32 %v789_v22, %v774_v0  ;;  %v2030_v16 = vadd.f32 %v787_v23, %v772_v46  ;;  %v2032_v34 = vadd.f32 %v788_v27, %v773_v49 }
  0xf8   : > { %v623_v33 = vpop.permute.xlu1 %622  ;;  %v2034_v35 = vadd.f32 %v790_v29, %v775_v4  ;;  %v2058_v4 = vsel %vm537_vm0, 1.0, %v1548_v2  ;;  %v2073_v23 = vsel %vm539_vm3, 1.0, %v1548_v2 }
  0xf9   : > { %v635_v41 = vsel %vm632_vm2, %v623_v33, %v625_v31  ;;  %v636_v13 = vsel %vm632_vm2, %v1913_v36, %v623_v33 }
  0xfa   : > { %v652_v46 = vmul.f32 %v1805_v38, %v636_v13  ;;  %v653_v49 = vmul.f32 %v1805_v38, %v635_v41  ;;  %v735_v59 = vpop.permute.xlu0 %734 }
  0xfc   : > { %v660_v50 = vadd.f32 %v652_v46, %v602_v19  ;;  %v661_v52 = vadd.f32 %v653_v49, %v603_v21  ;;  %v627_v56 = vpop.permute.xlu1 %626 }
  0xfd   : > { %v633_v58 = vsel %vm632_vm2, %v627_v56, %v629_v54  ;;  %v634_v36 = vsel %vm632_vm2, %v625_v31, %v627_v56  ;;  %vm540_vm2 = vcmp.ne.s32.totalorder %v466_v62, 31  ;;  %v753_v31 = vmul.f32 %v2000_v7, %v744_v14 }
  0xfe   : > { %v654_v61 = vmul.f32 %v1805_v38, %v634_v36  ;;  %v655_v0 = vmul.f32 %v1805_v38, %v633_v58  ;;  %v2076_v39 = vsel %vm540_vm2, 1.0, %v1548_v2  ;;  %v2078_v62 = vpop.permute.xlu0 %805 }
  0xff   : > { %v768_v33 = vmul.f32 %v1822_v42, %v753_v31  ;;  %v792_v31 = vmul.f32 %v2005_v20, %v1724_v26 }
 0x100   : > { %v662_v55 = vadd.f32 %v654_v61, %v604_v18  ;;  %v663_v54 = vadd.f32 %v655_v0, %v605_v17  ;;  %v673_v63 = vpop.permute.xlu1 %672 }
 0x101   : > { %v685_v37 = vsel %vm682_vm7, %v673_v63, %v1997_v1  ;;  %v686_v38 = vsel %vm682_vm7, %v1945_v60, %v673_v63 }
 0x102   : > { %v695_v10 = vmul.f32 %v2058_v4, %v686_v38  ;;  %v696_v22 = vmul.f32 %v2061_v53, %v685_v37  ;;  %v2096_v58 = vpop.permute.xlu0 %809 }
 0x104   : > { %v710_v27 = vmul.f32 %v1814_v40, %v695_v10  ;;  %v711_v29 = vmul.f32 %v1814_v40, %v696_v22  ;;  %v677_v14 = vpop.permute.xlu1 %676  ;;  %v793_v10 = vmul.f32 %v2005_v20, %v1745_v32 }
 0x105   : > { %v683_v60 = vsel %vm682_vm7, %v677_v14, %v679_v8  ;;  %v684_v19 = vsel %vm682_vm7, %v1997_v1, %v677_v14  ;;  %v791_v8 = vmul.f32 %v2005_v20, %v1740_v30  ;;  %vm987_vm7 = vcmp.lt.s32.totalorder %v1824_v44, 95 }
 0x106   : > { %v718_v21 = vadd.f32 %v710_v27, %v660_v50  ;;  %v719_v41 = vadd.f32 %v711_v29, %v661_v52  ;;  %v697_v13 = vmul.f32 %v2073_v23, %v684_v19  ;;  %v698_v43 = vmul.f32 %v2076_v39, %v683_v60 }
 0x108   : > { %v776_v45 = vadd.f32 %v768_v33, %v718_v21  ;;  %v712_v46 = vmul.f32 %v1814_v40, %v697_v13  ;;  %v713_v49 = vmul.f32 %v1814_v40, %v698_v43  ;;  %v2092_v56 = vpop.permute.xlu1 %842 }
 0x10a   : > { %v720_v36 = vadd.f32 %v712_v46, %v662_v55  ;;  %v721_v1 = vadd.f32 %v713_v49, %v663_v54  ;;  %v799_v50 = vadd.f32 %v791_v8, %v776_v45 }
 0x10c   : > { %v733_v52 = vpop.permute.xlu1 %732 }
 0x10d   : > { %v742_v18 = vsel %vm740_vm11, %v733_v52, %v735_v59  ;;  %v743_v17 = vsel %vm740_vm11, %v2016_v25, %v733_v52 }
 0x10e   : > { %v754_v40 = vmul.f32 %v2003_v15, %v743_v17  ;;  %v755_v61 = vmul.f32 %v2014_v24, %v742_v18 }
 0x10f   : > { %v2105_v0 = vpop.permute.xlu0 %900 }
 0x110   : > { %v769_v30 = vmul.f32 %v1822_v42, %v754_v40  ;;  %v770_v55 = vmul.f32 %v1822_v42, %v755_v61  ;;  %v737_v54 = vpop.permute.xlu1 %736 }
 0x111   : > { %v741_v63 = vsel %vm740_vm11, %v735_v59, %v737_v54  ;;  %v794_v59 = vmul.f32 %v2005_v20, %v1731_v28 }
 0x112   : > { %v777_v37 = vadd.f32 %v769_v30, %v719_v41  ;;  %v778_v38 = vadd.f32 %v770_v55, %v720_v36  ;;  %v756_v25 = vmul.f32 %v2023_v9, %v741_v63 }
 0x113   : > { %v2116_v22 = vpop.permute.xlu0 %863 }
 0x114   : > { %v771_v27 = vmul.f32 %v1822_v42, %v756_v25  ;;  %v808_v29 = vpop.permute.xlu1 %807  ;;  %v800_v14 = vadd.f32 %v792_v31, %v777_v37  ;;  %v801_v33 = vadd.f32 %v793_v10, %v778_v38 }
 0x116   : > { %v779_v60 = vadd.f32 %v771_v27, %v721_v1 }
 0x117   : > { %v2121_v19 = vpop.permute.xlu0 %867 }
 0x118   : > { %v812_v26 = vpop.permute.xlu1 %811  ;;  %v802_v21 = vadd.f32 %v794_v59, %v779_v60 }
 0x11b   : > { %v2123_v41 = vpop.permute.xlu0 %950 }
 0x11c   : > { %v804_v32 = vpop.permute.xlu1 %803 }
 0x11d   : > { %v829_v42 = vsel %vm821_vm4, %v804_v32, %v2078_v62 }
 0x11e   : > { %v830_v13 = vmul.f32 %v1891_v11, %v829_v42 }
 0x11f   : > { %v814_v43 = vpop.permute.xlu0 %813 }
 0x120   : > { %v845_v45 = vmul.f32 %v2092_v56, %v830_v13  ;;  %v825_v28 = vsel %vm821_vm4, %v812_v26, %v814_v43  ;;  %v866_v20 = vpop.permute.xlu1 %865 }
 0x121   : > { %v834_v46 = vmul.f32 %v2058_v4, %v825_v28  ;;  %v828_v28 = vsel %vm821_vm4, %v2078_v62, %v808_v29  ;;  %v886_v62 = vsel %vm879_vm5, %v2116_v22, %v866_v20 }
 0x122   : > { %v2135_v49 = vadd.f32 %v845_v45, %v2030_v16 }
 0x123   : > { %v849_v8 = vmul.f32 %v2092_v56, %v834_v46  ;;  %v818_v36 = vpop.permute.xlu0 %817 }
 0x124   : > { %v870_v1 = vpop.permute.xlu1 %869 }
 0x125   : > { %v857_v52 = vadd.f32 %v849_v8, %v799_v50 }
 0x127   : > { %v2138_v18 = vpop.permute.xlu0 %1008 }
 0x128   : > { %v862_v17 = vpop.permute.xlu1 %861 }
 0x12b   : > { %v2140_v40 = vpop.permute.xlu0 %873 }
 0x12c   : > { %v816_v61 = vpop.permute.xlu1 %815 }
 0x12d   : > { %v823_v30 = vsel %vm821_vm4, %v816_v61, %v818_v36  ;;  %v824_v55 = vsel %vm821_vm4, %v814_v43, %v816_v61 }
 0x12e   : > { %v835_v16 = vmul.f32 %v2061_v53, %v824_v55  ;;  %v836_v54 = vmul.f32 %v2073_v23, %v823_v30  ;;  %v831_v55 = vmul.f32 %v1925_v47, %v828_v28 }
 0x12f   : > { %v878_v63 = vpop.permute.xlu0 %877 }
 0x130   : > { %v850_v31 = vmul.f32 %v2092_v56, %v835_v16  ;;  %v851_v50 = vmul.f32 %v2092_v56, %v836_v54  ;;  %v820_v37 = vpop.permute.xlu1 %819  ;;  %v826_v16 = vsel %vm821_vm4, %v2096_v58, %v812_v26 }
 0x131   : > { %v822_v38 = vsel %vm821_vm4, %v818_v36, %v820_v37 }
 0x132   : > { %v2152_v25 = vadd.f32 %v850_v31, %v800_v14  ;;  %v859_v10 = vadd.f32 %v851_v50, %v801_v33  ;;  %v837_v27 = vmul.f32 %v2076_v39, %v822_v38  ;;  %v884_v31 = vsel %vm879_vm5, %v2121_v19, %v870_v1 }
 0x133   : > { %v924_v60 = vpop.permute.xlu0 %923  ;;  %v833_v50 = vmul.f32 %v1941_v57, %v826_v16  ;;  %v846_v38 = vmul.f32 %v2092_v56, %v831_v55 }
 0x134   : > { %v852_v59 = vmul.f32 %v2092_v56, %v837_v27  ;;  %v2157_v32 = vpop.permute.xlu1 %871 }
 0x135   : > { %v883_v42 = vsel %vm879_vm5, %v870_v1, %v2157_v32 }
 0x136   : > { %v860_v13 = vadd.f32 %v852_v59, %v802_v21  ;;  %v892_v43 = vmul.f32 %v2000_v7, %v883_v42  ;;  %v827_v7 = vsel %vm821_vm4, %v808_v29, %v2096_v58  ;;  %v891_v59 = vmul.f32 %v1894_v12, %v884_v31 }
 0x137   : > { %v2163_v45 = vpop.permute.xlu0 %927  ;;  %v887_v42 = vsel %vm879_vm5, %v862_v17, %v2116_v22 }
 0x138   : > { %v907_v14 = vmul.f32 %v2105_v0, %v892_v43  ;;  %v876_v33 = vpop.permute.xlu1 %875  ;;  %v906_v28 = vmul.f32 %v2105_v0, %v891_v59 }
 0x139   : > { %v880_v46 = vsel %vm879_vm5, %v876_v33, %v878_v63  ;;  %v881_v8 = vsel %vm879_vm5, %v2140_v40, %v876_v33  ;;  %v889_v63 = vmul.f32 %v1871_v3, %v886_v62  ;;  %v854_v33 = vadd.f32 %v846_v38, %v2032_v34 }
 0x13a   : > { %v894_v21 = vmul.f32 %v2014_v24, %v881_v8  ;;  %v895_v36 = vmul.f32 %v2023_v9, %v880_v46  ;;  %v2179_v61 = vadd.f32 %v907_v14, %v857_v52  ;;  %v832_v9 = vmul.f32 %v1928_v48, %v827_v7 }
 0x13b   : > { %v974_v30 = vpop.permute.xlu0 %973  ;;  %v885_v52 = vsel %vm879_vm5, %v866_v20, %v2121_v19  ;;  %v904_v1 = vmul.f32 %v2105_v0, %v889_v63  ;;  %v888_v46 = vmul.f32 %v1845_v51, %v887_v42 }
 0x13c   : > { %v909_v54 = vmul.f32 %v2105_v0, %v894_v21  ;;  %v910_v29 = vmul.f32 %v2105_v0, %v895_v36  ;;  %v922_v24 = vpop.permute.xlu1 %921  ;;  %v890_v20 = vmul.f32 %v1876_v5, %v885_v52  ;;  %v847_v19 = vmul.f32 %v2092_v56, %v832_v9 }
 0x13d   : > { %v944_v3 = vsel %vm937_vm6, %v922_v24, %v924_v60  ;;  %v912_v7 = vadd.f32 %v904_v1, %v854_v33 }
 0x13e   : > { %v2199_v58 = vadd.f32 %v909_v54, %v859_v10  ;;  %v2201_v26 = vadd.f32 %v910_v29, %v860_v13  ;;  %v848_v10 = vmul.f32 %v2092_v56, %v833_v50  ;;  %v905_v5 = vmul.f32 %v2105_v0, %v890_v20 }
 0x13f   : > { %v2204_v37 = vpop.permute.xlu0 %977  ;;  %v954_v13 = vmul.f32 %v2123_v41, %v944_v3  ;;  %v855_v17 = vadd.f32 %v847_v19, %v2028_v6 }
 0x140   : > { %v926_v27 = vpop.permute.xlu1 %925  ;;  %v856_v36 = vadd.f32 %v848_v10, %v2034_v35  ;;  %v903_v35 = vmul.f32 %v2105_v0, %v888_v46  ;;  %v1027_v10 = vld [vmem:[%s2314_s4] sm:$0xff] }
 0x141   : > { %v942_v12 = vsel %vm937_vm6, %v926_v27, %v2163_v45  ;;  %v943_v56 = vsel %vm937_vm6, %v924_v60, %v926_v27  ;;  %v962_v55 = vadd.f32 %v954_v13, %v912_v7  ;;  %v913_v54 = vadd.f32 %v905_v5, %v855_v17 }
 0x142   : > { %v956_v21 = vmul.f32 %v2123_v41, %v942_v12  ;;  %v955_v34 = vmul.f32 %v2123_v41, %v943_v56  ;;  %v914_v29 = vadd.f32 %v906_v28, %v856_v36  ;;  %v911_v1 = vadd.f32 %v903_v35, %v2135_v49 }
 0x143   : > { %v970_v43 = vpop.permute.xlu0 %969 }
 0x144   : > { %v972_v14 = vpop.permute.xlu1 %971  ;;  %v964_v31 = vadd.f32 %v956_v21, %v914_v29  ;;  %v963_v27 = vadd.f32 %v955_v34, %v913_v54 }
 0x145   : > { %v994_v22 = vsel %vm987_vm7, %v972_v14, %v974_v30  ;;  %v995_v6 = vsel %vm987_vm7, %v970_v43, %v972_v14 }
 0x146   : > { %v997_v8 = vmul.f32 %v1925_v47, %v994_v22  ;;  %v996_v50 = vmul.f32 %v1891_v11, %v995_v6 }
 0x147   : > { %v932_v16 = vpop.permute.xlu0 %931 }
 0x148   : > { %v976_v62 = vpop.permute.xlu1 %975  ;;  %v1012_v60 = vmul.f32 %v2138_v18, %v997_v8 }
 0x149   : > { %v992_v51 = vsel %vm987_vm7, %v976_v62, %v2204_v37  ;;  %v993_v47 = vsel %vm987_vm7, %v974_v30, %v976_v62  ;;  %v882_v30 = vsel %vm879_vm5, %v2157_v32, %v2140_v40  ;;  %v1011_v32 = vmul.f32 %v2138_v18, %v996_v50 }
 0x14a   : > { %v998_v9 = vmul.f32 %v1928_v48, %v993_v47  ;;  %v999_v52 = vmul.f32 %v1941_v57, %v992_v51  ;;  %v1020_v63 = vadd.f32 %v1012_v60, %v962_v55  ;;  %v893_v42 = vmul.f32 %v2003_v15, %v882_v30 }
 0x14b   : > { %v936_v11 = vpop.permute.xlu0 %935 }
 0x14c   : > { %1068 = vmatprep.subr.mxu0 %v1020_v63  ;;  %v920_v38 = vpop.permute.xlu1 %919  ;;  %v1014_v20 = vmul.f32 %v2138_v18, %v999_v52  ;;  %v1013_v59 = vmul.f32 %v2138_v18, %v998_v9  ;;  %v908_v49 = vmul.f32 %v2105_v0, %v893_v42 }
 0x14d   : > { %v945_v48 = vsel %vm937_vm6, %v920_v38, %v922_v24 }
 0x14e   : > { %v953_v57 = vmul.f32 %v2123_v41, %v945_v48  ;;  %v1022_v3 = vadd.f32 %v1014_v20, %v964_v31  ;;  %v1021_v19 = vadd.f32 %v1013_v59, %v963_v27  ;;  %v916_v0 = vadd.f32 %v908_v49, %v2152_v25 }
 0x14f   : > { %v982_v43 = vpop.permute.xlu0 %981 }
 0x150   : > { %1139 = vmatprep.subr.mxu1 %v1022_v3  ;;  %v930_v5 = vpop.permute.xlu1 %929  ;;  %v961_v40 = vadd.f32 %v953_v57, %v911_v1 }
 0x151   : > { %1140 = vmatpush1.msra.mxu1 %v1021_v19  ;;  %v940_v13 = vsel %vm937_vm6, %v930_v5, %v932_v16  ;;  %v941_v15 = vsel %vm937_vm6, %v2163_v45, %v930_v5 }
 0x152   : > { %1448 = vmatmul.mubr.msk.f32.vlgmr.msra.gmra.mxu1 %vm1034_vm8, %v1027_v10  ;;  %v1019_v24 = vadd.f32 %v1011_v32, %v961_v40  ;;  %v957_v14 = vmul.f32 %v2123_v41, %v941_v15  ;;  %v958_v33 = vmul.f32 %v2123_v41, %v940_v13 }
 0x153   : > { %1315 = vmatprep.mubr.f32.mxu1 %v1548_v2  ;;  %v986_v8 = vpop.permute.xlu0 %985 }
 0x154   : > { %1069 = vmatpush1.msra.mxu0 %v1019_v24  ;;  %v934_v12 = vpop.permute.xlu1 %933  ;;  %v965_v25 = vadd.f32 %v957_v14, %v2179_v61  ;;  %v966_v7 = vadd.f32 %v958_v33, %v916_v0 }
 0x155   : > { %1447 = vmatmul.mubr.msk.f32.vlgmr.msra.gmra.mxu0 %vm1034_vm8, %v1027_v10  ;;  %v938_v56 = vsel %vm937_vm6, %v934_v12, %v936_v11  ;;  %v939_v45 = vsel %vm937_vm6, %v932_v16, %v934_v12 }
 0x156   : > { %1244 = vmatprep.mubr.f32.mxu0 %v1548_v2  ;;  %v959_v21 = vmul.f32 %v2123_v41, %v939_v45  ;;  %v960_v36 = vmul.f32 %v2123_v41, %v938_v56 }
 0x158   : > { %v980_v28 = vpop.permute.xlu1 %979  ;;  %v967_v41 = vadd.f32 %v959_v21, %v2199_v58  ;;  %v968_v54 = vadd.f32 %v960_v36, %v2201_v26 }
 0x159   : > { %v990_v22 = vsel %vm987_vm7, %v980_v28, %v982_v43  ;;  %v991_v2 = vsel %vm987_vm7, %v2204_v37, %v980_v28 }
 0x15a   : > { %v1000_v17 = vmul.f32 %v2058_v4, %v991_v2  ;;  %v1001_v46 = vmul.f32 %v2061_v53, %v990_v22 }
 0x15c   : > { %v1015_v34 = vmul.f32 %v2138_v18, %v1000_v17  ;;  %v1016_v62 = vmul.f32 %v2138_v18, %v1001_v46  ;;  %v984_v55 = vpop.permute.xlu1 %983 }
 0x15d   : > { %v988_v37 = vsel %vm987_vm7, %v984_v55, %v986_v8  ;;  %v989_v4 = vsel %vm987_vm7, %v982_v43, %v984_v55 }
 0x15e   : > { %v1023_v53 = vadd.f32 %v1015_v34, %v965_v25  ;;  %v1002_v60 = vmul.f32 %v2073_v23, %v989_v4  ;;  %v1003_v61 = vmul.f32 %v2076_v39, %v988_v37  ;;  %v1024_v16 = vadd.f32 %v1016_v62, %v966_v7 }
 0x160   : > { %v1017_v6 = vmul.f32 %v2138_v18, %v1002_v60  ;;  %v1018_v51 = vmul.f32 %v2138_v18, %v1003_v61  ;;  %1210 = vmatprep.subr.mxu0 %v1024_v16  ;;  %v1032_v23 = vpop.permute.xlu1 %1031 }
 0x161   : > { %1211 = vmatpush1.msra.mxu0 %v1023_v53 }
 0x162   : > { %v1025_v47 = vadd.f32 %v1017_v6, %v967_v41  ;;  %1449 = vmatmul.mubr.msk.f32.vlgmr.msra.gmra.mxu0 %vm1034_vm8, %v1027_v10  ;;  %v1026_v44 = vadd.f32 %v1018_v51, %v968_v54 }
 0x164   : > { %1281 = vmatprep.subr.mxu1 %v1026_v44 }
 0x165   : > { %1282 = vmatpush1.msra.mxu1 %v1025_v47 }
 0x166   : > { %1450 = vmatmul.mubr.msk.f32.vlgmr.msra.gmra.mxu1 %vm1034_vm8, %v1027_v10 }
 0x212   : > { %v1175_v39 = vpop.f32.mrf.mxu1 }
 0x213   : > { %v1176_v58 = vadd.f32 %v1175_v39, %v1032_v23 }
 0x214   : > { %v1177_v26 = vpop.f32.mrf.mxu1 }
 0x215   : > { %1324 = vst [vmem:[%s285_s25 + $0x10] sm:$0xff] %v1176_v58  ;;  %v1178_v18 = vadd.f32 %v1177_v26, %v1032_v23  ;;  %v1104_v29 = vpop.f32.mrf.mxu0 }
 0x216   : > { %v1105_v35 = vadd.f32 %v1104_v29, %v1032_v23 }
 0x217   : > { %1325 = vst [vmem:[%s285_s25 + $0x18] sm:$0xff] %v1178_v18  ;;  %v1106_v9 = vpop.f32.mrf.mxu0 }
 0x218   : > { %1322 = vst [vmem:[%s285_s25] sm:$0xff] %v1105_v35  ;;  %v1107_v52 = vadd.f32 %v1106_v9, %v1032_v23 }
 0x21a   : > { %1323 = vst [vmem:[%s285_s25 + $0x8] sm:$0xff] %v1107_v52 }
 0x222   : > { %v1246_v63 = vpop.f32.mrf.mxu0 }
 0x223   : > { %v1247_v31 = vadd.f32 %v1246_v63, %v1032_v23 }
 0x224   : > { %v1248_v50 = vpop.f32.mrf.mxu0 }
 0x225   : > { %1326 = vst [vmem:[%s285_s25 + $0x20] sm:$0xff] %v1247_v31  ;;  %v1249_v38 = vadd.f32 %v1248_v50, %v1032_v23 }
 0x226   : > { %v1317_v20 = vpop.f32.mrf.mxu1 }
 0x227   : > { %1327 = vst [vmem:[%s285_s25 + $0x28] sm:$0xff] %v1249_v38  ;;  %v1318_v27 = vadd.f32 %v1317_v20, %v1032_v23 }
 0x228   : > { %v1319_v59 = vpop.f32.mrf.mxu1 }
 0x229   : > { %1328 = vst [vmem:[%s285_s25 + $0x30] sm:$0xff] %v1318_v27  ;;  %v1320_v30 = vadd.f32 %v1319_v59, %v1032_v23 }
 0x22b   : > { %1329 = vst [vmem:[%s285_s25 + $0x38] sm:$0xff] %v1320_v30 }
 0x22c PF: > { %s17_s21 = sadd.s32 1, %s1544_s21  }
 0x22d   : > { %p14_p1 = scmp.ge.s32.totalorder %s17_s21, 4  }
 0x22f   :  { %16 = sbr.rel (!%p14_p1) target bundleno = 1 (0x1), region = 90 }
 0x234   :  { %1351 = vsyncpa [#allocation4], 1 }
 0x235   :  { %1353 = vsyncpa [#allocation4 + $0x1], 1 }

// kernel: bifpn3_forward.14
= control target key start
LH: loop header
LB: loop body
LE: loop exit
PB: predicated region body
PF: predicated region fallthrough
CT: control target
= control target key end

     0   :  { %s731_s21 = smov 0   ;;  %s807_s0 = inlined_call_operand.vmem [shape: f32[2,8,256], index: 0, kind: input, shape index: {}]   ;;  %s808_s1 = inlined_call_operand.vmem [shape: f32[2,8,256], index: 1, kind: input, shape index: {}]   ;;  %s809_s2 = inlined_call_operand.vmem [shape: f32[2,8,256], index: 2, kind: input, shape index: {}]   ;;  %s810_s3 = inlined_call_operand.vmem [shape: f32[2,8,256], index: 3, kind: input, shape index: {}]   ;;  %s811_s4 = inlined_call_operand.vmem [shape: f32[16,8], index: 4, kind: input, shape index: {}]   ;;  %s812_s5 = inlined_call_operand.vmem [shape: f32[16,1], index: 5, kind: input, shape index: {}]   ;;  %s813_s6 = inlined_call_operand.vmem [shape: f32[2,16,256], index: 6, kind: output, shape index: {}]  }
   0x1 LB: > { %s635_s22 = sadd.s32 4294967295, %s689_s21   ;;  %p639_p0 = scmp.ge.s32.totalorder %s689_s21, 1  ;;  %s689_s21 = sphi %s731_s21, %s16_s21  }
   0x2   : > { %p242_p1 = scmp.lt.s32.totalorder %s689_s21, 3 }
   0x4   : > { %p243_p2 = pnand %p639_p0, %p242_p1 }
   0x5   : > { %p287_p3 = scmp.lt.s32.totalorder (!%p243_p2), %s635_s22, 1  ;;  %s692_s23 = smov (!%p243_p2), 127  }
   0x6   : > { %246 = sbr.rel (%p243_p2) target bundleno = 360 (0x168), region = 44  ;;  %s693_s28 = smov (!%p243_p2), 112  }
   0x7   : > { %s694_s29 = smov (!%p243_p2), 111  }
   0xb   : > { %v691_v0 = vmov 0.0   ;;  %s815_s22 = smov (!%p287_p3, %s635_s22), 1  ;;  %v695_v7 = vmov 0   ;;  %v444_v8 = vld [vmem:[%s812_s5] sm:$0xff]  ;;  %v445_v9 = vld [vmem:[%s812_s5 + $0x8] sm:$0xff]  ;;  %v312_v10 = vlaneseq  ;;  %vm456_vm5 = vcmask 64512  }
   0xc   : > { %359 = vrot.lane.b32.xlu0 %v691_v0, %s692_s23  ;;  %527 = vmatprep.mubr.f32.mxu0 %v691_v0  ;;  %s743_s24 = sshll.u32 %s815_s22, 4  ;;  %s660_s25 = sshll.u32 %s815_s22, 5 }
   0xd   : > { %533 = vmatprep.mubr.f32.mxu1 %v691_v0  ;;  %s291_s27 = scalar_lea.vmem %s807_s0, %s743_s24  ;;  %s296_s8 = scalar_lea.vmem %s808_s1, %s743_s24  ;;  %682 = vset.pattern.permute.xlu1 %v695_v7  ;;  %v313_v11 = vand.u32 127, %v312_v10 }
   0xe   : > { %v349_v1 = vld [vmem:[%s291_s27 + $0x8] sm:$0xff]  ;;  %v749_v2 = vld [vmem:[%s291_s27] sm:$0xff]  ;;  %s301_s11 = scalar_lea.vmem %s809_s2, %s743_s24  ;;  %681 = vset.pattern.permute.xlu0 %v695_v7  ;;  %s306_s18 = scalar_lea.vmem %s810_s3, %s743_s24 }
   0xf   : > { %355 = vrot.lane.b32.xlu1 %v749_v2, %s692_s23  ;;  %v395_v3 = vld [vmem:[%s296_s8] sm:$0xff]  ;;  %v396_v4 = vld [vmem:[%s296_s8 + $0x8] sm:$0xff]  ;;  %v314_v12 = vadd.s32 128, %v313_v11  ;;  %vm361_vm1 = vcmp.lt.s32.totalorder %v313_v11, 127  ;;  %v319_v15 = vand.u32 15, %v313_v11  ;;  %vm374_vm3 = vcmp.lt.s32.totalorder %v313_v11, 112 }
  0x10   : > { %357 = vrot.lane.b32.xlu0 %v349_v1, %s692_s23  ;;  %v764_v5 = vld [vmem:[%s301_s11 + $0x8] sm:$0xff]  ;;  %v769_v6 = vld [vmem:[%s301_s11] sm:$0xff]  ;;  %vm385_vm4 = vcmp.lt.s32.totalorder %v313_v11, 111 }
  0x11   : > { %v326_v14 = vand.u32 15, %v314_v12  ;;  %vm339_vm2 = vcmp.ne.s32.totalorder %v319_v15, 15  ;;  %v439_v57 = vld [vmem:[%s306_s18 + $0x8] sm:$0xff] }
  0x12   : > { %v650_v23 = vsel %vm339_vm2, 1.0, %v691_v0 }
  0x13   : > { %370 = vrot.lane.b32.xlu1 %v349_v1, %s693_s28  ;;  %vm340_vm0 = vcmp.ne.s32.totalorder %v326_v14, 15 }
  0x14   : > { %677 = vrot.lane.b32.xlu0 %v691_v0, %s693_s28  ;;  %v651_v18 = vsel %vm340_vm0, 1.0, %v691_v0 }
  0x17   : > { %381 = vrot.lane.b32.xlu1 %v349_v1, %s694_s29 }
  0x18   : > { %383 = vrot.lane.b32.xlu0 %v691_v0, %s694_s29 }
  0x1b   : > { %368 = vrot.lane.b32.xlu1 %v749_v2, %s693_s28 }
  0x1c   : > { %379 = vrot.lane.b32.xlu0 %v749_v2, %s694_s29 }
  0x1f   : > { %406 = vrot.lane.b32.xlu1 %v396_v4, %s693_s28 }
  0x20   : > { %404 = vrot.lane.b32.xlu0 %v395_v3, %s693_s28  ;;  %s311_s28 = scalar_lea.vmem %s813_s6, %s660_s25 }
  0x23   : > { %428 = vrot.lane.b32.xlu1 %v764_v5, %s692_s23 }
  0x24   : > { %430 = vrot.lane.b32.xlu0 %v691_v0, %s692_s23  ;;  %v438_v0 = vld [vmem:[%s306_s18] sm:$0xff] }
  0x27   : > { %426 = vrot.lane.b32.xlu1 %v769_v6, %s692_s23 }
  0x28   : > { %448 = vperm.xlu0 %681, %v444_v8  }
  0x2b   : > { %453 = vperm.xlu1 %682, %v445_v9  }
  0x7e   : > { %v360_v13 = vpop.permute.xlu0 %359 }
  0x81   : > { %v356_v17 = vpop.permute.xlu1 %355 }
  0x82   : > { %v358_v16 = vpop.permute.xlu0 %357 }
  0x83   : > { %v362_v19 = vsel %vm361_vm1, %v358_v16, %v360_v13  ;;  %v363_v24 = vsel %vm361_vm1, %v356_v17, %v358_v16 }
  0x84   : > { %v365_v20 = vmul.f32 %v651_v18, %v362_v19  ;;  %v364_v27 = vmul.f32 %v650_v23, %v363_v24 }
  0x85   : > { %v371_v22 = vpop.permute.xlu1 %370 }
  0x86   : > { %v678_v21 = vpop.permute.xlu0 %677  ;;  %v367_v28 = vmax.f32 %v349_v1, %v365_v20  ;;  %v366_v36 = vmax.f32 %v749_v2, %v364_v27 }
  0x87   : > { %v679_v25 = vunpack.i.l.bf16 %v678_v21  ;;  %v680_v42 = vunpack.i.h.bf16 %v678_v21 }
  0x89   : > { %v375_v26 = vsel %vm374_vm3, %v371_v22, %v679_v25  ;;  %v382_v30 = vpop.permute.xlu1 %381 }
  0x8a   : > { %v384_v29 = vpop.permute.xlu0 %383  ;;  %v378_v32 = vmax.f32 %v367_v28, %v375_v26 }
  0x8b   : > { %v386_v31 = vsel %vm385_vm4, %v382_v30, %v384_v29 }
  0x8c   : > { %v389_v33 = vmul.f32 %v651_v18, %v386_v31 }
  0x8d   : > { %v369_v37 = vpop.permute.xlu1 %368 }
  0x8e   : > { %v391_v34 = vmax.f32 %v378_v32, %v389_v33  ;;  %v380_v35 = vpop.permute.xlu0 %379  ;;  %v376_v39 = vsel %vm374_vm3, %v369_v37, %v371_v22 }
  0x8f   : > { %v387_v38 = vsel %vm385_vm4, %v380_v35, %v382_v30  ;;  %v377_v41 = vmax.f32 %v366_v36, %v376_v39 }
  0x90   : > { %v388_v40 = vmul.f32 %v650_v23, %v387_v38  ;;  %v403_v45 = vmax.f32 %v391_v34, %v396_v4  ;;  %v443_v4 = vld [vmem:[%s811_s4 + $0x8] sm:$0xff] }
  0x91   : > { %v407_v46 = vpop.permute.xlu1 %406 }
  0x92   : > { %v390_v43 = vmax.f32 %v377_v41, %v388_v40  ;;  %v405_v44 = vpop.permute.xlu0 %404  ;;  %v410_v47 = vsel %vm374_vm3, %v407_v46, %v680_v42 }
  0x93   : > { %v413_v49 = vmax.f32 %v403_v45, %v410_v47  ;;  %v411_v52 = vsel %vm374_vm3, %v405_v44, %v407_v46 }
  0x94   : > { %v402_v48 = vmax.f32 %v390_v43, %v395_v3  ;;  %v442_v3 = vld [vmem:[%s811_s4] sm:$0xff] }
  0x95   : > { %v429_v51 = vpop.permute.xlu1 %428  ;;  %v425_v55 = vmax.f32 %v413_v49, %v764_v5 }
  0x96   : > { %v431_v50 = vpop.permute.xlu0 %430  ;;  %v412_v54 = vmax.f32 %v402_v48, %v411_v52 }
  0x97   : > { %v432_v53 = vsel %vm361_vm1, %v429_v51, %v431_v50 }
  0x98   : > { %v435_v56 = vmul.f32 %v651_v18, %v432_v53  ;;  %v424_v61 = vmax.f32 %v412_v54, %v769_v6 }
  0x99   : > { %v427_v58 = vpop.permute.xlu1 %426 }
  0x9a   : > { %v437_v59 = vmax.f32 %v425_v55, %v435_v56  ;;  %v433_v60 = vsel %vm361_vm1, %v427_v58, %v429_v51 }
  0x9b   : > { %v434_v62 = vmul.f32 %v650_v23, %v433_v60 }
  0x9c   : > { %v441_v63 = vmax.f32 %v437_v59, %v439_v57 }
  0x9d   : > { %v436_v1 = vmax.f32 %v424_v61, %v434_v62 }
  0x9e   : > { %493 = vmatprep.subr.mxu0 %v441_v63  ;;  %661 = vmatprep.subr.mxu1 %v441_v63 }
  0x9f   : > { %v440_v2 = vmax.f32 %v436_v1, %v438_v0 }
  0xa1   : > { %494 = vmatpush1.msra.mxu0 %v440_v2  ;;  %662 = vmatpush1.msra.mxu1 %v440_v2 }
  0xa2   : > { %652 = vmatmul.mubr.msk.f32.vlgmr.msra.gmra.mxu0 %vm456_vm5, %v442_v3  ;;  %653 = vmatmul.mubr.msk.f32.vlgmr.msra.gmra.mxu1 %vm456_vm5, %v443_v4 }
  0xa3   : > { %v449_v5 = vpop.permute.xlu0 %448 }
  0xa6   : > { %v454_v6 = vpop.permute.xlu1 %453 }
 0x162   : > { %v529_v7 = vpop.f32.mrf.mxu0  ;;  %v535_v8 = vpop.f32.mrf.mxu1 }
 0x163   : > { %v530_v9 = vadd.f32 %v529_v7, %v449_v5  ;;  %v536_v10 = vadd.f32 %v535_v8, %v454_v6 }
 0x164   : > { %v531_v11 = vpop.f32.mrf.mxu0  ;;  %v537_v12 = vpop.f32.mrf.mxu1 }
 0x165   : > { %540 = vst [vmem:[%s311_s28] sm:$0xff] %v530_v9  ;;  %542 = vst [vmem:[%s311_s28 + $0x10] sm:$0xff] %v536_v10  ;;  %v532_v13 = vadd.f32 %v531_v11, %v449_v5  ;;  %v538_v14 = vadd.f32 %v537_v12, %v454_v6 }
 0x167   : > { %541 = vst [vmem:[%s311_s28 + $0x8] sm:$0xff] %v532_v13  ;;  %543 = vst [vmem:[%s311_s28 + $0x18] sm:$0xff] %v538_v14 }
 0x168 PF: > { %s16_s21 = sadd.s32 1, %s689_s21  }
 0x169   : > { %p13_p4 = scmp.ge.s32.totalorder %s16_s21, 4  }
 0x16b   :  { %15 = sbr.rel (!%p13_p4) target bundleno = 1 (0x1), region = 83 }

// kernel: bifpn3_forward.15
= control target key start
LH: loop header
LB: loop body
LE: loop exit
PB: predicated region body
PF: predicated region fallthrough
CT: control target
= control target key end

     0   :  { %12 = vsyncpa [#allocation4], 0  ;;  %s1205_s24 = smov 0   ;;  %s1535_s0 = inlined_call_operand.vmem [shape: f32[3], index: 0, kind: input, shape index: {}]   ;;  %s1536_s1 = inlined_call_operand.vmem [shape: f32[2,16,256], index: 1, kind: input, shape index: {}]   ;;  %s1537_s2 = inlined_call_operand.vmem [shape: f32[2,16,256], index: 2, kind: input, shape index: {}]   ;;  %s1538_s3 = inlined_call_operand.vmem [shape: f32[2,16,256], index: 3, kind: input, shape index: {}]   ;;  %s1539_s4 = inlined_call_operand.vmem [shape: f32[9,16,1], index: 4, kind: input, shape index: {}]   ;;  %s1540_s5 = inlined_call_operand.vmem [shape: f32[16,16], index: 5, kind: input, shape index: {}]   ;;  %s1541_s6 = inlined_call_operand.vmem [shape: f32[16,1], index: 6, kind: input, shape index: {}]   ;;  %s1542_s7 = inlined_call_operand.vmem [shape: f32[2,16,256], index: 7, kind: output, shape index: {}]  }
   0x1 LB: > { %s1211_s25 = sadd.s32 4294967295, %s1152_s24   ;;  %p993_p0 = scmp.ge.s32.totalorder %s1152_s24, 1  ;;  %s1152_s24 = sphi %s1205_s24, %s18_s24  }
   0x2   : > { %p211_p1 = scmp.lt.s32.totalorder %s1152_s24, 3  ;;  %s224_s28 = sshll.u32 %s1535_s0, 4  ;;  %s225_s28 = int_to_ptr.vmem [resolvable:$true] %s224_s28 }
   0x3   : > { %p1048_p3 = scmp.eq.s32.totalorder %s1211_s25, 0  ;;  %s1127_s30 = scalar_lea.vmem %s225_s28, 16 }
   0x4   : > { %p1218_p2 = pnand %p993_p0, %p211_p1  ;;  %p1128_p6 = scmp.ne.s32.totalorder %s225_s28, %s1127_s30 }
   0x5   : > { %p1135_p10 = scmp.lt.s32.totalorder %s225_s28, %s225_s28  ;;  %p1136_p11 = scmp.lt.s32.totalorder %s1127_s30, %s1127_s30 }
   0x6   : > { %p1044_p4 = pneg %p1218_p2 }
   0x7   : > { %p1137_p12 = por %p1136_p11, %p1135_p10 }
   0x8   : > { %p1045_p5 = pnand %p1048_p3, %p1044_p4 }
   0xa   : > { %p1129_p7 = pneg %p1045_p5 }
   0xc   : > { %p1130_p8 = pnand %p1129_p7, %p1128_p6 }
   0xe   : > { %p1131_p9 = pneg %p1130_p8 }
  0x10   : > { %p1138_p13 = pnand %p1137_p12, %p1131_p9 }
  0x12   : > { %1141 = shalt.err (!%p1138_p13)
}
  0x13   : > { %s1154_s8 = smov [#allocation3]   ;;  %270 = sbr.rel (%p1218_p2) target bundleno = 499 (0x1f3), region = 48 }
  0x14   : > { %1047 = dma.vmem_to_smem (!%p1045_p5), %s225_s28, 16, %s1154_s8, [#allocation4]  }
  0x18   : > { %1147 = dma.done.wait (%p1048_p3), [#allocation4], 16  }
  0x19   : > { %1149 = vsyncadd (%p1048_p3), [#allocation4], 4294967280 }
  0x1a   : > { %276 = sfence }
  0x1b   : > { %v472_v0 = vld [vmem:[%s1539_s4 + $0x8] sm:$0xff]  ;;  %v1012_v1 = vld [vmem:[%s1539_s4 + $0x10] sm:$0xff]  ;;  %v1155_v2 = vmov 0   ;;  %p313_p0 = scmp.lt.s32.totalorder %s1211_s25, 1  ;;  %s337_s13 = sld [smem:[#allocation3]]  ;;  %v1013_v3 = vld [vmem:[%s1539_s4 + $0x18] sm:$0xff] }
  0x1c   : > { %1069 = vset.pattern.permute.xlu0 %v1155_v2  ;;  %1070 = vset.pattern.permute.xlu1 %v1155_v2  ;;  %s1006_s16 = sld [smem:[#allocation3 + $0x1]]  ;;  %v1156_v4 = vmov 0.0   ;;  %s1157_s18 = smov 17   ;;  %v471_v5 = vld [vmem:[%s1539_s4] sm:$0xff]  ;;  %v1017_v6 = vld [vmem:[%s1539_s4 + $0x38] sm:$0xff]  ;;  %v1015_v11 = vld [vmem:[%s1539_s4 + $0x28] sm:$0xff] }
  0x1d   : > { %480 = vperm.xlu0 %1069, %v472_v0   ;;  %513 = vperm.xlu1 %1070, %v1012_v1   ;;  %s1545_s25 = smov (!%p313_p0, %s1211_s25), 1  ;;  %s1007_s17 = sld [smem:[#allocation3 + $0x2]]  ;;  %v1014_v40 = vld [vmem:[%s1539_s4 + $0x20] sm:$0xff]  ;;  %v1019_v41 = vld [vmem:[%s1539_s4 + $0x48] sm:$0xff]  ;;  %v1016_v53 = vld [vmem:[%s1539_s4 + $0x30] sm:$0xff]  ;;  %vm812_vm12 = vcmask 130048  }
  0x1e   : > { %883 = vmatprep.mubr.f32.mxu0 %v1156_v4  ;;  %889 = vmatprep.mubr.f32.mxu1 %v1156_v4  ;;  %s1248_s19 = sshll.u32 %s1545_s25, 5  ;;  %s1159_s20 = smov 16  }
  0x1f   : > { %s317_s28 = scalar_lea.vmem %s1536_s1, %s1248_s19  ;;  %s322_s25 = scalar_lea.vmem %s1537_s2, %s1248_s19 }
  0x20   : > { %s327_s10 = scalar_lea.vmem %s1538_s3, %s1248_s19  ;;  %v335_v7 = vld [vmem:[%s317_s28 + $0x10] sm:$0xff]  ;;  %v333_v10 = vld [vmem:[%s317_s28] sm:$0xff]  ;;  %v336_v20 = vld [vmem:[%s317_s28 + $0x18] sm:$0xff]  ;;  %s1160_s23 = smov 1  }
  0x21   : > { %518 = vperm.xlu0 %1069, %v1013_v3   ;;  %1072 = vrot.lane.b32.xlu1 %v1156_v4, %s1157_s18  ;;  %v338_v8 = vstv %s337_s13  ;;  %v345_v9 = vld [vmem:[%s322_s25 + $0x10] sm:$0xff]  ;;  %v343_v16 = vld [vmem:[%s322_s25] sm:$0xff]  ;;  %s1158_s13 = smov 15   ;;  %s1161_s29 = smov 127  }
  0x22   : > { %v341_v12 = vmul.f32 %v338_v8, %v335_v7  ;;  %v348_v13 = vstv %s1006_s16  ;;  %v359_v14 = vld [vmem:[%s327_s10 + $0x10] sm:$0xff]  ;;  %v339_v15 = vmul.f32 %v338_v8, %v333_v10  ;;  %v357_v17 = vld [vmem:[%s327_s10] sm:$0xff]  ;;  %v346_v21 = vld [vmem:[%s322_s25 + $0x18] sm:$0xff]  ;;  %v342_v24 = vmul.f32 %v338_v8, %v336_v20  ;;  %s1163_s21 = smov 112   ;;  %s1164_s22 = smov 111  }
  0x23   : > { %v351_v18 = vmul.f32 %v348_v13, %v345_v9  ;;  %v349_v19 = vmul.f32 %v348_v13, %v343_v16  ;;  %v360_v22 = vld [vmem:[%s327_s10 + $0x18] sm:$0xff]  ;;  %v362_v23 = vstv %s1007_s17  ;;  %v352_v25 = vmul.f32 %v348_v13, %v346_v21  ;;  %v334_v26 = vld [vmem:[%s317_s28 + $0x8] sm:$0xff]  ;;  %v1020_v10 = vld [vmem:[%s1539_s4 + $0x50] sm:$0xff]  ;;  %s332_s12 = scalar_lea.vmem %s1542_s7, %s1248_s19 }
  0x24   : > { %v344_v27 = vld [vmem:[%s322_s25 + $0x8] sm:$0xff]  ;;  %v365_v30 = vmul.f32 %v362_v23, %v359_v14  ;;  %v363_v32 = vmul.f32 %v362_v23, %v357_v17  ;;  %v366_v34 = vmul.f32 %v362_v23, %v360_v22  ;;  %v340_v35 = vmul.f32 %v338_v8, %v334_v26  ;;  %v1021_v7 = vld [vmem:[%s1539_s4 + $0x58] sm:$0xff]  ;;  %v1018_v8 = vld [vmem:[%s1539_s4 + $0x40] sm:$0xff] }
  0x25   : > { %475 = vperm.xlu0 %1069, %v471_v5   ;;  %602 = vperm.xlu1 %1070, %v1017_v6   ;;  %v358_v28 = vld [vmem:[%s327_s10 + $0x8] sm:$0xff]  ;;  %v355_v29 = vadd.f32 %v351_v18, %v341_v12  ;;  %v353_v31 = vadd.f32 %v349_v19, %v339_v15  ;;  %v356_v33 = vadd.f32 %v352_v25, %v342_v24  ;;  %s1162_s10 = smov 113   ;;  %v1022_v12 = vld [vmem:[%s1539_s4 + $0x60] sm:$0xff]  ;;  %v411_v25 = vlaneseq }
  0x26   : > { %v350_v36 = vmul.f32 %v348_v13, %v344_v27  ;;  %v364_v39 = vmul.f32 %v362_v23, %v358_v28  ;;  %v1023_v9 = vld [vmem:[%s1539_s4 + $0x68] sm:$0xff]  ;;  %v1024_v13 = vld [vmem:[%s1539_s4 + $0x70] sm:$0xff]  ;;  %v1026_v16 = vld [vmem:[%s1539_s4 + $0x80] sm:$0xff] }
  0x27   : > { %v369_v37 = vadd.f32 %v365_v30, %v355_v29  ;;  %v367_v38 = vadd.f32 %v363_v32, %v353_v31  ;;  %v370_v42 = vadd.f32 %v366_v34, %v356_v33  ;;  %v1027_v14 = vld [vmem:[%s1539_s4 + $0x88] sm:$0xff]  ;;  %v800_v19 = vld [vmem:[%s1541_s6] sm:$0xff]  ;;  %v1384_v27 = vand.u32 127, %v411_v25 }
  0x28   : > { %v354_v43 = vadd.f32 %v350_v36, %v340_v35  ;;  %v801_v23 = vld [vmem:[%s1541_s6 + $0x8] sm:$0xff] }
  0x29   : > { %560 = vperm.xlu0 %1069, %v1015_v11   ;;  %1082 = vrot.lane.b32.xlu1 %v1156_v4, %s1158_s13  ;;  %v373_v44 = vsub.f32 0.0, %v369_v37  ;;  %v371_v45 = vsub.f32 0.0, %v367_v38  ;;  %v374_v46 = vsub.f32 0.0, %v370_v42  ;;  %v1025_v11 = vld [vmem:[%s1539_s4 + $0x78] sm:$0xff]  ;;  %v418_v30 = vand.u32 15, %v1384_v27 }
  0x2a   : > { %v368_v47 = vadd.f32 %v364_v39, %v354_v43  ;;  %v413_v31 = vadd.s32 128, %v1384_v27  ;;  %vm462_vm1 = vcmp.lt.s32.totalorder %v1384_v27, 17  ;;  %vm503_vm3 = vcmp.lt.s32.totalorder %v1384_v27, 16 }
  0x2b   : > { %v379_v48 = vmul.f32 1.442695, %v373_v44  ;;  %v375_v49 = vmul.f32 1.442695, %v371_v45  ;;  %v381_v50 = vmul.f32 1.442695, %v374_v46 }
  0x2c   : > { %v372_v51 = vsub.f32 0.0, %v368_v47  ;;  %vm438_vm0 = vcmp.ne.s32.totalorder %v418_v30, 0  ;;  %v425_v33 = vand.u32 15, %v413_v31  ;;  %vm444_vm4 = vcmp.ne.s32.totalorder %v418_v30, 15 }
  0x2d   : > { %555 = vperm.xlu0 %1069, %v1014_v40   ;;  %623 = vperm.xlu1 %1070, %v1019_v41   ;;  %1111 = vpow2.f32 %v379_v48  ;;  %v1396_v36 = vsel %vm438_vm0, 1.0, %v1156_v4  ;;  %vm541_vm5 = vcmp.lt.s32.totalorder %v1384_v27, 15  ;;  %vm583_vm7 = vcmp.lt.s32.totalorder %v1384_v27, 1 }
  0x2e   : > { %1113 = vpow2.f32 %v375_v49  ;;  %v377_v52 = vmul.f32 1.442695, %v372_v51  ;;  %vm439_vm2 = vcmp.ne.s32.totalorder %v425_v33, 0  ;;  %vm445_vm6 = vcmp.ne.s32.totalorder %v425_v33, 15 }
  0x2f   : > { %1115 = vpow2.f32 %v381_v50  ;;  %v1405_v44 = vsel %vm439_vm2, 1.0, %v1156_v4  ;;  %vm646_vm8 = vcmp.lt.s32.totalorder %v1384_v27, 127  ;;  %vm688_vm9 = vcmp.lt.s32.totalorder %v1384_v27, 113 }
  0x30   : > { %1117 = vpow2.f32 %v377_v52  ;;  %vm730_vm10 = vcmp.lt.s32.totalorder %v1384_v27, 112  ;;  %vm768_vm11 = vcmp.lt.s32.totalorder %v1384_v27, 111 }
  0x31   : > { %1077 = vrot.lane.b32.xlu0 %v1156_v4, %s1159_s20 }
  0x35   : > { %597 = vperm.xlu0 %1069, %v1016_v53  }
  0x3a   : > { %v1112_v54 = vpop.eup %1111 }
  0x3b   : > { %v1114_v55 = vpop.eup %1113  ;;  %v385_v56 = vadd.f32 1.0, %v1112_v54 }
  0x3c   : > { %v1116_v57 = vpop.eup %1115  ;;  %v383_v58 = vadd.f32 1.0, %v1114_v55 }
  0x3d   : > { %v1118_v59 = vpop.eup %1117  ;;  %1119 = vrcp.f32 %v385_v56  ;;  %v386_v60 = vadd.f32 1.0, %v1116_v57  ;;  %v1417_v57 = vsel %vm444_vm4, 1.0, %v1156_v4 }
  0x3e   : > { %1121 = vrcp.f32 %v383_v58  ;;  %v384_v61 = vadd.f32 1.0, %v1118_v59 }
  0x3f   : > { %1123 = vrcp.f32 %v386_v60 }
  0x40   : > { %1125 = vrcp.f32 %v384_v61 }
  0x4a   : > { %v1120_v62 = vpop.eup %1119 }
  0x4b   : > { %v1122_v63 = vpop.eup %1121  ;;  %v1284_v0 = vmul.f32 %v1120_v62, %v369_v37 }
  0x4c   : > { %v1124_v1 = vpop.eup %1123  ;;  %v1286_v2 = vmul.f32 %v1122_v63, %v367_v38 }
  0x4d   : > { %452 = vrot.lane.b32.xlu1 %v1284_v0, %s1157_s18  ;;  %v1290_v3 = vmul.f32 %v1124_v1, %v370_v42  ;;  %v1126_v5 = vpop.eup %1125 }
  0x4e   : > { %450 = vrot.lane.b32.xlu0 %v1286_v2, %s1157_s18  ;;  %v1296_v6 = vmul.f32 %v1126_v5, %v368_v47 }
  0x51   : > { %456 = vrot.lane.b32.xlu1 %v1290_v3, %s1157_s18 }
  0x52   : > { %493 = vrot.lane.b32.xlu0 %v1284_v0, %s1159_s20 }
  0x55   : > { %454 = vrot.lane.b32.xlu1 %v1296_v6, %s1157_s18 }
  0x56   : > { %531 = vrot.lane.b32.xlu0 %v1284_v0, %s1158_s13 }
  0x59   : > { %497 = vrot.lane.b32.xlu1 %v1290_v3, %s1159_s20 }
  0x5a   : > { %491 = vrot.lane.b32.xlu0 %v1286_v2, %s1159_s20 }
  0x5d   : > { %535 = vrot.lane.b32.xlu1 %v1290_v3, %s1158_s13 }
  0x5e   : > { %529 = vrot.lane.b32.xlu0 %v1286_v2, %s1158_s13 }
  0x61   : > { %495 = vrot.lane.b32.xlu1 %v1296_v6, %s1159_s20 }
  0x62   : > { %573 = vrot.lane.b32.xlu0 %v1284_v0, %s1160_s23 }
  0x65   : > { %533 = vrot.lane.b32.xlu1 %v1296_v6, %s1158_s13 }
  0x66   : > { %1087 = vrot.lane.b32.xlu0 %v1156_v4, %s1160_s23 }
  0x69   : > { %577 = vrot.lane.b32.xlu1 %v1290_v3, %s1160_s23 }
  0x6a   : > { %575 = vrot.lane.b32.xlu0 %v1296_v6, %s1160_s23 }
  0x6d   : > { %571 = vrot.lane.b32.xlu1 %v1286_v2, %s1160_s23 }
  0x6e   : > { %665 = vperm.xlu0 %1069, %v1021_v7  }
  0x71   : > { %618 = vperm.xlu1 %1070, %v1018_v8  }
  0x72   : > { %1092 = vrot.lane.b32.xlu0 %v1156_v4, %s1161_s29 }
  0x75   : > { %640 = vrot.lane.b32.xlu1 %v1290_v3, %s1161_s29 }
  0x76   : > { %707 = vperm.xlu0 %1069, %v1023_v9  }
  0x79   : > { %660 = vperm.xlu1 %1070, %v1020_v10  }
  0x7a   : > { %638 = vrot.lane.b32.xlu0 %v1296_v6, %s1161_s29 }
  0x7d   : > { %636 = vrot.lane.b32.xlu1 %v1284_v0, %s1161_s29 }
  0x7e   : > { %1097 = vrot.lane.b32.xlu0 %v1156_v4, %s1162_s10 }
  0x81   : > { %682 = vrot.lane.b32.xlu1 %v1290_v3, %s1162_s10 }
  0x82   : > { %745 = vperm.xlu0 %1069, %v1025_v11  }
  0x85   : > { %702 = vperm.xlu1 %1070, %v1022_v12  }
  0x86   : > { %678 = vrot.lane.b32.xlu0 %v1284_v0, %s1162_s10 }
  0x89   : > { %634 = vrot.lane.b32.xlu1 %v1286_v2, %s1161_s29 }
  0x8a   : > { %740 = vperm.xlu0 %1069, %v1024_v13  }
  0x8d   : > { %680 = vrot.lane.b32.xlu1 %v1296_v6, %s1162_s10 }
  0x8e   : > { %676 = vrot.lane.b32.xlu0 %v1286_v2, %s1162_s10 }
  0x91   : > { %787 = vperm.xlu1 %1070, %v1027_v14  }
  0x92   : > { %1102 = vrot.lane.b32.xlu0 %v1156_v4, %s1163_s21 }
  0x95   : > { %724 = vrot.lane.b32.xlu1 %v1290_v3, %s1163_s21 }
  0x96   : > { %1107 = vrot.lane.b32.xlu0 %v1156_v4, %s1164_s22 }
  0x98   : > { %v481_v15 = vpop.permute.xlu0 %480  ;;  %v1368_v18 = vpop.permute.xlu1 %513 }
  0x99   : > { %762 = vrot.lane.b32.xlu1 %v1290_v3, %s1164_s22 }
  0x9a   : > { %720 = vrot.lane.b32.xlu0 %v1284_v0, %s1163_s21 }
  0x9c   : > { %v1364_v17 = vpop.permute.xlu0 %518  ;;  %v1073_v21 = vpop.permute.xlu1 %1072 }
  0x9d   : > { %782 = vperm.xlu1 %1070, %v1026_v16   ;;  %v1074_v35 = vunpack.i.l.bf16 %v1073_v21  ;;  %v1075_v37 = vunpack.i.h.bf16 %v1073_v21 }
  0x9e   : > { %722 = vrot.lane.b32.xlu0 %v1296_v6, %s1163_s21 }
  0xa0   : > { %v476_v20 = vpop.permute.xlu0 %475  ;;  %v1380_v24 = vpop.permute.xlu1 %602 }
  0xa1   : > { %758 = vrot.lane.b32.xlu1 %v1284_v0, %s1164_s22 }
  0xa2   : > { %718 = vrot.lane.b32.xlu0 %v1286_v2, %s1163_s21 }
  0xa4   : > { %v1375_v22 = vpop.permute.xlu0 %560  ;;  %v1386_v28 = vpop.permute.xlu1 %1082 }
  0xa5   : > { %760 = vrot.lane.b32.xlu1 %v1296_v6, %s1164_s22  ;;  %v1084_v54 = vunpack.i.l.bf16 %v1386_v28  ;;  %v1085_v16 = vunpack.i.h.bf16 %v1386_v28 }
  0xa6   : > { %804 = vperm.xlu0 %1069, %v800_v19  }
  0xa8   : > { %v1382_v26 = vpop.permute.xlu0 %555  ;;  %v1390_v32 = vpop.permute.xlu1 %623 }
  0xa9   : > { %756 = vrot.lane.b32.xlu1 %v1286_v2, %s1164_s22 }
  0xac   : > { %v1078_v29 = vpop.permute.xlu0 %1077 }
  0xad   : > { %809 = vperm.xlu1 %1070, %v801_v23   ;;  %v1079_v45 = vunpack.i.l.bf16 %v1078_v29  ;;  %v1080_v1 = vunpack.i.h.bf16 %v1078_v29 }
  0xb0   : > { %v1392_v34 = vpop.permute.xlu0 %597 }
  0xbf   : > { %v453_v38 = vpop.permute.xlu1 %452 }
  0xc0   : > { %v466_v39 = vsel %vm462_vm1, %v1074_v35, %v453_v38  ;;  %v451_v40 = vpop.permute.xlu0 %450 }
  0xc1   : > { %v469_v41 = vmul.f32 %v1396_v36, %v466_v39  ;;  %v465_v42 = vsel %vm462_vm1, %v1075_v37, %v451_v40 }
  0xc2   : > { %v467_v43 = vmul.f32 %v1396_v36, %v465_v42 }
  0xc3   : > { %v485_v46 = vmul.f32 %v481_v15, %v469_v41  ;;  %v457_v47 = vpop.permute.xlu1 %456 }
  0xc4   : > { %v483_v48 = vmul.f32 %v476_v20, %v467_v43  ;;  %v464_v49 = vsel %vm462_vm1, %v453_v38, %v457_v47  ;;  %v494_v50 = vpop.permute.xlu0 %493 }
  0xc5   : > { %v470_v51 = vmul.f32 %v1405_v44, %v464_v49  ;;  %v507_v52 = vsel %vm503_vm3, %v1079_v45, %v494_v50 }
  0xc6   : > { %v523_v53 = vmul.f32 %v1364_v17, %v507_v52 }
  0xc7   : > { %v486_v55 = vmul.f32 %v481_v15, %v470_v51  ;;  %v455_v56 = vpop.permute.xlu1 %454  ;;  %v1433_v15 = vsel %vm445_vm6, 1.0, %v1156_v4 }
  0xc8   : > { %v527_v58 = vadd.f32 %v523_v53, %v485_v46  ;;  %v463_v59 = vsel %vm462_vm1, %v451_v40, %v455_v56  ;;  %v532_v60 = vpop.permute.xlu0 %531 }
  0xc9   : > { %v468_v61 = vmul.f32 %v1405_v44, %v463_v59  ;;  %v545_v62 = vsel %vm541_vm5, %v1084_v54, %v532_v60 }
  0xca   : > { %v548_v63 = vmul.f32 %v1417_v57, %v545_v62 }
  0xcb   : > { %v484_v5 = vmul.f32 %v476_v20, %v468_v61  ;;  %v498_v7 = vpop.permute.xlu1 %497  ;;  %v629_v61 = vmul.f32 %v1390_v32, %v1290_v3 }
  0xcc   : > { %v565_v8 = vmul.f32 %v1375_v22, %v548_v63  ;;  %v505_v9 = vsel %vm503_vm3, %v494_v50, %v498_v7  ;;  %v492_v10 = vpop.permute.xlu0 %491 }
  0xcd   : > { %v524_v11 = vmul.f32 %v1364_v17, %v505_v9  ;;  %v506_v12 = vsel %vm503_vm3, %v1080_v1, %v492_v10 }
  0xce   : > { %v569_v13 = vadd.f32 %v565_v8, %v527_v58  ;;  %v521_v14 = vmul.f32 %v1368_v18, %v506_v12 }
  0xcf   : > { %v528_v19 = vadd.f32 %v524_v11, %v486_v55  ;;  %v536_v20 = vpop.permute.xlu1 %535 }
  0xd0   : > { %v525_v21 = vadd.f32 %v521_v14, %v483_v48  ;;  %v543_v23 = vsel %vm541_vm5, %v532_v60, %v536_v20  ;;  %v530_v25 = vpop.permute.xlu0 %529 }
  0xd1   : > { %v549_v17 = vmul.f32 %v1433_v15, %v543_v23  ;;  %v544_v29 = vsel %vm541_vm5, %v1085_v16, %v530_v25 }
  0xd2   : > { %v546_v30 = vmul.f32 %v1417_v57, %v544_v29 }
  0xd3   : > { %v566_v31 = vmul.f32 %v1375_v22, %v549_v17  ;;  %v496_v4 = vpop.permute.xlu1 %495 }
  0xd4   : > { %v563_v33 = vmul.f32 %v1382_v26, %v546_v30  ;;  %v504_v28 = vsel %vm503_vm3, %v492_v10, %v496_v4  ;;  %v574_v35 = vpop.permute.xlu0 %573 }
  0xd5   : > { %v570_v37 = vadd.f32 %v566_v31, %v528_v19  ;;  %v522_v38 = vmul.f32 %v1368_v18, %v504_v28 }
  0xd6   : > { %v567_v39 = vadd.f32 %v563_v33, %v525_v21 }
  0xd7   : > { %v526_v40 = vadd.f32 %v522_v38, %v484_v5  ;;  %v534_v41 = vpop.permute.xlu1 %533 }
  0xd8   : > { %v542_v42 = vsel %vm541_vm5, %v530_v25, %v534_v41  ;;  %v1088_v43 = vpop.permute.xlu0 %1087 }
  0xd9   : > { %v547_v22 = vmul.f32 %v1433_v15, %v542_v42  ;;  %v1089_v45 = vunpack.i.l.bf16 %v1088_v43  ;;  %v1090_v49 = vunpack.i.h.bf16 %v1088_v43 }
  0xdb   : > { %v564_v46 = vmul.f32 %v1382_v26, %v547_v22  ;;  %v578_v47 = vpop.permute.xlu1 %577  ;;  %v587_v48 = vsel %vm583_vm7, %v1089_v45, %v574_v35  ;;  %v628_v26 = vmul.f32 %v1390_v32, %v1284_v0 }
  0xdc   : > { %v585_v18 = vsel %vm583_vm7, %v574_v35, %v578_v47  ;;  %v590_v50 = vmul.f32 %v1396_v36, %v587_v48  ;;  %v576_v53 = vpop.permute.xlu0 %575 }
  0xdd   : > { %v568_v51 = vadd.f32 %v564_v46, %v526_v40  ;;  %v591_v52 = vmul.f32 %v1405_v44, %v585_v18 }
  0xde   : > { %v607_v54 = vmul.f32 %v1380_v24, %v590_v50 }
  0xdf   : > { %v608_v55 = vmul.f32 %v1380_v24, %v591_v52  ;;  %v572_v56 = vpop.permute.xlu1 %571 }
  0xe0   : > { %v586_v58 = vsel %vm583_vm7, %v1090_v49, %v572_v56  ;;  %v584_v59 = vsel %vm583_vm7, %v572_v56, %v576_v53  ;;  %v611_v60 = vadd.f32 %v607_v54, %v569_v13 }
  0xe1   : > { %v612_v62 = vadd.f32 %v608_v55, %v570_v37  ;;  %v588_v63 = vmul.f32 %v1396_v36, %v586_v58  ;;  %v589_v1 = vmul.f32 %v1405_v44, %v584_v59 }
  0xe2   : > { %v632_v24 = vadd.f32 %v628_v26, %v611_v60 }
  0xe3   : > { %v605_v5 = vmul.f32 %v1392_v34, %v588_v63  ;;  %v606_v0 = vmul.f32 %v1392_v34, %v589_v1  ;;  %v633_v7 = vadd.f32 %v629_v61, %v612_v62 }
  0xe5   : > { %v609_v8 = vadd.f32 %v605_v5, %v567_v39  ;;  %v610_v9 = vadd.f32 %v606_v0, %v568_v51 }
  0xe9   : > { %v666_v10 = vpop.permute.xlu0 %665 }
  0xec   : > { %v619_v11 = vpop.permute.xlu1 %618 }
  0xed   : > { %v1093_v12 = vpop.permute.xlu0 %1092  ;;  %v627_v34 = vmul.f32 %v619_v11, %v1296_v6  ;;  %v626_v18 = vmul.f32 %v619_v11, %v1286_v2 }
  0xee   : > { %v1094_v13 = vunpack.i.l.bf16 %v1093_v12  ;;  %v1095_v19 = vunpack.i.h.bf16 %v1093_v12 }
  0xef   : > { %v631_v31 = vadd.f32 %v627_v34, %v610_v9  ;;  %v630_v26 = vadd.f32 %v626_v18, %v609_v8 }
  0xf0   : > { %v641_v3 = vpop.permute.xlu1 %640 }
  0xf1   : > { %v648_v32 = vsel %vm646_vm8, %v641_v3, %v1094_v13  ;;  %v708_v14 = vpop.permute.xlu0 %707 }
  0xf2   : > { %v654_v16 = vmul.f32 %v1433_v15, %v648_v32 }
  0xf4   : > { %v671_v20 = vmul.f32 %v666_v10, %v654_v16  ;;  %v661_v21 = vpop.permute.xlu1 %660 }
  0xf5   : > { %v639_v23 = vpop.permute.xlu0 %638 }
  0xf6   : > { %v675_v25 = vadd.f32 %v671_v20, %v633_v7  ;;  %v647_v17 = vsel %vm646_vm8, %v639_v23, %v1095_v19 }
  0xf7   : > { %v652_v29 = vmul.f32 %v1433_v15, %v647_v17 }
  0xf8   : > { %v637_v30 = vpop.permute.xlu1 %636 }
  0xf9   : > { %v669_v4 = vmul.f32 %v661_v21, %v652_v29  ;;  %v650_v33 = vsel %vm646_vm8, %v637_v30, %v641_v3  ;;  %v1098_v28 = vpop.permute.xlu0 %1097 }
  0xfa   : > { %v653_v35 = vmul.f32 %v1417_v57, %v650_v33  ;;  %v1099_v6 = vunpack.i.l.bf16 %v1098_v28  ;;  %v1100_v55 = vunpack.i.h.bf16 %v1098_v28 }
  0xfb   : > { %v673_v37 = vadd.f32 %v669_v4, %v631_v31 }
  0xfc   : > { %v670_v38 = vmul.f32 %v666_v10, %v653_v35  ;;  %v683_v39 = vpop.permute.xlu1 %682 }
  0xfd   : > { %v690_v40 = vsel %vm688_vm9, %v683_v39, %v1099_v6  ;;  %v746_v41 = vpop.permute.xlu0 %745 }
  0xfe   : > { %v674_v42 = vadd.f32 %v670_v38, %v632_v24  ;;  %v696_v43 = vmul.f32 %v1405_v44, %v690_v40 }
 0x100   : > { %v713_v22 = vmul.f32 %v708_v14, %v696_v43  ;;  %v703_v45 = vpop.permute.xlu1 %702 }
 0x101   : > { %v679_v46 = vpop.permute.xlu0 %678 }
 0x102   : > { %v692_v47 = vsel %vm688_vm9, %v679_v46, %v683_v39  ;;  %v717_v48 = vadd.f32 %v713_v22, %v675_v25 }
 0x103   : > { %v695_v49 = vmul.f32 %v1396_v36, %v692_v47 }
 0x104   : > { %v635_v50 = vpop.permute.xlu1 %634 }
 0x105   : > { %v712_v51 = vmul.f32 %v708_v14, %v695_v49  ;;  %v649_v52 = vsel %vm646_vm8, %v635_v50, %v639_v23  ;;  %v741_v53 = vpop.permute.xlu0 %740 }
 0x106   : > { %v651_v54 = vmul.f32 %v1417_v57, %v649_v52 }
 0x107   : > { %v716_v56 = vadd.f32 %v712_v51, %v674_v42 }
 0x108   : > { %v668_v58 = vmul.f32 %v661_v21, %v651_v54  ;;  %v681_v59 = vpop.permute.xlu1 %680 }
 0x109   : > { %v689_v60 = vsel %vm688_vm9, %v681_v59, %v1100_v55  ;;  %v677_v61 = vpop.permute.xlu0 %676 }
 0x10a   : > { %v672_v62 = vadd.f32 %v668_v58, %v630_v26  ;;  %v694_v2 = vmul.f32 %v1405_v44, %v689_v60  ;;  %v691_v63 = vsel %vm688_vm9, %v677_v61, %v681_v59 }
 0x10b   : > { %v693_v1 = vmul.f32 %v1396_v36, %v691_v63 }
 0x10c   : > { %v711_v24 = vmul.f32 %v703_v45, %v694_v2  ;;  %v788_v5 = vpop.permute.xlu1 %787 }
 0x10d   : > { %v710_v0 = vmul.f32 %v703_v45, %v693_v1  ;;  %v1103_v7 = vpop.permute.xlu0 %1102 }
 0x10e   : > { %v1104_v9 = vunpack.i.l.bf16 %v1103_v7  ;;  %v715_v8 = vadd.f32 %v711_v24, %v673_v37  ;;  %v1105_v17 = vunpack.i.h.bf16 %v1103_v7 }
 0x10f   : > { %v714_v10 = vadd.f32 %v710_v0, %v672_v62 }
 0x110   : > { %v725_v11 = vpop.permute.xlu1 %724 }
 0x111   : > { %v732_v12 = vsel %vm730_vm10, %v725_v11, %v1104_v9  ;;  %v1108_v13 = vpop.permute.xlu0 %1107 }
 0x112   : > { %v1109_v44 = vunpack.i.l.bf16 %v1108_v13  ;;  %v751_v3 = vmul.f32 %v746_v41, %v732_v12  ;;  %v1110_v35 = vunpack.i.h.bf16 %v1108_v13 }
 0x114   : > { %v763_v32 = vpop.permute.xlu1 %762  ;;  %v755_v20 = vadd.f32 %v751_v3, %v717_v48 }
 0x115   : > { %v770_v36 = vsel %vm768_vm11, %v763_v32, %v1109_v44  ;;  %v721_v14 = vpop.permute.xlu0 %720 }
 0x116   : > { %v776_v16 = vmul.f32 %v1433_v15, %v770_v36  ;;  %v734_v34 = vsel %vm730_vm10, %v721_v14, %v725_v11 }
 0x117   : > { %v750_v29 = vmul.f32 %v746_v41, %v734_v34 }
 0x118   : > { %v783_v19 = vpop.permute.xlu1 %782  ;;  %v793_v21 = vmul.f32 %v788_v5, %v776_v16 }
 0x119   : > { %v723_v23 = vpop.permute.xlu0 %722  ;;  %v754_v38 = vadd.f32 %v750_v29, %v716_v56 }
 0x11a   : > { %v797_v25 = vadd.f32 %v793_v21, %v755_v20  ;;  %v731_v31 = vsel %vm730_vm10, %v723_v23, %v1105_v17 }
 0x11b   : > { %v749_v37 = vmul.f32 %v741_v53, %v731_v31 }
 0x11c   : > { %v759_v30 = vpop.permute.xlu1 %758  ;;  %847 = vmatprep.subr.mxu0 %v797_v25  ;;  %1036 = vmatprep.subr.mxu1 %v797_v25 }
 0x11d   : > { %v772_v4 = vsel %vm768_vm11, %v759_v30, %v763_v32  ;;  %v719_v28 = vpop.permute.xlu0 %718  ;;  %v753_v22 = vadd.f32 %v749_v37, %v715_v8 }
 0x11e   : > { %v775_v33 = vmul.f32 %v1417_v57, %v772_v4  ;;  %v733_v40 = vsel %vm730_vm10, %v719_v28, %v723_v23 }
 0x11f   : > { %v748_v45 = vmul.f32 %v741_v53, %v733_v40  ;;  %v799_v53 = vld [vmem:[%s1540_s5 + $0x8] sm:$0xff] }
 0x120   : > { %v761_v6 = vpop.permute.xlu1 %760  ;;  %v792_v39 = vmul.f32 %v788_v5, %v775_v33 }
 0x121   : > { %v769_v41 = vsel %vm768_vm11, %v761_v6, %v1110_v35  ;;  %v752_v50 = vadd.f32 %v748_v45, %v714_v10  ;;  %v805_v27 = vpop.permute.xlu0 %804 }
 0x122   : > { %v774_v42 = vmul.f32 %v1433_v15, %v769_v41  ;;  %v796_v43 = vadd.f32 %v792_v39, %v754_v38  ;;  %v798_v15 = vld [vmem:[%s1540_s5] sm:$0xff] }
 0x124   : > { %v791_v46 = vmul.f32 %v783_v19, %v774_v42  ;;  %v757_v47 = vpop.permute.xlu1 %756  ;;  %848 = vmatpush1.msra.mxu0 %v796_v43  ;;  %1038 = vmatpush1.msra.mxu1 %v796_v43 }
 0x125   : > { %v771_v48 = vsel %vm768_vm11, %v757_v47, %v761_v6 }
 0x126   : > { %v773_v49 = vmul.f32 %v1417_v57, %v771_v48  ;;  %v795_v18 = vadd.f32 %v791_v46, %v753_v22 }
 0x128   : > { %v790_v51 = vmul.f32 %v783_v19, %v773_v49  ;;  %849 = vmatprep.subr.mxu0 %v795_v18  ;;  %1037 = vmatprep.subr.mxu1 %v795_v18  ;;  %v810_v57 = vpop.permute.xlu1 %809 }
 0x12a   : > { %v794_v52 = vadd.f32 %v790_v51, %v752_v50 }
 0x12c   : > { %850 = vmatpush1.msra.mxu0 %v794_v52  ;;  %1039 = vmatpush1.msra.mxu1 %v794_v52 }
 0x12d   : > { %1028 = vmatmul.mubr.msk.f32.vlgmr.msra.gmra.mxu0 %vm812_vm12, %v798_v15  ;;  %1029 = vmatmul.mubr.msk.f32.vlgmr.msra.gmra.mxu1 %vm812_vm12, %v799_v53 }
 0x1ed   : > { %v885_v54 = vpop.f32.mrf.mxu0  ;;  %v891_v55 = vpop.f32.mrf.mxu1 }
 0x1ee   : > { %v886_v56 = vadd.f32 %v885_v54, %v805_v27  ;;  %v892_v26 = vadd.f32 %v891_v55, %v810_v57 }
 0x1ef   : > { %v887_v58 = vpop.f32.mrf.mxu0  ;;  %v893_v59 = vpop.f32.mrf.mxu1 }
 0x1f0   : > { %896 = vst [vmem:[%s332_s12] sm:$0xff] %v886_v56  ;;  %898 = vst [vmem:[%s332_s12 + $0x10] sm:$0xff] %v892_v26  ;;  %v888_v60 = vadd.f32 %v887_v58, %v805_v27  ;;  %v894_v61 = vadd.f32 %v893_v59, %v810_v57 }
 0x1f2   : > { %897 = vst [vmem:[%s332_s12 + $0x8] sm:$0xff] %v888_v60  ;;  %899 = vst [vmem:[%s332_s12 + $0x18] sm:$0xff] %v894_v61 }
 0x1f3 PF: > { %s18_s24 = sadd.s32 1, %s1152_s24  }
 0x1f4   : > { %p15_p1 = scmp.ge.s32.totalorder %s18_s24, 4  }
 0x1f6   :  { %17 = sbr.rel (!%p15_p1) target bundleno = 1 (0x1), region = 97 }
 0x1fb   :  { %921 = vsyncpa [#allocation4], 1 }
 0x1fc   :  { %923 = vsyncpa [#allocation4 + $0x1], 1 }

// kernel: bifpn3_forward.16
= control target key start
LH: loop header
LB: loop body
LE: loop exit
PB: predicated region body
PF: predicated region fallthrough
CT: control target
= control target key end

     0   :  { %s729_s21 = smov 0   ;;  %s820_s0 = inlined_call_operand.vmem [shape: f32[2,16,64], index: 0, kind: input, shape index: {}]   ;;  %s821_s1 = inlined_call_operand.vmem [shape: f32[2,16,64], index: 1, kind: input, shape index: {}]   ;;  %s822_s2 = inlined_call_operand.vmem [shape: f32[2,16,64], index: 2, kind: input, shape index: {}]   ;;  %s823_s3 = inlined_call_operand.vmem [shape: f32[2,16,64], index: 3, kind: input, shape index: {}]   ;;  %s824_s4 = inlined_call_operand.vmem [shape: f32[32,16], index: 4, kind: input, shape index: {}]   ;;  %s825_s5 = inlined_call_operand.vmem [shape: f32[32,1], index: 5, kind: input, shape index: {}]   ;;  %s826_s6 = inlined_call_operand.vmem [shape: f32[2,32,64], index: 6, kind: output, shape index: {}]  }
   0x1 LB: > { %s619_s22 = sadd.s32 4294967295, %s687_s21   ;;  %p623_p0 = scmp.ge.s32.totalorder %s687_s21, 1  ;;  %s687_s21 = sphi %s729_s21, %s16_s21  }
   0x2   : > { %p242_p1 = scmp.lt.s32.totalorder %s687_s21, 3 }
   0x4   : > { %p243_p2 = pnand %p623_p0, %p242_p1 }
   0x5   : > { %p287_p3 = scmp.lt.s32.totalorder (!%p243_p2), %s619_s22, 1  ;;  %s690_s30 = smov (!%p243_p2), 120  }
   0x6   : > { %246 = sbr.rel (%p243_p2) target bundleno = 364 (0x16c), region = 44  ;;  %s691_s7 = smov (!%p243_p2), 127  }
   0x7   : > { %s692_s8 = smov (!%p243_p2), 119  }
   0xb   : > { %v689_v0 = vmov 0.0   ;;  %s828_s22 = smov (!%p287_p3, %s619_s22), 1  ;;  %vm333_vm0 = vcmask 523264   ;;  %v398_v11 = vld [vmem:[%s824_s4] sm:$0xff]  ;;  %vm426_vm1 = vcmask 130048   ;;  %v400_v12 = vld [vmem:[%s824_s4 + $0x10] sm:$0xff]  ;;  %v312_v20 = vlaneseq }
   0xc   : > { %330 = vst [vmem:[#allocation2 + $0x8] sm:$0xff] %v689_v0  ;;  %329 = vst [vmem:[#allocation2] sm:$0xff] %v689_v0  ;;  %s742_s23 = sshll.u32 %s828_s22, 4  ;;  %656 = vmatprep.mubr.msk.f32.mxu0 %vm426_vm1, %v398_v11  ;;  %659 = vmatprep.mubr.msk.f32.mxu1 %vm426_vm1, %v400_v12  ;;  %v693_v13 = vmov 0   ;;  %v402_v16 = vld [vmem:[%s825_s5] sm:$0xff]  ;;  %v403_v17 = vld [vmem:[%s825_s5 + $0x8] sm:$0xff] }
   0xd   : > { %s291_s26 = scalar_lea.vmem %s820_s0, %s742_s23  ;;  %s296_s29 = scalar_lea.vmem %s821_s1, %s742_s23  ;;  %680 = vset.pattern.permute.xlu1 %v693_v13  ;;  %679 = vset.pattern.permute.xlu0 %v693_v13  ;;  %v405_v18 = vld [vmem:[%s825_s5 + $0x18] sm:$0xff]  ;;  %v404_v19 = vld [vmem:[%s825_s5 + $0x10] sm:$0xff]  ;;  %v313_v21 = vand.u32 127, %v312_v20  ;;  %v399_v58 = vld [vmem:[%s824_s4 + $0x8] sm:$0xff] }
   0xe   : > { %v332_v1 = vld [vmem:[%s291_s26 + $0x8] sm:$0xff]  ;;  %v331_v2 = vld [vmem:[%s291_s26] sm:$0xff]  ;;  %s301_s11 = scalar_lea.vmem %s822_s2, %s742_s23  ;;  %v401_v59 = vld [vmem:[%s824_s4 + $0x18] sm:$0xff]  ;;  %s645_s9 = sshll.u32 %s828_s22, 5 }
   0xf   : > { %335 = vst.msk [vmem:[#allocation2 + $0x8] sm:$0xff] %vm333_vm0, %v332_v1  ;;  %334 = vst.msk [vmem:[#allocation2] sm:$0xff] %vm333_vm0, %v331_v2  ;;  %v363_v3 = vld [vmem:[%s296_s29 + $0x8] sm:$0xff]  ;;  %v362_v4 = vld [vmem:[%s296_s29] sm:$0xff]  ;;  %v318_v22 = vand.u32 7, %v313_v21  ;;  %s306_s29 = scalar_lea.vmem %s823_s3, %s742_s23  ;;  %s311_s12 = scalar_lea.vmem %s826_s6, %s645_s9 }
  0x10   : > { %v379_v7 = vld [vmem:[%s301_s11 + $0x8] sm:$0xff]  ;;  %v378_v8 = vld [vmem:[%s301_s11] sm:$0xff] }
  0x11   : > { %vm326_vm2 = vcmp.ne.s32.totalorder %v318_v22, 7  ;;  %v395_v52 = vld [vmem:[%s306_s29 + $0x8] sm:$0xff]  ;;  %v394_v53 = vld [vmem:[%s306_s29] sm:$0xff] }
  0x12   : > { %v634_v23 = vsel %vm326_vm2, 1.0, %v689_v0 }
  0x16   : > { %v337_v5 = vld [vmem:[#allocation2 + $0x8] sm:$0xff]  ;;  %v754_v6 = vld [vmem:[#allocation2] sm:$0xff] }
  0x17   : > { %348 = vrot.lane.b32.xlu1 %v337_v5, %s690_s30  ;;  %361 = vst [vmem:[#allocation2 + $0x8] sm:$0xff] %v689_v0  ;;  %340 = vrot.lane.b32.xlu0 %v337_v5, %s691_s7  ;;  %360 = vst [vmem:[#allocation2] sm:$0xff] %v689_v0 }
  0x18   : > { %365 = vst.msk [vmem:[#allocation2 + $0x8] sm:$0xff] %vm333_vm0, %v363_v3  ;;  %364 = vst.msk [vmem:[#allocation2] sm:$0xff] %vm333_vm0, %v362_v4 }
  0x1b   : > { %354 = vrot.lane.b32.xlu1 %v337_v5, %s692_s8  ;;  %338 = vrot.lane.b32.xlu0 %v754_v6, %s691_s7 }
  0x1f   : > { %346 = vrot.lane.b32.xlu0 %v754_v6, %s690_s30  ;;  %352 = vrot.lane.b32.xlu1 %v754_v6, %s692_s8  ;;  %v367_v9 = vld [vmem:[#allocation2 + $0x8] sm:$0xff]  ;;  %v366_v10 = vld [vmem:[#allocation2] sm:$0xff] }
  0x20   : > { %377 = vst [vmem:[#allocation2 + $0x8] sm:$0xff] %v689_v0  ;;  %376 = vst [vmem:[#allocation2] sm:$0xff] %v689_v0 }
  0x21   : > { %381 = vst.msk [vmem:[#allocation2 + $0x8] sm:$0xff] %vm333_vm0, %v379_v7  ;;  %380 = vst.msk [vmem:[#allocation2] sm:$0xff] %vm333_vm0, %v378_v8 }
  0x23   : > { %372 = vrot.lane.b32.xlu0 %v367_v9, %s690_s30  ;;  %370 = vrot.lane.b32.xlu1 %v366_v10, %s690_s30 }
  0x28   : > { %v383_v14 = vld [vmem:[#allocation2 + $0x8] sm:$0xff]  ;;  %v382_v15 = vld [vmem:[#allocation2] sm:$0xff] }
  0x29   : > { %388 = vrot.lane.b32.xlu0 %v383_v14, %s691_s7  ;;  %386 = vrot.lane.b32.xlu1 %v382_v15, %s691_s7 }
  0x2d   : > { %408 = vperm.xlu0 %679, %v402_v16   ;;  %413 = vperm.xlu1 %680, %v403_v17  }
  0x31   : > { %423 = vperm.xlu0 %679, %v405_v18   ;;  %418 = vperm.xlu1 %680, %v404_v19  }
  0x89   : > { %v349_v24 = vpop.permute.xlu1 %348  ;;  %v341_v25 = vpop.permute.xlu0 %340 }
  0x8a   : > { %v343_v26 = vmul.f32 %v634_v23, %v341_v25 }
  0x8c   : > { %v345_v27 = vmax.f32 %v337_v5, %v343_v26 }
  0x8d   : > { %v355_v28 = vpop.permute.xlu1 %354  ;;  %v339_v29 = vpop.permute.xlu0 %338 }
  0x8e   : > { %v351_v30 = vmax.f32 %v345_v27, %v349_v24  ;;  %v357_v31 = vmul.f32 %v634_v23, %v355_v28  ;;  %v342_v32 = vmul.f32 %v634_v23, %v339_v29 }
  0x90   : > { %v344_v33 = vmax.f32 %v754_v6, %v342_v32  ;;  %v359_v36 = vmax.f32 %v351_v30, %v357_v31 }
  0x91   : > { %v347_v34 = vpop.permute.xlu0 %346  ;;  %v353_v35 = vpop.permute.xlu1 %352 }
  0x92   : > { %v350_v37 = vmax.f32 %v344_v33, %v347_v34  ;;  %v356_v38 = vmul.f32 %v634_v23, %v353_v35  ;;  %v369_v42 = vmax.f32 %v359_v36, %v367_v9 }
  0x94   : > { %v358_v39 = vmax.f32 %v350_v37, %v356_v38 }
  0x95   : > { %v373_v40 = vpop.permute.xlu0 %372  ;;  %v371_v41 = vpop.permute.xlu1 %370 }
  0x96   : > { %v368_v43 = vmax.f32 %v358_v39, %v366_v10  ;;  %v375_v44 = vmax.f32 %v369_v42, %v373_v40 }
  0x98   : > { %v374_v45 = vmax.f32 %v368_v43, %v371_v41  ;;  %v385_v49 = vmax.f32 %v375_v44, %v383_v14 }
  0x9a   : > { %v384_v46 = vmax.f32 %v374_v45, %v382_v15 }
  0x9b   : > { %v389_v47 = vpop.permute.xlu0 %388  ;;  %v387_v48 = vpop.permute.xlu1 %386 }
  0x9c   : > { %v391_v50 = vmul.f32 %v634_v23, %v389_v47  ;;  %v390_v51 = vmul.f32 %v634_v23, %v387_v48 }
  0x9e   : > { %v393_v54 = vmax.f32 %v385_v49, %v391_v50  ;;  %v392_v55 = vmax.f32 %v384_v46, %v390_v51 }
  0xa0   : > { %v397_v56 = vmax.f32 %v393_v54, %v395_v52  ;;  %v396_v57 = vmax.f32 %v392_v55, %v394_v53 }
  0xa2   : > { %652 = vmatprep.subr.mxu0 %v397_v56  ;;  %662 = vmatprep.subr.mxu1 %v397_v56 }
  0xa3   : > { %653 = vmatpush3.msra.mxu0 %v397_v56  ;;  %664 = vmatpush3.msra.mxu1 %v397_v56 }
  0xa4   : > { %654 = vmatprep.subr.mxu0 %v396_v57  ;;  %663 = vmatprep.subr.mxu1 %v396_v57 }
  0xa5   : > { %655 = vmatpush3.msra.mxu0 %v396_v57  ;;  %665 = vmatpush3.msra.mxu1 %v396_v57 }
  0xa6   : > { %657 = vmatmul.mubr.msk.f32.vlgmr.msra.gmra.mxu0 %vm426_vm1, %v399_v58  ;;  %660 = vmatmul.mubr.msk.f32.vlgmr.msra.gmra.mxu1 %vm426_vm1, %v401_v59 }
  0xa8   : > { %v409_v60 = vpop.permute.xlu0 %408  ;;  %v414_v61 = vpop.permute.xlu1 %413 }
  0xac   : > { %v424_v62 = vpop.permute.xlu0 %423  ;;  %v419_v1 = vpop.permute.xlu1 %418 }
 0x166   : > { %v658_v63 = vpop.f32.mrf.mxu0  ;;  %v661_v0 = vpop.f32.mrf.mxu1 }
 0x167   : > { %v511_v2 = vadd.f32 %v658_v63, %v414_v61  ;;  %v521_v3 = vadd.f32 %v661_v0, %v424_v62 }
 0x168   : > { %v505_v4 = vpop.f32.mrf.mxu0  ;;  %v515_v5 = vpop.f32.mrf.mxu1 }
 0x169   : > { %525 = vst.msk [vmem:[%s311_s12 + $0x8] sm:$0xff] %vm333_vm0, %v511_v2  ;;  %527 = vst.msk [vmem:[%s311_s12 + $0x18] sm:$0xff] %vm333_vm0, %v521_v3  ;;  %v506_v6 = vadd.f32 %v505_v4, %v409_v60  ;;  %v516_v7 = vadd.f32 %v515_v5, %v419_v1 }
 0x16b   : > { %524 = vst.msk [vmem:[%s311_s12] sm:$0xff] %vm333_vm0, %v506_v6  ;;  %526 = vst.msk [vmem:[%s311_s12 + $0x10] sm:$0xff] %vm333_vm0, %v516_v7 }
 0x16c PF: > { %s16_s21 = sadd.s32 1, %s687_s21  }
 0x16d   : > { %p13_p4 = scmp.ge.s32.totalorder %s16_s21, 4  }
 0x16f   :  { %15 = sbr.rel (!%p13_p4) target bundleno = 1 (0x1), region = 83 }

// kernel: bifpn3_forward.17
= control target key start
LH: loop header
LB: loop body
LE: loop exit
PB: predicated region body
PF: predicated region fallthrough
CT: control target
= control target key end

     0   :  { %11 = vsyncpa [#allocation4], 0  ;;  %s1167_s21 = smov 0   ;;  %s1475_s0 = inlined_call_operand.vmem [shape: f32[2], index: 0, kind: input, shape index: {}]   ;;  %s1476_s1 = inlined_call_operand.vmem [shape: f32[2,32,64], index: 1, kind: input, shape index: {}]   ;;  %s1477_s2 = inlined_call_operand.vmem [shape: f32[2,32,64], index: 2, kind: input, shape index: {}]   ;;  %s1478_s3 = inlined_call_operand.vmem [shape: f32[9,32,1], index: 3, kind: input, shape index: {}]   ;;  %s1479_s4 = inlined_call_operand.vmem [shape: f32[32,32], index: 4, kind: input, shape index: {}]   ;;  %s1480_s5 = inlined_call_operand.vmem [shape: f32[32,1], index: 5, kind: input, shape index: {}]   ;;  %s1481_s6 = inlined_call_operand.vmem [shape: f32[2,32,64], index: 6, kind: output, shape index: {}]  }
   0x1 LB: > { %s1173_s22 = sadd.s32 4294967295, %s1119_s21   ;;  %p962_p0 = scmp.ge.s32.totalorder %s1119_s21, 1  ;;  %s1119_s21 = sphi %s1167_s21, %s17_s21  }
   0x2   : > { %p184_p1 = scmp.lt.s32.totalorder %s1119_s21, 3  ;;  %s197_s25 = sshll.u32 %s1475_s0, 4  ;;  %s198_s25 = int_to_ptr.vmem [resolvable:$true] %s197_s25 }
   0x3   : > { %p1055_p3 = scmp.eq.s32.totalorder %s1173_s22, 0  ;;  %s1094_s27 = scalar_lea.vmem %s198_s25, 16 }
   0x4   : > { %p1180_p2 = pnand %p962_p0, %p184_p1  ;;  %p1095_p6 = scmp.ne.s32.totalorder %s198_s25, %s1094_s27 }
   0x5   : > { %p1102_p10 = scmp.lt.s32.totalorder %s198_s25, %s198_s25  ;;  %p1103_p11 = scmp.lt.s32.totalorder %s1094_s27, %s1094_s27 }
   0x6   : > { %p1051_p4 = pneg %p1180_p2 }
   0x7   : > { %p1104_p12 = por %p1103_p11, %p1102_p10 }
   0x8   : > { %p1052_p5 = pnand %p1055_p3, %p1051_p4 }
   0xa   : > { %p1096_p7 = pneg %p1052_p5 }
   0xc   : > { %p1097_p8 = pnand %p1096_p7, %p1095_p6 }
   0xe   : > { %p1098_p9 = pneg %p1097_p8 }
  0x10   : > { %p1105_p13 = pnand %p1104_p12, %p1098_p9 }
  0x12   : > { %1108 = shalt.err (!%p1105_p13)
}
  0x13   : > { %s1121_s28 = smov [#allocation3]   ;;  %235 = sbr.rel (%p1180_p2) target bundleno = 510 (0x1fe), region = 44 }
  0x14   : > { %1054 = dma.vmem_to_smem (!%p1052_p5), %s198_s25, 16, %s1121_s28, [#allocation4]  }
  0x18   : > { %1114 = dma.done.wait (%p1055_p3), [#allocation4], 16  }
  0x19   : > { %1116 = vsyncadd (%p1055_p3), [#allocation4], 4294967280 }
  0x1a   : > { %241 = sfence }
  0x1b   : > { %v382_v0 = vld [vmem:[%s1478_s3 + $0x18] sm:$0xff]  ;;  %v381_v1 = vld [vmem:[%s1478_s3 + $0x10] sm:$0xff]  ;;  %p271_p0 = scmp.lt.s32.totalorder %s1173_s22, 1  ;;  %v1122_v2 = vmov 0   ;;  %s290_s9 = sld [smem:[#allocation3]]  ;;  %v1123_v3 = vmov 0.0  }
  0x1c   : > { %1077 = vset.pattern.permute.xlu1 %v1122_v2  ;;  %1076 = vset.pattern.permute.xlu0 %v1122_v2  ;;  %337 = vst [vmem:[#allocation2 + $0x18] sm:$0xff] %v1123_v3  ;;  %334 = vst [vmem:[#allocation2] sm:$0xff] %v1123_v3  ;;  %v979_v4 = vld [vmem:[%s1478_s3 + $0x38] sm:$0xff]  ;;  %v978_v5 = vld [vmem:[%s1478_s3 + $0x30] sm:$0xff]  ;;  %s973_s14 = sld [smem:[#allocation3 + $0x1]]  ;;  %vm338_vm0 = vcmask 523264  }
  0x1d   : > { %335 = vst [vmem:[#allocation2 + $0x8] sm:$0xff] %v1123_v3  ;;  %336 = vst [vmem:[#allocation2 + $0x10] sm:$0xff] %v1123_v3  ;;  %400 = vperm.xlu0 %1076, %v382_v0   ;;  %395 = vperm.xlu1 %1077, %v381_v1   ;;  %s1484_s22 = smov (!%p271_p0, %s1173_s22), 1  ;;  %v983_v6 = vld [vmem:[%s1478_s3 + $0x58] sm:$0xff]  ;;  %v977_v7 = vld [vmem:[%s1478_s3 + $0x28] sm:$0xff]  ;;  %s1124_s29 = smov 9  }
  0x1e   : > { %s1213_s15 = sshll.u32 %s1484_s22, 5  ;;  %v987_v25 = vld [vmem:[%s1478_s3 + $0x78] sm:$0xff]  ;;  %v380_v26 = vld [vmem:[%s1478_s3 + $0x8] sm:$0xff]  ;;  %v982_v35 = vld [vmem:[%s1478_s3 + $0x50] sm:$0xff]  ;;  %s1125_s30 = smov 8   ;;  %vm779_vm1 = vcmask 261120  }
  0x1f   : > { %s275_s24 = scalar_lea.vmem %s1476_s1, %s1213_s15  ;;  %s280_s27 = scalar_lea.vmem %s1477_s2, %s1213_s15  ;;  %v379_v36 = vld [vmem:[%s1478_s3] sm:$0xff]  ;;  %v981_v43 = vld [vmem:[%s1478_s3 + $0x48] sm:$0xff]  ;;  %v986_v44 = vld [vmem:[%s1478_s3 + $0x70] sm:$0xff] }
  0x20   : > { %v289_v8 = vld [vmem:[%s275_s24 + $0x18] sm:$0xff]  ;;  %v288_v10 = vld [vmem:[%s275_s24 + $0x10] sm:$0xff]  ;;  %v287_v13 = vld [vmem:[%s275_s24 + $0x8] sm:$0xff]  ;;  %s1126_s7 = smov 7   ;;  %s1127_s8 = smov 1  }
  0x21   : > { %441 = vperm.xlu0 %1076, %v979_v4   ;;  %436 = vperm.xlu1 %1077, %v978_v5   ;;  %v299_v9 = vld [vmem:[%s280_s27 + $0x18] sm:$0xff]  ;;  %v291_v11 = vstv %s290_s9  ;;  %v298_v12 = vld [vmem:[%s280_s27 + $0x10] sm:$0xff]  ;;  %v297_v14 = vld [vmem:[%s280_s27 + $0x8] sm:$0xff]  ;;  %s1128_s18 = smov 127   ;;  %s1130_s23 = smov 119  }
  0x22   : > { %v295_v15 = vmul.f32 %v291_v11, %v289_v8  ;;  %v294_v16 = vmul.f32 %v291_v11, %v288_v10  ;;  %v293_v17 = vmul.f32 %v291_v11, %v287_v13  ;;  %v286_v18 = vld [vmem:[%s275_s24] sm:$0xff]  ;;  %v301_v20 = vstv %s973_s14  ;;  %v991_v45 = vld [vmem:[%s1478_s3 + $0x98] sm:$0xff]  ;;  %v985_v47 = vld [vmem:[%s1478_s3 + $0x68] sm:$0xff]  ;;  %s1131_s24 = smov 120  }
  0x23   : > { %v296_v19 = vld [vmem:[%s280_s27] sm:$0xff]  ;;  %v292_v21 = vmul.f32 %v291_v11, %v286_v18  ;;  %v305_v22 = vmul.f32 %v301_v20, %v299_v9  ;;  %v304_v23 = vmul.f32 %v301_v20, %v298_v12  ;;  %v303_v24 = vmul.f32 %v301_v20, %v297_v14  ;;  %v990_v49 = vld [vmem:[%s1478_s3 + $0x90] sm:$0xff]  ;;  %v995_v50 = vld [vmem:[%s1478_s3 + $0xb8] sm:$0xff]  ;;  %s285_s27 = scalar_lea.vmem %s1481_s6, %s1213_s15 }
  0x24   : > { %v302_v27 = vmul.f32 %v301_v20, %v296_v19  ;;  %v976_v42 = vld [vmem:[%s1478_s3 + $0x20] sm:$0xff]  ;;  %v999_v9 = vld [vmem:[%s1478_s3 + $0xd8] sm:$0xff]  ;;  %v994_v10 = vld [vmem:[%s1478_s3 + $0xb0] sm:$0xff] }
  0x25   : > { %486 = vperm.xlu0 %1076, %v983_v6   ;;  %431 = vperm.xlu1 %1077, %v977_v7   ;;  %v309_v28 = vadd.f32 %v305_v22, %v295_v15  ;;  %v308_v29 = vadd.f32 %v304_v23, %v294_v16  ;;  %v307_v30 = vadd.f32 %v303_v24, %v293_v17  ;;  %v980_v46 = vld [vmem:[%s1478_s3 + $0x40] sm:$0xff]  ;;  %v989_v7 = vld [vmem:[%s1478_s3 + $0x88] sm:$0xff]  ;;  %v1003_v13 = vld [vmem:[%s1478_s3 + $0xf8] sm:$0xff] }
  0x26   : > { %v306_v31 = vadd.f32 %v302_v27, %v292_v21  ;;  %v984_v8 = vld [vmem:[%s1478_s3 + $0x60] sm:$0xff]  ;;  %v993_v11 = vld [vmem:[%s1478_s3 + $0xa8] sm:$0xff]  ;;  %v998_v14 = vld [vmem:[%s1478_s3 + $0xd0] sm:$0xff] }
  0x27   : > { %v313_v32 = vsub.f32 0.0, %v309_v28  ;;  %v312_v33 = vsub.f32 0.0, %v308_v29  ;;  %v311_v34 = vsub.f32 0.0, %v307_v30  ;;  %v988_v12 = vld [vmem:[%s1478_s3 + $0x80] sm:$0xff]  ;;  %v1002_v16 = vld [vmem:[%s1478_s3 + $0xf0] sm:$0xff]  ;;  %v997_v17 = vld [vmem:[%s1478_s3 + $0xc8] sm:$0xff] }
  0x28   : > { %v310_v37 = vsub.f32 0.0, %v306_v31  ;;  %v992_v15 = vld [vmem:[%s1478_s3 + $0xa0] sm:$0xff]  ;;  %v1007_v18 = vld [vmem:[%s1478_s3 + $0x118] sm:$0xff]  ;;  %v1006_v20 = vld [vmem:[%s1478_s3 + $0x110] sm:$0xff] }
  0x29   : > { %531 = vperm.xlu1 %1077, %v987_v25   ;;  %390 = vperm.xlu0 %1076, %v380_v26   ;;  %v320_v38 = vmul.f32 1.442695, %v313_v32  ;;  %v318_v39 = vmul.f32 1.442695, %v312_v33  ;;  %v316_v40 = vmul.f32 1.442695, %v311_v34 }
  0x2a   : > { %v314_v41 = vmul.f32 1.442695, %v310_v37  ;;  %v996_v19 = vld [vmem:[%s1478_s3 + $0xc0] sm:$0xff]  ;;  %v1001_v21 = vld [vmem:[%s1478_s3 + $0xe8] sm:$0xff] }
  0x2b   : > { %1078 = vpow2.f32 %v320_v38  ;;  %v1004_v32 = vld [vmem:[%s1478_s3 + $0x100] sm:$0xff]  ;;  %v756_v37 = vld [vmem:[%s1480_s5 + $0x8] sm:$0xff]  ;;  %v347_v38 = vlaneseq }
  0x2c   : > { %1080 = vpow2.f32 %v318_v39 }
  0x2d   : > { %481 = vperm.xlu0 %1076, %v982_v35   ;;  %385 = vperm.xlu1 %1077, %v379_v36   ;;  %1082 = vpow2.f32 %v316_v40  ;;  %v755_v40 = vld [vmem:[%s1480_s5] sm:$0xff] }
  0x2e   : > { %1084 = vpow2.f32 %v314_v41 }
  0x31   : > { %426 = vperm.xlu0 %1076, %v976_v42   ;;  %476 = vperm.xlu1 %1077, %v981_v43   ;;  %v751_v42 = vld [vmem:[%s1479_s4] sm:$0xff]  ;;  %v753_v43 = vld [vmem:[%s1479_s4 + $0x10] sm:$0xff] }
  0x32   : > { %1033 = vmatprep.mubr.msk.f32.mxu0 %vm779_vm1, %v751_v42  ;;  %1036 = vmatprep.mubr.msk.f32.mxu1 %vm779_vm1, %v753_v43 }
  0x35   : > { %526 = vperm.xlu0 %1076, %v986_v44   ;;  %564 = vperm.xlu1 %1077, %v991_v45   ;;  %v758_v44 = vld [vmem:[%s1480_s5 + $0x18] sm:$0xff]  ;;  %v348_v45 = vand.u32 127, %v347_v38 }
  0x38   : > { %v1079_v48 = vpop.eup %1078 }
  0x39   : > { %471 = vperm.xlu0 %1076, %v980_v46   ;;  %521 = vperm.xlu1 %1077, %v985_v47   ;;  %v1081_v51 = vpop.eup %1080  ;;  %v325_v52 = vadd.f32 1.0, %v1079_v48  ;;  %v757_v46 = vld [vmem:[%s1480_s5 + $0x10] sm:$0xff] }
  0x3a   : > { %v1083_v53 = vpop.eup %1082  ;;  %v324_v54 = vadd.f32 1.0, %v1081_v51 }
  0x3b   : > { %v1085_v55 = vpop.eup %1084  ;;  %1086 = vrcp.f32 %v325_v52  ;;  %v323_v56 = vadd.f32 1.0, %v1083_v53 }
  0x3c   : > { %1088 = vrcp.f32 %v324_v54  ;;  %v322_v57 = vadd.f32 1.0, %v1085_v55 }
  0x3d   : > { %559 = vperm.xlu0 %1076, %v990_v49   ;;  %609 = vperm.xlu1 %1077, %v995_v50   ;;  %1090 = vrcp.f32 %v323_v56  ;;  %v353_v49 = vand.u32 7, %v348_v45 }
  0x3e   : > { %1092 = vrcp.f32 %v322_v57 }
  0x3f   : > { %vm361_vm2 = vcmp.ne.s32.totalorder %v353_v49, 0  ;;  %vm364_vm3 = vcmp.ne.s32.totalorder %v353_v49, 7 }
  0x40   : > { %v1414_v52 = vsel %vm361_vm2, 1.0, %v1123_v3 }
  0x48   : > { %v1087_v58 = vpop.eup %1086 }
  0x49   : > { %v1089_v59 = vpop.eup %1088  ;;  %v333_v60 = vmul.f32 %v1087_v58, %v309_v28  ;;  %v1005_v28 = vld [vmem:[%s1478_s3 + $0x108] sm:$0xff]  ;;  %v1419_v58 = vsel %vm364_vm3, 1.0, %v1123_v3 }
  0x4a   : > { %v1091_v61 = vpop.eup %1090  ;;  %v332_v62 = vmul.f32 %v1089_v59, %v308_v29  ;;  %v1000_v29 = vld [vmem:[%s1478_s3 + $0xe0] sm:$0xff] }
  0x4b   : > { %v1093_v63 = vpop.eup %1092  ;;  %342 = vst.msk [vmem:[#allocation2 + $0x18] sm:$0xff] %vm338_vm0, %v333_v60  ;;  %v331_v0 = vmul.f32 %v1091_v61, %v307_v30 }
  0x4c   : > { %341 = vst.msk [vmem:[#allocation2 + $0x10] sm:$0xff] %vm338_vm0, %v332_v62  ;;  %v330_v1 = vmul.f32 %v1093_v63, %v306_v31 }
  0x4d   : > { %340 = vst.msk [vmem:[#allocation2 + $0x8] sm:$0xff] %vm338_vm0, %v331_v0 }
  0x4e   : > { %339 = vst.msk [vmem:[#allocation2] sm:$0xff] %vm338_vm0, %v330_v1 }
  0x52   : > { %v1269_v2 = vld [vmem:[#allocation2 + $0x18] sm:$0xff] }
  0x53   : > { %373 = vrot.lane.b32.xlu1 %v1269_v2, %s1124_s29  ;;  %v1272_v4 = vld [vmem:[#allocation2 + $0x10] sm:$0xff] }
  0x54   : > { %371 = vrot.lane.b32.xlu0 %v1272_v4, %s1124_s29  ;;  %v1277_v5 = vld [vmem:[#allocation2 + $0x8] sm:$0xff] }
  0x55   : > { %v1284_v6 = vld [vmem:[#allocation2] sm:$0xff] }
  0x57   : > { %417 = vrot.lane.b32.xlu1 %v1269_v2, %s1125_s30 }
  0x58   : > { %458 = vrot.lane.b32.xlu0 %v1269_v2, %s1126_s7 }
  0x5b   : > { %415 = vrot.lane.b32.xlu1 %v1272_v4, %s1125_s30 }
  0x5c   : > { %369 = vrot.lane.b32.xlu0 %v1277_v5, %s1124_s29 }
  0x5f   : > { %503 = vrot.lane.b32.xlu1 %v1269_v2, %s1127_s8 }
  0x60   : > { %456 = vrot.lane.b32.xlu0 %v1272_v4, %s1126_s7 }
  0x63   : > { %413 = vrot.lane.b32.xlu1 %v1277_v5, %s1125_s30 }
  0x64   : > { %367 = vrot.lane.b32.xlu0 %v1284_v6, %s1124_s29 }
  0x67   : > { %501 = vrot.lane.b32.xlu1 %v1272_v4, %s1127_s8 }
  0x68   : > { %454 = vrot.lane.b32.xlu0 %v1277_v5, %s1126_s7 }
  0x6b   : > { %554 = vperm.xlu1 %1077, %v989_v7  }
  0x6c   : > { %516 = vperm.xlu0 %1076, %v984_v8  }
  0x6f   : > { %654 = vperm.xlu1 %1077, %v999_v9  }
  0x70   : > { %604 = vperm.xlu0 %1076, %v994_v10  }
  0x73   : > { %452 = vrot.lane.b32.xlu1 %v1284_v6, %s1126_s7 }
  0x74   : > { %411 = vrot.lane.b32.xlu0 %v1284_v6, %s1125_s30  ;;  %s1129_s30 = smov 121  }
  0x77   : > { %581 = vrot.lane.b32.xlu1 %v1269_v2, %s1128_s18 }
  0x78   : > { %499 = vrot.lane.b32.xlu0 %v1277_v5, %s1127_s8 }
  0x7b   : > { %599 = vperm.xlu1 %1077, %v993_v11  }
  0x7c   : > { %549 = vperm.xlu0 %1076, %v988_v12  }
  0x7f   : > { %695 = vperm.xlu1 %1077, %v1003_v13  }
  0x80   : > { %649 = vperm.xlu0 %1076, %v998_v14  }
  0x83   : > { %579 = vrot.lane.b32.xlu1 %v1272_v4, %s1128_s18 }
  0x84   : > { %497 = vrot.lane.b32.xlu0 %v1284_v6, %s1127_s8 }
  0x87   : > { %594 = vperm.xlu1 %1077, %v992_v15  }
  0x88   : > { %626 = vrot.lane.b32.xlu0 %v1269_v2, %s1129_s30 }
  0x8b   : > { %690 = vperm.xlu1 %1077, %v1002_v16  }
  0x8c   : > { %644 = vperm.xlu0 %1076, %v997_v17  }
  0x8f   : > { %577 = vrot.lane.b32.xlu1 %v1277_v5, %s1128_s18 }
  0x90   : > { %740 = vperm.xlu0 %1076, %v1007_v18  }
  0x93   : > { %639 = vperm.xlu1 %1077, %v996_v19  }
  0x94   : > { %624 = vrot.lane.b32.xlu0 %v1272_v4, %s1129_s30 }
  0x97   : > { %735 = vperm.xlu1 %1077, %v1006_v20  }
  0x98   : > { %v401_v22 = vpop.permute.xlu0 %400  ;;  %v1352_v23 = vpop.permute.xlu1 %395  ;;  %685 = vperm.xlu0 %1076, %v1001_v21  }
  0x9b   : > { %622 = vrot.lane.b32.xlu1 %v1277_v5, %s1129_s30 }
  0x9c   : > { %v442_v24 = vpop.permute.xlu0 %441  ;;  %v1354_v25 = vpop.permute.xlu1 %436  ;;  %575 = vrot.lane.b32.xlu0 %v1284_v6, %s1128_s18 }
  0x9f   : > { %712 = vrot.lane.b32.xlu1 %v1269_v2, %s1130_s23 }
  0xa0   : > { %v487_v26 = vpop.permute.xlu0 %486  ;;  %v1360_v27 = vpop.permute.xlu1 %431  ;;  %671 = vrot.lane.b32.xlu0 %v1269_v2, %s1131_s24 }
  0xa3   : > { %730 = vperm.xlu1 %1077, %v1005_v28  }
  0xa4   : > { %v1370_v30 = vpop.permute.xlu1 %531  ;;  %680 = vperm.xlu0 %1076, %v1000_v29   ;;  %v391_v31 = vpop.permute.xlu0 %390 }
  0xa7   : > { %669 = vrot.lane.b32.xlu1 %v1272_v4, %s1131_s24 }
  0xa8   : > { %620 = vrot.lane.b32.xlu0 %v1284_v6, %s1129_s30  ;;  %v1378_v33 = vpop.permute.xlu1 %385  ;;  %v482_v34 = vpop.permute.xlu0 %481 }
  0xab   : > { %725 = vperm.xlu1 %1077, %v1004_v32  }
  0xac   : > { %710 = vrot.lane.b32.xlu0 %v1272_v4, %s1130_s23  ;;  %v1381_v35 = vpop.permute.xlu1 %476  ;;  %v1384_v36 = vpop.permute.xlu0 %426 }
  0xaf   : > { %708 = vrot.lane.b32.xlu1 %v1277_v5, %s1130_s23 }
  0xb0   : > { %667 = vrot.lane.b32.xlu0 %v1277_v5, %s1131_s24  ;;  %v565_v39 = vpop.permute.xlu1 %564  ;;  %v527_v41 = vpop.permute.xlu0 %526 }
  0xb1   : > { %v570_v20 = vmul.f32 %v565_v39, %v1269_v2 }
  0xb3   : > { %706 = vrot.lane.b32.xlu1 %v1284_v6, %s1130_s23 }
  0xb4   : > { %665 = vrot.lane.b32.xlu0 %v1284_v6, %s1131_s24  ;;  %v1409_v47 = vpop.permute.xlu1 %521  ;;  %v472_v48 = vpop.permute.xlu0 %471 }
  0xb7   : > { %766 = vperm.xlu1 %1077, %v756_v37  }
  0xb8   : > { %761 = vperm.xlu0 %1076, %v755_v40   ;;  %v1411_v50 = vpop.permute.xlu1 %609  ;;  %v560_v51 = vpop.permute.xlu0 %559 }
  0xb9   : > { %v569_v38 = vmul.f32 %v560_v51, %v1272_v4 }
  0xbb   : > { %776 = vperm.xlu1 %1077, %v758_v44  }
  0xbc   : > { %771 = vperm.xlu0 %1076, %v757_v46  }
  0xc5   : > { %v374_v53 = vpop.permute.xlu1 %373 }
  0xc6   : > { %v378_v54 = vmul.f32 %v1414_v52, %v374_v53  ;;  %v372_v55 = vpop.permute.xlu0 %371 }
  0xc7   : > { %v377_v56 = vmul.f32 %v1414_v52, %v372_v55 }
  0xc8   : > { %v406_v57 = vmul.f32 %v401_v22, %v378_v54 }
  0xc9   : > { %v405_v59 = vmul.f32 %v1352_v23, %v377_v56  ;;  %v418_v60 = vpop.permute.xlu1 %417 }
  0xca   : > { %v447_v61 = vmul.f32 %v442_v24, %v418_v60  ;;  %v459_v62 = vpop.permute.xlu0 %458 }
  0xcb   : > { %v463_v63 = vmul.f32 %v1419_v58, %v459_v62 }
  0xcc   : > { %v451_v0 = vadd.f32 %v447_v61, %v406_v57 }
  0xcd   : > { %v492_v1 = vmul.f32 %v487_v26, %v463_v63  ;;  %v416_v7 = vpop.permute.xlu1 %415 }
  0xce   : > { %v446_v8 = vmul.f32 %v1354_v25, %v416_v7  ;;  %v370_v9 = vpop.permute.xlu0 %369 }
  0xcf   : > { %v496_v10 = vadd.f32 %v492_v1, %v451_v0  ;;  %v376_v11 = vmul.f32 %v1414_v52, %v370_v9 }
  0xd0   : > { %v450_v12 = vadd.f32 %v446_v8, %v405_v59 }
  0xd1   : > { %v404_v13 = vmul.f32 %v391_v31, %v376_v11  ;;  %v504_v3 = vpop.permute.xlu1 %503 }
  0xd2   : > { %v508_v14 = vmul.f32 %v1414_v52, %v504_v3  ;;  %v457_v15 = vpop.permute.xlu0 %456 }
  0xd3   : > { %v462_v16 = vmul.f32 %v1419_v58, %v457_v15 }
  0xd4   : > { %v537_v17 = vmul.f32 %v1370_v30, %v508_v14 }
  0xd5   : > { %v491_v18 = vmul.f32 %v482_v34, %v462_v16  ;;  %v414_v19 = vpop.permute.xlu1 %413 }
  0xd6   : > { %v541_v21 = vadd.f32 %v537_v17, %v496_v10  ;;  %v445_v22 = vmul.f32 %v1360_v27, %v414_v19  ;;  %v368_v23 = vpop.permute.xlu0 %367 }
  0xd7   : > { %v495_v24 = vadd.f32 %v491_v18, %v450_v12  ;;  %v375_v25 = vmul.f32 %v1414_v52, %v368_v23 }
  0xd8   : > { %v449_v26 = vadd.f32 %v445_v22, %v404_v13  ;;  %v574_v28 = vadd.f32 %v570_v20, %v541_v21 }
  0xd9   : > { %v403_v29 = vmul.f32 %v1378_v33, %v375_v25  ;;  %v502_v31 = vpop.permute.xlu1 %501 }
  0xda   : > { %v507_v32 = vmul.f32 %v1414_v52, %v502_v31  ;;  %v455_v37 = vpop.permute.xlu0 %454 }
  0xdb   : > { %v461_v30 = vmul.f32 %v1419_v58, %v455_v37 }
  0xdc   : > { %v536_v34 = vmul.f32 %v527_v41, %v507_v32 }
  0xdd   : > { %v490_v2 = vmul.f32 %v1381_v35, %v461_v30 }
  0xde   : > { %v540_v27 = vadd.f32 %v536_v34, %v495_v24 }
  0xdf   : > { %v494_v39 = vadd.f32 %v490_v2, %v449_v26 }
  0xe0   : > { %v573_v40 = vadd.f32 %v569_v38, %v540_v27 }
  0xe6   : > { %v555_v42 = vpop.permute.xlu1 %554 }
  0xe7   : > { %v517_v43 = vpop.permute.xlu0 %516  ;;  %v568_v18 = vmul.f32 %v555_v42, %v1277_v5 }
  0xea   : > { %v655_v44 = vpop.permute.xlu1 %654 }
  0xeb   : > { %v605_v45 = vpop.permute.xlu0 %604 }
  0xee   : > { %v453_v46 = vpop.permute.xlu1 %452 }
  0xef   : > { %v460_v33 = vmul.f32 %v1419_v58, %v453_v46  ;;  %v412_v49 = vpop.permute.xlu0 %411 }
  0xf0   : > { %v444_v53 = vmul.f32 %v1384_v36, %v412_v49 }
  0xf1   : > { %v489_v54 = vmul.f32 %v472_v48, %v460_v33 }
  0xf2   : > { %v448_v55 = vadd.f32 %v444_v53, %v403_v29  ;;  %v582_v41 = vpop.permute.xlu1 %581 }
  0xf3   : > { %v586_v35 = vmul.f32 %v1419_v58, %v582_v41  ;;  %v500_v56 = vpop.permute.xlu0 %499 }
  0xf4   : > { %v493_v4 = vadd.f32 %v489_v54, %v448_v55  ;;  %v506_v51 = vmul.f32 %v1414_v52, %v500_v56 }
  0xf5   : > { %v615_v57 = vmul.f32 %v1411_v50, %v586_v35 }
  0xf6   : > { %v535_v59 = vmul.f32 %v1409_v47, %v506_v51  ;;  %v600_v60 = vpop.permute.xlu1 %599 }
  0xf7   : > { %v619_v61 = vadd.f32 %v615_v57, %v574_v28  ;;  %v550_v62 = vpop.permute.xlu0 %549 }
  0xf8   : > { %v539_v63 = vadd.f32 %v535_v59, %v494_v39  ;;  %v567_v5 = vmul.f32 %v550_v62, %v1284_v6 }
  0xfa   : > { %v696_v0 = vpop.permute.xlu1 %695  ;;  %v572_v21 = vadd.f32 %v568_v18, %v539_v63 }
  0xfb   : > { %v650_v1 = vpop.permute.xlu0 %649 }
  0xfe   : > { %v580_v36 = vpop.permute.xlu1 %579 }
  0xff   : > { %v585_v48 = vmul.f32 %v1419_v58, %v580_v36  ;;  %v498_v7 = vpop.permute.xlu0 %497 }
 0x100   : > { %v505_v8 = vmul.f32 %v1414_v52, %v498_v7 }
 0x101   : > { %v614_v9 = vmul.f32 %v605_v45, %v585_v48 }
 0x102   : > { %v534_v10 = vmul.f32 %v517_v43, %v505_v8  ;;  %v595_v11 = vpop.permute.xlu1 %594 }
 0x103   : > { %v618_v12 = vadd.f32 %v614_v9, %v573_v40  ;;  %v627_v13 = vpop.permute.xlu0 %626 }
 0x104   : > { %v538_v50 = vadd.f32 %v534_v10, %v493_v4  ;;  %v631_v47 = vmul.f32 %v1414_v52, %v627_v13 }
 0x106   : > { %v660_v3 = vmul.f32 %v655_v44, %v631_v47  ;;  %v691_v14 = vpop.permute.xlu1 %690  ;;  %v571_v27 = vadd.f32 %v567_v5, %v538_v50 }
 0x107   : > { %v645_v15 = vpop.permute.xlu0 %644 }
 0x108   : > { %v664_v16 = vadd.f32 %v660_v3, %v619_v61  ;;  %v752_v3 = vld [vmem:[%s1479_s4 + $0x8] sm:$0xff] }
 0x10a   : > { %v578_v17 = vpop.permute.xlu1 %577 }
 0x10b   : > { %v584_v19 = vmul.f32 %v1419_v58, %v578_v17  ;;  %v741_v20 = vpop.permute.xlu0 %740 }
 0x10d   : > { %v613_v22 = vmul.f32 %v600_v60, %v584_v19 }
 0x10e   : > { %v640_v23 = vpop.permute.xlu1 %639 }
 0x10f   : > { %v617_v24 = vadd.f32 %v613_v22, %v572_v21  ;;  %v625_v25 = vpop.permute.xlu0 %624 }
 0x110   : > { %v630_v26 = vmul.f32 %v1414_v52, %v625_v25 }
 0x112   : > { %v659_v28 = vmul.f32 %v650_v1, %v630_v26  ;;  %v736_v29 = vpop.permute.xlu1 %735 }
 0x113   : > { %v686_v31 = vpop.permute.xlu0 %685 }
 0x114   : > { %v663_v32 = vadd.f32 %v659_v28, %v618_v12 }
 0x116   : > { %v623_v37 = vpop.permute.xlu1 %622 }
 0x117   : > { %v629_v30 = vmul.f32 %v1414_v52, %v623_v37  ;;  %v576_v34 = vpop.permute.xlu0 %575 }
 0x118   : > { %v583_v2 = vmul.f32 %v1419_v58, %v576_v34 }
 0x119   : > { %v658_v38 = vmul.f32 %v645_v15, %v629_v30 }
 0x11a   : > { %v612_v39 = vmul.f32 %v595_v11, %v583_v2  ;;  %v713_v40 = vpop.permute.xlu1 %712 }
 0x11b   : > { %v717_v42 = vmul.f32 %v1419_v58, %v713_v40  ;;  %v672_v43 = vpop.permute.xlu0 %671  ;;  %v662_v44 = vadd.f32 %v658_v38, %v617_v24 }
 0x11c   : > { %v616_v45 = vadd.f32 %v612_v39, %v571_v27  ;;  %v701_v46 = vmul.f32 %v696_v0, %v672_v43 }
 0x11d   : > { %v746_v33 = vmul.f32 %v741_v20, %v717_v42 }
 0x11e   : > { %v705_v49 = vadd.f32 %v701_v46, %v664_v16  ;;  %v731_v53 = vpop.permute.xlu1 %730 }
 0x11f   : > { %v681_v54 = vpop.permute.xlu0 %680 }
 0x120   : > { %v750_v55 = vadd.f32 %v746_v33, %v705_v49 }
 0x122   : > { %1025 = vmatprep.subr.mxu0 %v750_v55  ;;  %1039 = vmatprep.subr.mxu1 %v750_v55  ;;  %v670_v6 = vpop.permute.xlu1 %669 }
 0x123   : > { %1026 = vmatpush3.msra.mxu0 %v750_v55  ;;  %1043 = vmatpush3.msra.mxu1 %v750_v55  ;;  %v621_v41 = vpop.permute.xlu0 %620  ;;  %v700_v56 = vmul.f32 %v691_v14, %v670_v6 }
 0x124   : > { %v628_v35 = vmul.f32 %v1414_v52, %v621_v41 }
 0x125   : > { %v704_v61 = vadd.f32 %v700_v56, %v663_v32 }
 0x126   : > { %v657_v4 = vmul.f32 %v640_v23, %v628_v35  ;;  %v726_v51 = vpop.permute.xlu1 %725 }
 0x127   : > { %v711_v57 = vpop.permute.xlu0 %710 }
 0x128   : > { %v716_v59 = vmul.f32 %v1419_v58, %v711_v57  ;;  %v661_v60 = vadd.f32 %v657_v4, %v616_v45 }
 0x12a   : > { %v745_v62 = vmul.f32 %v736_v29, %v716_v59  ;;  %v709_v63 = vpop.permute.xlu1 %708 }
 0x12b   : > { %v715_v0 = vmul.f32 %v1419_v58, %v709_v63  ;;  %v668_v1 = vpop.permute.xlu0 %667 }
 0x12c   : > { %v749_v36 = vadd.f32 %v745_v62, %v704_v61  ;;  %v699_v48 = vmul.f32 %v686_v31, %v668_v1 }
 0x12d   : > { %v744_v7 = vmul.f32 %v731_v53, %v715_v0 }
 0x12e   : > { %v703_v8 = vadd.f32 %v699_v48, %v662_v44  ;;  %1027 = vmatprep.subr.mxu0 %v749_v36  ;;  %1040 = vmatprep.subr.mxu1 %v749_v36  ;;  %v707_v52 = vpop.permute.xlu1 %706 }
 0x12f   : > { %v714_v9 = vmul.f32 %v1419_v58, %v707_v52  ;;  %1028 = vmatpush3.msra.mxu0 %v749_v36  ;;  %1044 = vmatpush3.msra.mxu1 %v749_v36  ;;  %v666_v10 = vpop.permute.xlu0 %665  ;;  %v754_v58 = vld [vmem:[%s1479_s4 + $0x18] sm:$0xff] }
 0x130   : > { %v748_v11 = vadd.f32 %v744_v7, %v703_v8  ;;  %v698_v12 = vmul.f32 %v681_v54, %v666_v10 }
 0x131   : > { %v743_v13 = vmul.f32 %v726_v51, %v714_v9 }
 0x132   : > { %v702_v50 = vadd.f32 %v698_v12, %v661_v60  ;;  %1029 = vmatprep.subr.mxu0 %v748_v11  ;;  %1041 = vmatprep.subr.mxu1 %v748_v11  ;;  %v767_v14 = vpop.permute.xlu1 %766 }
 0x133   : > { %1030 = vmatpush3.msra.mxu0 %v748_v11  ;;  %1045 = vmatpush3.msra.mxu1 %v748_v11  ;;  %v762_v15 = vpop.permute.xlu0 %761 }
 0x134   : > { %v747_v47 = vadd.f32 %v743_v13, %v702_v50 }
 0x136   : > { %1031 = vmatprep.subr.mxu0 %v747_v47  ;;  %1042 = vmatprep.subr.mxu1 %v747_v47  ;;  %v777_v16 = vpop.permute.xlu1 %776 }
 0x137   : > { %1032 = vmatpush3.msra.mxu0 %v747_v47  ;;  %1046 = vmatpush3.msra.mxu1 %v747_v47  ;;  %v772_v19 = vpop.permute.xlu0 %771 }
 0x138   : > { %1034 = vmatmul.mubr.msk.f32.vlgmr.msra.gmra.mxu0 %vm779_vm1, %v752_v3  ;;  %1037 = vmatmul.mubr.msk.f32.vlgmr.msra.gmra.mxu1 %vm779_vm1, %v754_v58 }
 0x1f8   : > { %v1035_v17 = vpop.f32.mrf.mxu0  ;;  %v1038_v18 = vpop.f32.mrf.mxu1 }
 0x1f9   : > { %v864_v20 = vadd.f32 %v1035_v17, %v767_v14  ;;  %v874_v21 = vadd.f32 %v1038_v18, %v777_v16 }
 0x1fa   : > { %v858_v22 = vpop.f32.mrf.mxu0  ;;  %v868_v23 = vpop.f32.mrf.mxu1 }
 0x1fb   : > { %878 = vst.msk [vmem:[%s285_s27 + $0x8] sm:$0xff] %vm338_vm0, %v864_v20  ;;  %880 = vst.msk [vmem:[%s285_s27 + $0x18] sm:$0xff] %vm338_vm0, %v874_v21  ;;  %v859_v24 = vadd.f32 %v858_v22, %v762_v15  ;;  %v869_v25 = vadd.f32 %v868_v23, %v772_v19 }
 0x1fd   : > { %877 = vst.msk [vmem:[%s285_s27] sm:$0xff] %vm338_vm0, %v859_v24  ;;  %879 = vst.msk [vmem:[%s285_s27 + $0x10] sm:$0xff] %vm338_vm0, %v869_v25 }
 0x1fe PF: > { %s17_s21 = sadd.s32 1, %s1119_s21  }
 0x1ff   : > { %p14_p1 = scmp.ge.s32.totalorder %s17_s21, 4  }
 0x201   :  { %16 = sbr.rel (!%p14_p1) target bundleno = 1 (0x1), region = 90 }
 0x206   :  { %902 = vsyncpa [#allocation4], 1 }
 0x207   :  { %904 = vsyncpa [#allocation4 + $0x1], 1 }

</bundles_post_ra>
